<compile_context>
chip_gen: v5e
topology: v5e:2x2
jax: 0.10.0
libtpu: 0.0.40
codegen_flags: <defaults>
</compile_context>

<pallas_src>
import functools

import numpy as np
import jax
import jax.numpy as jnp
from jax import lax
from jax.experimental import pallas as pl
from jax.experimental.pallas import tpu as pltpu

EPS = 1e-5          # InstanceNorm3d default eps
NEG_SLOPE = 0.2     # LeakyReLU slope


def _round_up(v, m):
    return (v + m - 1) // m * m


def _pick_cout_block(cout, target=128):
    """Largest divisor of cout that is a multiple of 8 and <= target; else cout itself."""
    if cout <= target:
        return cout
    cb = (target // 8) * 8
    while cb >= 8:
        if cout % cb == 0:
            return cb
        cb -= 8
    return cout


def _pick_tap_group(n_taps, cin, k_target=256):
    """Largest divisor G of n_taps with G*cin <= k_target: folds G taps into one MXU K dim."""
    for g in range(n_taps, 0, -1):
        if n_taps % g == 0 and g * cin <= k_target:
            return g
    return 1


# --------------------------------------------------------------------------------------- kernels
def _conv_stats_kernel(xa_ref, xh_ref, w_ref, m_ref, y_ref, stats_ref, *, group_offsets):
    """Pass 1: implicit-im2col conv (bias-free, tap-folded) + streaming sum / sum-of-squares.

    xa_ref   : [Cin, TILE_S]        bf16  flat padded-input tile s
    xh_ref   : [Cin, HALO]          bf16  narrow halo (HALO >= off_max, 128-multiple)
    w_ref    : [nG, Cout_blk, G*Cin] bf16 folded weights (tap-major / cin-minor per group)
    m_ref    : [1, TILE_S]          f32   1.0 on valid output voxels, 0.0 elsewhere
    y_ref    : [Cout_blk, TILE_S]   bf16  raw conv output tile (lane-dense store)
    stats_ref: [Cout_blk, 2]        f32   [sum(y), sum(y*y)] per (n, c); resident across s
    """
    s = pl.program_id(2)
    tile_s = y_ref.shape[-1]

    # Combined window: tile s plus its narrow halo.  xw[:, q] == x_flat[:, s*TILE_S + q].
    xw = jnp.concatenate([xa_ref[...], xh_ref[...]], axis=-1)          # [Cin, TILE_S + HALO]

    acc = None
    for g, offs in enumerate(group_offsets):
        # Implicit im2col for this tap group: stack G shifted windows along the contraction dim.
        xg = jnp.concatenate([xw[:, off:off + tile_s] for off in offs], axis=0)  # [G*Cin, TILE_S]
        part = jnp.dot(w_ref[g], xg, preferred_element_type=jnp.float32)         # MXU, K = G*Cin
        acc = part if acc is None else acc + part

    # bf16 intermediate (pass 2 is HBM-bound); stats come from the f32 accumulator below.
    y_ref[...] = acc.astype(y_ref.dtype)

    masked = acc * m_ref[...]                                          # zero non-output positions
    ps = jnp.concatenate(
        [jnp.sum(masked, axis=-1, keepdims=True),
         jnp.sum(masked * masked, axis=-1, keepdims=True)], axis=-1)   # [Cout_blk, 2]

    @pl.when(s == 0)
    def _init():
        stats_ref[...] = jnp.zeros_like(stats_ref)

    stats_ref[...] += ps                                               # single merged store


def _norm_lrelu_kernel(y_ref, stats_ref, o_ref, *, inv_count):
    """Pass 2: InstanceNorm3d (affine=False) + LeakyReLU(0.2) over one output tile."""
    mean = stats_ref[:, 0:1] * inv_count                               # [Cout_blk, 1]
    var = stats_ref[:, 1:2] * inv_count - mean * mean                  # biased variance
    var = jnp.maximum(var, 0.0)                                        # guard cancellation
    inv_std = lax.rsqrt(var + EPS)                                     # EUP slot
    yn = (y_ref[...].astype(jnp.float32) - mean) * inv_std
    o_ref[...] = jnp.where(yn >= 0, yn, NEG_SLOPE * yn).astype(o_ref.dtype)


# --------------------------------------------------------------------------------------- wrapper
def disc_cbr_forward(x, weight, bias=None, *, kernel_size=4, stride=1, padding=1,
                     tile_s=1024, k_target=256, cout_block=128):
    """x: [N, Cin, D, H, W] NCDHW.  weight: [Cout, Cin, k, k, k].  bias: [Cout] (unused, see note)."""
    assert stride == 1, "disc_CBR default stride=1 is what this kernel implements"
    N, Cin, D, H, W = x.shape
    Cout = weight.shape[0]
    k = kernel_size
    Dp, Hp, Wp = D + 2 * padding, H + 2 * padding, W + 2 * padding
    Do, Ho, Wo = Dp - k + 1, Hp - k + 1, Wp - k + 1
    T = k * k * k
    P_full = Dp * Hp * Wp

    # Bias is a mathematical no-op here: InstanceNorm3d(affine=False) removes any per-channel
    # constant.  Do NOT reuse this kernel with an affine norm without re-adding the bias.
    del bias

    # Tap offsets in the flattened padded-input raster (strides Hp*Wp, Wp, 1).
    offsets = tuple(kd * Hp * Wp + kh * Wp + kw
                    for kd in range(k) for kh in range(k) for kw in range(k))
    off_max = offsets[-1]

    # Narrow halo (multiple of 128); TILE_S is a multiple of HALO so the halo block start
    # (block_index * HALO) lands exactly at (s+1)*TILE_S.
    HALO = _round_up(max(off_max, 128), 128)
    TILE_S = _round_up(max(tile_s, HALO, 128), HALO)
    ratio = TILE_S // HALO

    n_base = (Do - 1) * Hp * Wp + (Ho - 1) * Wp + Wo        # last valid output base index + 1
    nS = -(-n_base // TILE_S)
    S_axis = nS * TILE_S
    L = S_axis + HALO                                       # + trailing halo of zeros

    # Cout blocking -> extra "parallel" grid axis (keeps both v7x TensorCores busy at small N).
    Cout_blk = _pick_cout_block(Cout, cout_block)
    nCb = Cout // Cout_blk

    # Tap folding: G taps per matmul so K = G*Cin ~= k_target fills the MXU contraction dim.
    G = _pick_tap_group(T, Cin, k_target)
    nG = T // G
    K_fold = G * Cin
    group_offsets = tuple(offsets[g * G:(g + 1) * G] for g in range(nG))

    # ---- glue: zero-pad, flatten spatial (pure reshape), zero-extend, cast to bf16 ----
    xp = jnp.pad(x, ((0, 0), (0, 0), (padding,) * 2, (padding,) * 2, (padding,) * 2))
    x_flat = xp.reshape(N, Cin, P_full)
    x_flat = jnp.pad(x_flat, ((0, 0), (0, 0), (0, L - P_full))).astype(jnp.bfloat16)

    # weight [Cout, Cin, kd, kh, kw] -> [nG, Cout, G*Cin], tap-major / cin-minor inside each group
    # (must match the x_group stacking order in the kernel).
    w_taps = jnp.transpose(weight, (2, 3, 4, 0, 1)).reshape(T, Cout, Cin)
    w_fold = (w_taps.reshape(nG, G, Cout, Cin).transpose(0, 2, 1, 3)
              .reshape(nG, Cout, K_fold).astype(jnp.bfloat16))

    # Validity mask over base positions (only real output voxels enter the statistics).
    p = np.arange(S_axis)
    d_i = p // (Hp * Wp)
    h_i = (p % (Hp * Wp)) // Wp
    w_i = p % Wp
    valid = (d_i < Do) & (h_i < Ho) & (w_i < Wo)
    mask = jnp.asarray(valid.astype(np.float32)[None, :])   # [1, S_axis]

    count = Do * Ho * Wo

    # ------------------------------- pass 1: conv + streaming stats -------------------------------
    conv_kernel = functools.partial(_conv_stats_kernel, group_offsets=group_offsets)
    flops = 2 * N * nS * Cout * T * Cin * TILE_S
    bytes_accessed = (N * nCb * nS * Cin * (TILE_S + HALO) * 2 + w_fold.size * 2 + mask.size * 4
                      + N * Cout * S_axis * 2 + N * Cout * 2 * 4)

    y_raw, stats = pl.pallas_call(
        conv_kernel,
        out_shape=(
            jax.ShapeDtypeStruct((N, Cout, S_axis), jnp.bfloat16),   # raw conv output (pre-norm)
            jax.ShapeDtypeStruct((N, Cout, 2), jnp.float32),         # per-(n,c) [sum, sumsq]
        ),
        grid_spec=pltpu.PrefetchScalarGridSpec(
            num_scalar_prefetch=0,
            grid=(N, nCb, nS),
            in_specs=[
                pl.BlockSpec((None, Cin, TILE_S), lambda n, cb, s: (n, 0, s)),              # tile s
                pl.BlockSpec((None, Cin, HALO), lambda n, cb, s: (n, 0, (s + 1) * ratio)),  # halo
                pl.BlockSpec((nG, Cout_blk, K_fold), lambda n, cb, s: (0, cb, 0)),          # weights
                pl.BlockSpec((1, TILE_S), lambda n, cb, s: (0, s)),                         # mask
            ],
            out_specs=[
                pl.BlockSpec((None, Cout_blk, TILE_S), lambda n, cb, s: (n, cb, s)),
                pl.BlockSpec((None, Cout_blk, 2), lambda n, cb, s: (n, cb, 0)),             # resident
            ],
        ),
        compiler_params=pltpu.CompilerParams(
            dimension_semantics=("parallel", "parallel", "arbitrary"),
            vmem_limit_bytes=32 * 1024 * 1024),
        cost_estimate=pl.CostEstimate(flops=int(flops), transcendentals=0,
                                      bytes_accessed=int(bytes_accessed)),
    )(x_flat, x_flat, w_fold, mask)

    # ------------------------------- pass 2: normalize + LeakyReLU --------------------------------
    norm_kernel = functools.partial(_norm_lrelu_kernel, inv_count=1.0 / count)
    out_flat = pl.pallas_call(
        norm_kernel,
        out_shape=jax.ShapeDtypeStruct((N, Cout, S_axis), x.dtype),
        grid_spec=pltpu.PrefetchScalarGridSpec(
            num_scalar_prefetch=0,
            grid=(N, nCb, nS),
            in_specs=[
                pl.BlockSpec((None, Cout_blk, TILE_S), lambda n, cb, s: (n, cb, s)),
                pl.BlockSpec((None, Cout_blk, 2), lambda n, cb, s: (n, cb, 0)),
            ],
            out_specs=pl.BlockSpec((None, Cout_blk, TILE_S), lambda n, cb, s: (n, cb, s)),
        ),
        compiler_params=pltpu.CompilerParams(
            dimension_semantics=("parallel", "parallel", "parallel"),
            vmem_limit_bytes=32 * 1024 * 1024),
        cost_estimate=pl.CostEstimate(
            flops=int(6 * N * Cout * S_axis),
            transcendentals=int(N * Cout),
            bytes_accessed=int(N * Cout * S_axis * (2 + x.dtype.itemsize) + N * Cout * 2 * 4)),
    )(y_raw, stats)

    # Un-flatten: the flat axis uses padded-grid strides, so view as (Dp, Hp, Wp) and crop.
    # The [N, Cout, ...] layout is already NCDHW -> no final transpose.
    if S_axis >= P_full:
        flat = out_flat[:, :, :P_full]
    else:
        flat = jnp.pad(out_flat, ((0, 0), (0, 0), (0, P_full - S_axis)))
    return flat.reshape(N, Cout, Dp, Hp, Wp)[:, :, :Do, :Ho, :Wo]


# ------------------------------------------------------------------------------------- reference
def reference(x, weight, bias):
    """Pure-JAX (f32) reference of the PyTorch module's forward."""
    y = lax.conv_general_dilated(
        x, weight, window_strides=(1, 1, 1), padding=[(1, 1)] * 3,
        dimension_numbers=("NCDHW", "OIDHW", "NCDHW"))
    y = y + bias.reshape(1, -1, 1, 1, 1)
    mean = y.mean(axis=(2, 3, 4), keepdims=True)
    var = ((y - mean) ** 2).mean(axis=(2, 3, 4), keepdims=True)
    yn = (y - mean) / jnp.sqrt(var + EPS)
    return jnp.where(yn >= 0, yn, NEG_SLOPE * yn)


if __name__ == "__main__":
    # small shapes: batch=2, in_ch=4, out_ch=8, spatial 8^3  ->  output 2 x 8 x 7 x 7 x 7
    N, Cin, Cout, Dm = 2, 4, 8, 8
    key = jax.random.PRNGKey(0)
    kx, kw, kb = jax.random.split(key, 3)

    x = jax.random.normal(kx, (N, Cin, Dm, Dm, Dm), dtype=jnp.float32)
    weight = 0.1 * jax.random.normal(kw, (Cout, Cin, 4, 4, 4), dtype=jnp.float32)
    bias = 0.1 * jax.random.normal(kb, (Cout,), dtype=jnp.float32)

    out = jax.block_until_ready(disc_cbr_forward(x, weight, bias))
    ref = jax.block_until_ready(reference(x, weight, bias))

    # bf16 matmul inputs + bf16 pre-norm intermediate (f32 accumulation/stats) -> loose tolerance.
    if not bool(jnp.allclose(out, ref, rtol=5e-2, atol=5e-2)):
        err = float(jnp.max(jnp.abs(out - ref)))
        raise AssertionError(f"Pallas disc_CBR output mismatch vs JAX reference (max abs err {err})")

    print("KERNEL_OK")
</pallas_src>

<mosaic_0001>
module attributes {stable_mosaic.version = 11 : i64} {
  func.func @_conv_stats_kernel(%arg0: i32, %arg1: i32, %arg2: i32, %arg3: memref<1x4x1152xbf16, #tpu.memory_space<vmem>>, %arg4: memref<1x4x384xbf16, #tpu.memory_space<vmem>>, %arg5: memref<1x8x256xbf16, #tpu.memory_space<vmem>>, %arg6: memref<1x1152xf32, #tpu.memory_space<vmem>>, %arg7: memref<1x8x1152xbf16, #tpu.memory_space<vmem>>, %arg8: memref<1x8x2xf32, #tpu.memory_space<vmem>>) attributes {dimension_semantics = [#tpu.dimension_semantics<parallel>, #tpu.dimension_semantics<parallel>, #tpu.dimension_semantics<arbitrary>], iteration_bounds = array<i64: 2, 1, 1>, scalar_prefetch = 0 : i64, scratch_operands = 0 : i64, tpu.core_type = #tpu.core_type<tc>, window_params = [{transform_indices = @transform_0, window_bounds = array<i64: 1, 4, 1152>}, {transform_indices = @transform_1, window_bounds = array<i64: 1, 4, 384>}, {transform_indices = @transform_2, window_bounds = array<i64: 1, 8, 256>}, {transform_indices = @transform_3, window_bounds = array<i64: 1, 1152>}, {transform_indices = @transform_4, window_bounds = array<i64: 1, 8, 1152>}, {transform_indices = @transform_5, window_bounds = array<i64: 1, 8, 2>}]} {
    %c0 = arith.constant 0 : index
    %c0_0 = arith.constant 0 : index
    %c0_1 = arith.constant 0 : index
    %0 = vector.load %arg3[%c0, %c0_0, %c0_1] : memref<1x4x1152xbf16, #tpu.memory_space<vmem>>, vector<1x4x1152xbf16>
    %1 = vector.shape_cast %0 : vector<1x4x1152xbf16> to vector<4x1152xbf16>
    %c0_2 = arith.constant 0 : index
    %c0_3 = arith.constant 0 : index
    %c0_4 = arith.constant 0 : index
    %2 = vector.load %arg4[%c0_2, %c0_3, %c0_4] : memref<1x4x384xbf16, #tpu.memory_space<vmem>>, vector<1x4x384xbf16>
    %3 = vector.shape_cast %2 : vector<1x4x384xbf16> to vector<4x384xbf16>
    %4 = tpu.concatenate %1, %3 in 1 : vector<4x1152xbf16>, vector<4x384xbf16> -> vector<4x1536xbf16>
    %5 = vector.extract_strided_slice %4 {offsets = [0, 0], sizes = [4, 1152], strides = [1, 1]} : vector<4x1536xbf16> to vector<4x1152xbf16>
    %6 = vector.extract_strided_slice %4 {offsets = [0, 1], sizes = [4, 1152], strides = [1, 1]} : vector<4x1536xbf16> to vector<4x1152xbf16>
    %7 = vector.extract_strided_slice %4 {offsets = [0, 2], sizes = [4, 1152], strides = [1, 1]} : vector<4x1536xbf16> to vector<4x1152xbf16>
    %8 = vector.extract_strided_slice %4 {offsets = [0, 3], sizes = [4, 1152], strides = [1, 1]} : vector<4x1536xbf16> to vector<4x1152xbf16>
    %9 = vector.extract_strided_slice %4 {offsets = [0, 10], sizes = [4, 1152], strides = [1, 1]} : vector<4x1536xbf16> to vector<4x1152xbf16>
    %10 = vector.extract_strided_slice %4 {offsets = [0, 11], sizes = [4, 1152], strides = [1, 1]} : vector<4x1536xbf16> to vector<4x1152xbf16>
    %11 = vector.extract_strided_slice %4 {offsets = [0, 12], sizes = [4, 1152], strides = [1, 1]} : vector<4x1536xbf16> to vector<4x1152xbf16>
    %12 = vector.extract_strided_slice %4 {offsets = [0, 13], sizes = [4, 1152], strides = [1, 1]} : vector<4x1536xbf16> to vector<4x1152xbf16>
    %13 = vector.extract_strided_slice %4 {offsets = [0, 20], sizes = [4, 1152], strides = [1, 1]} : vector<4x1536xbf16> to vector<4x1152xbf16>
    %14 = vector.extract_strided_slice %4 {offsets = [0, 21], sizes = [4, 1152], strides = [1, 1]} : vector<4x1536xbf16> to vector<4x1152xbf16>
    %15 = vector.extract_strided_slice %4 {offsets = [0, 22], sizes = [4, 1152], strides = [1, 1]} : vector<4x1536xbf16> to vector<4x1152xbf16>
    %16 = vector.extract_strided_slice %4 {offsets = [0, 23], sizes = [4, 1152], strides = [1, 1]} : vector<4x1536xbf16> to vector<4x1152xbf16>
    %17 = vector.extract_strided_slice %4 {offsets = [0, 30], sizes = [4, 1152], strides = [1, 1]} : vector<4x1536xbf16> to vector<4x1152xbf16>
    %18 = vector.extract_strided_slice %4 {offsets = [0, 31], sizes = [4, 1152], strides = [1, 1]} : vector<4x1536xbf16> to vector<4x1152xbf16>
    %19 = vector.extract_strided_slice %4 {offsets = [0, 32], sizes = [4, 1152], strides = [1, 1]} : vector<4x1536xbf16> to vector<4x1152xbf16>
    %20 = vector.extract_strided_slice %4 {offsets = [0, 33], sizes = [4, 1152], strides = [1, 1]} : vector<4x1536xbf16> to vector<4x1152xbf16>
    %21 = vector.extract_strided_slice %4 {offsets = [0, 100], sizes = [4, 1152], strides = [1, 1]} : vector<4x1536xbf16> to vector<4x1152xbf16>
    %22 = vector.extract_strided_slice %4 {offsets = [0, 101], sizes = [4, 1152], strides = [1, 1]} : vector<4x1536xbf16> to vector<4x1152xbf16>
    %23 = vector.extract_strided_slice %4 {offsets = [0, 102], sizes = [4, 1152], strides = [1, 1]} : vector<4x1536xbf16> to vector<4x1152xbf16>
    %24 = vector.extract_strided_slice %4 {offsets = [0, 103], sizes = [4, 1152], strides = [1, 1]} : vector<4x1536xbf16> to vector<4x1152xbf16>
    %25 = vector.extract_strided_slice %4 {offsets = [0, 110], sizes = [4, 1152], strides = [1, 1]} : vector<4x1536xbf16> to vector<4x1152xbf16>
    %26 = vector.extract_strided_slice %4 {offsets = [0, 111], sizes = [4, 1152], strides = [1, 1]} : vector<4x1536xbf16> to vector<4x1152xbf16>
    %27 = vector.extract_strided_slice %4 {offsets = [0, 112], sizes = [4, 1152], strides = [1, 1]} : vector<4x1536xbf16> to vector<4x1152xbf16>
    %28 = vector.extract_strided_slice %4 {offsets = [0, 113], sizes = [4, 1152], strides = [1, 1]} : vector<4x1536xbf16> to vector<4x1152xbf16>
    %29 = vector.extract_strided_slice %4 {offsets = [0, 120], sizes = [4, 1152], strides = [1, 1]} : vector<4x1536xbf16> to vector<4x1152xbf16>
    %30 = vector.extract_strided_slice %4 {offsets = [0, 121], sizes = [4, 1152], strides = [1, 1]} : vector<4x1536xbf16> to vector<4x1152xbf16>
    %31 = vector.extract_strided_slice %4 {offsets = [0, 122], sizes = [4, 1152], strides = [1, 1]} : vector<4x1536xbf16> to vector<4x1152xbf16>
    %32 = vector.extract_strided_slice %4 {offsets = [0, 123], sizes = [4, 1152], strides = [1, 1]} : vector<4x1536xbf16> to vector<4x1152xbf16>
    %33 = vector.extract_strided_slice %4 {offsets = [0, 130], sizes = [4, 1152], strides = [1, 1]} : vector<4x1536xbf16> to vector<4x1152xbf16>
    %34 = vector.extract_strided_slice %4 {offsets = [0, 131], sizes = [4, 1152], strides = [1, 1]} : vector<4x1536xbf16> to vector<4x1152xbf16>
    %35 = vector.extract_strided_slice %4 {offsets = [0, 132], sizes = [4, 1152], strides = [1, 1]} : vector<4x1536xbf16> to vector<4x1152xbf16>
    %36 = vector.extract_strided_slice %4 {offsets = [0, 133], sizes = [4, 1152], strides = [1, 1]} : vector<4x1536xbf16> to vector<4x1152xbf16>
    %37 = vector.extract_strided_slice %4 {offsets = [0, 200], sizes = [4, 1152], strides = [1, 1]} : vector<4x1536xbf16> to vector<4x1152xbf16>
    %38 = vector.extract_strided_slice %4 {offsets = [0, 201], sizes = [4, 1152], strides = [1, 1]} : vector<4x1536xbf16> to vector<4x1152xbf16>
    %39 = vector.extract_strided_slice %4 {offsets = [0, 202], sizes = [4, 1152], strides = [1, 1]} : vector<4x1536xbf16> to vector<4x1152xbf16>
    %40 = vector.extract_strided_slice %4 {offsets = [0, 203], sizes = [4, 1152], strides = [1, 1]} : vector<4x1536xbf16> to vector<4x1152xbf16>
    %41 = vector.extract_strided_slice %4 {offsets = [0, 210], sizes = [4, 1152], strides = [1, 1]} : vector<4x1536xbf16> to vector<4x1152xbf16>
    %42 = vector.extract_strided_slice %4 {offsets = [0, 211], sizes = [4, 1152], strides = [1, 1]} : vector<4x1536xbf16> to vector<4x1152xbf16>
    %43 = vector.extract_strided_slice %4 {offsets = [0, 212], sizes = [4, 1152], strides = [1, 1]} : vector<4x1536xbf16> to vector<4x1152xbf16>
    %44 = vector.extract_strided_slice %4 {offsets = [0, 213], sizes = [4, 1152], strides = [1, 1]} : vector<4x1536xbf16> to vector<4x1152xbf16>
    %45 = vector.extract_strided_slice %4 {offsets = [0, 220], sizes = [4, 1152], strides = [1, 1]} : vector<4x1536xbf16> to vector<4x1152xbf16>
    %46 = vector.extract_strided_slice %4 {offsets = [0, 221], sizes = [4, 1152], strides = [1, 1]} : vector<4x1536xbf16> to vector<4x1152xbf16>
    %47 = vector.extract_strided_slice %4 {offsets = [0, 222], sizes = [4, 1152], strides = [1, 1]} : vector<4x1536xbf16> to vector<4x1152xbf16>
    %48 = vector.extract_strided_slice %4 {offsets = [0, 223], sizes = [4, 1152], strides = [1, 1]} : vector<4x1536xbf16> to vector<4x1152xbf16>
    %49 = vector.extract_strided_slice %4 {offsets = [0, 230], sizes = [4, 1152], strides = [1, 1]} : vector<4x1536xbf16> to vector<4x1152xbf16>
    %50 = vector.extract_strided_slice %4 {offsets = [0, 231], sizes = [4, 1152], strides = [1, 1]} : vector<4x1536xbf16> to vector<4x1152xbf16>
    %51 = vector.extract_strided_slice %4 {offsets = [0, 232], sizes = [4, 1152], strides = [1, 1]} : vector<4x1536xbf16> to vector<4x1152xbf16>
    %52 = vector.extract_strided_slice %4 {offsets = [0, 233], sizes = [4, 1152], strides = [1, 1]} : vector<4x1536xbf16> to vector<4x1152xbf16>
    %53 = vector.extract_strided_slice %4 {offsets = [0, 300], sizes = [4, 1152], strides = [1, 1]} : vector<4x1536xbf16> to vector<4x1152xbf16>
    %54 = vector.extract_strided_slice %4 {offsets = [0, 301], sizes = [4, 1152], strides = [1, 1]} : vector<4x1536xbf16> to vector<4x1152xbf16>
    %55 = vector.extract_strided_slice %4 {offsets = [0, 302], sizes = [4, 1152], strides = [1, 1]} : vector<4x1536xbf16> to vector<4x1152xbf16>
    %56 = vector.extract_strided_slice %4 {offsets = [0, 303], sizes = [4, 1152], strides = [1, 1]} : vector<4x1536xbf16> to vector<4x1152xbf16>
    %57 = vector.extract_strided_slice %4 {offsets = [0, 310], sizes = [4, 1152], strides = [1, 1]} : vector<4x1536xbf16> to vector<4x1152xbf16>
    %58 = vector.extract_strided_slice %4 {offsets = [0, 311], sizes = [4, 1152], strides = [1, 1]} : vector<4x1536xbf16> to vector<4x1152xbf16>
    %59 = vector.extract_strided_slice %4 {offsets = [0, 312], sizes = [4, 1152], strides = [1, 1]} : vector<4x1536xbf16> to vector<4x1152xbf16>
    %60 = vector.extract_strided_slice %4 {offsets = [0, 313], sizes = [4, 1152], strides = [1, 1]} : vector<4x1536xbf16> to vector<4x1152xbf16>
    %61 = vector.extract_strided_slice %4 {offsets = [0, 320], sizes = [4, 1152], strides = [1, 1]} : vector<4x1536xbf16> to vector<4x1152xbf16>
    %62 = vector.extract_strided_slice %4 {offsets = [0, 321], sizes = [4, 1152], strides = [1, 1]} : vector<4x1536xbf16> to vector<4x1152xbf16>
    %63 = vector.extract_strided_slice %4 {offsets = [0, 322], sizes = [4, 1152], strides = [1, 1]} : vector<4x1536xbf16> to vector<4x1152xbf16>
    %64 = vector.extract_strided_slice %4 {offsets = [0, 323], sizes = [4, 1152], strides = [1, 1]} : vector<4x1536xbf16> to vector<4x1152xbf16>
    %65 = vector.extract_strided_slice %4 {offsets = [0, 330], sizes = [4, 1152], strides = [1, 1]} : vector<4x1536xbf16> to vector<4x1152xbf16>
    %66 = vector.extract_strided_slice %4 {offsets = [0, 331], sizes = [4, 1152], strides = [1, 1]} : vector<4x1536xbf16> to vector<4x1152xbf16>
    %67 = vector.extract_strided_slice %4 {offsets = [0, 332], sizes = [4, 1152], strides = [1, 1]} : vector<4x1536xbf16> to vector<4x1152xbf16>
    %68 = vector.extract_strided_slice %4 {offsets = [0, 333], sizes = [4, 1152], strides = [1, 1]} : vector<4x1536xbf16> to vector<4x1152xbf16>
    %69 = tpu.concatenate %5, %6, %7, %8, %9, %10, %11, %12, %13, %14, %15, %16, %17, %18, %19, %20 in 0 : vector<4x1152xbf16>, vector<4x1152xbf16>, vector<4x1152xbf16>, vector<4x1152xbf16>, vector<4x1152xbf16>, vector<4x1152xbf16>, vector<4x1152xbf16>, vector<4x1152xbf16>, vector<4x1152xbf16>, vector<4x1152xbf16>, vector<4x1152xbf16>, vector<4x1152xbf16>, vector<4x1152xbf16>, vector<4x1152xbf16>, vector<4x1152xbf16>, vector<4x1152xbf16> -> vector<64x1152xbf16>
    %70 = tpu.concatenate %21, %22, %23, %24, %25, %26, %27, %28, %29, %30, %31, %32, %33, %34, %35, %36 in 0 : vector<4x1152xbf16>, vector<4x1152xbf16>, vector<4x1152xbf16>, vector<4x1152xbf16>, vector<4x1152xbf16>, vector<4x1152xbf16>, vector<4x1152xbf16>, vector<4x1152xbf16>, vector<4x1152xbf16>, vector<4x1152xbf16>, vector<4x1152xbf16>, vector<4x1152xbf16>, vector<4x1152xbf16>, vector<4x1152xbf16>, vector<4x1152xbf16>, vector<4x1152xbf16> -> vector<64x1152xbf16>
    %71 = tpu.concatenate %37, %38, %39, %40, %41, %42, %43, %44, %45, %46, %47, %48, %49, %50, %51, %52 in 0 : vector<4x1152xbf16>, vector<4x1152xbf16>, vector<4x1152xbf16>, vector<4x1152xbf16>, vector<4x1152xbf16>, vector<4x1152xbf16>, vector<4x1152xbf16>, vector<4x1152xbf16>, vector<4x1152xbf16>, vector<4x1152xbf16>, vector<4x1152xbf16>, vector<4x1152xbf16>, vector<4x1152xbf16>, vector<4x1152xbf16>, vector<4x1152xbf16>, vector<4x1152xbf16> -> vector<64x1152xbf16>
    %72 = tpu.concatenate %53, %54, %55, %56, %57, %58, %59, %60, %61, %62, %63, %64, %65, %66, %67, %68 in 0 : vector<4x1152xbf16>, vector<4x1152xbf16>, vector<4x1152xbf16>, vector<4x1152xbf16>, vector<4x1152xbf16>, vector<4x1152xbf16>, vector<4x1152xbf16>, vector<4x1152xbf16>, vector<4x1152xbf16>, vector<4x1152xbf16>, vector<4x1152xbf16>, vector<4x1152xbf16>, vector<4x1152xbf16>, vector<4x1152xbf16>, vector<4x1152xbf16>, vector<4x1152xbf16> -> vector<64x1152xbf16>
    %73 = tpu.concatenate %69, %70, %71, %72 in 0 : vector<64x1152xbf16>, vector<64x1152xbf16>, vector<64x1152xbf16>, vector<64x1152xbf16> -> vector<256x1152xbf16>
    %c0_5 = arith.constant 0 : index
    %c0_6 = arith.constant 0 : index
    %c0_7 = arith.constant 0 : index
    %74 = vector.load %arg5[%c0_5, %c0_6, %c0_7] : memref<1x8x256xbf16, #tpu.memory_space<vmem>>, vector<1x8x256xbf16>
    %75 = vector.shape_cast %74 : vector<1x8x256xbf16> to vector<8x256xbf16>
    %cst = arith.constant dense<0.000000e+00> : vector<8x1152xf32>
    %76 = tpu.matmul %75, %73, %cst {dimension_numbers = #tpu.dot_dimension_numbers<[1], [0], [0], [1], [0, 0, 1, 1], [], []>} : vector<8x256xbf16>, vector<256x1152xbf16>, vector<8x1152xf32> -> vector<8x1152xf32>
    %77 = arith.truncf %76 : vector<8x1152xf32> to vector<8x1152xbf16>
    %c0_8 = arith.constant 0 : index
    %c0_9 = arith.constant 0 : index
    %c0_10 = arith.constant 0 : index
    %78 = vector.load %arg7[%c0_8, %c0_9, %c0_10] : memref<1x8x1152xbf16, #tpu.memory_space<vmem>>, vector<1x8x1152xbf16>
    %79 = vector.shape_cast %78 : vector<1x8x1152xbf16> to vector<8x1152xbf16>
    %80 = vector.shape_cast %77 : vector<8x1152xbf16> to vector<1x8x1152xbf16>
    tpu.vector_store %arg7[%c0_8, %c0_9, %c0_10], %80 {strides = array<i32>} : memref<1x8x1152xbf16, #tpu.memory_space<vmem>>, vector<1x8x1152xbf16>,
    %c0_11 = arith.constant 0 : index
    %c0_12 = arith.constant 0 : index
    %81 = vector.load %arg6[%c0_11, %c0_12] : memref<1x1152xf32, #tpu.memory_space<vmem>>, vector<1x1152xf32>
    %82 = vector.broadcast %81 : vector<1x1152xf32> to vector<8x1152xf32>
    %83 = arith.mulf %76, %82 : vector<8x1152xf32>
    %cst_13 = arith.constant dense<0.000000e+00> : vector<8xf32>
    %84 = vector.multi_reduction <add>, %83, %cst_13 [1] : vector<8x1152xf32> to vector<8xf32>
    %85 = vector.shape_cast %84 : vector<8xf32> to vector<8x1xf32>
    %86 = arith.mulf %83, %83 : vector<8x1152xf32>
    %cst_14 = arith.constant dense<0.000000e+00> : vector<8xf32>
    %87 = vector.multi_reduction <add>, %86, %cst_14 [1] : vector<8x1152xf32> to vector<8xf32>
    %88 = vector.shape_cast %87 : vector<8xf32> to vector<8x1xf32>
    %89 = tpu.concatenate %85, %88 in 1 : vector<8x1xf32>, vector<8x1xf32> -> vector<8x2xf32>
    %c0_i32 = arith.constant 0 : i32
    %90 = arith.cmpi eq, %arg2, %c0_i32 : i32
    %91 = arith.extui %90 : i1 to i32
    %c0_i32_15 = arith.constant 0 : i32
    %92 = arith.cmpi ne, %91, %c0_i32_15 : i32
    scf.if %92 {
      %cst_22 = arith.constant 0.000000e+00 : f32
      %99 = vector.broadcast %cst_22 : f32 to vector<8x2xf32>
      %c0_23 = arith.constant 0 : index
      %c0_24 = arith.constant 0 : index
      %c0_25 = arith.constant 0 : index
      %100 = vector.load %arg8[%c0_23, %c0_24, %c0_25] : memref<1x8x2xf32, #tpu.memory_space<vmem>>, vector<1x8x2xf32>
      %101 = vector.shape_cast %100 : vector<1x8x2xf32> to vector<8x2xf32>
      %102 = vector.shape_cast %99 : vector<8x2xf32> to vector<1x8x2xf32>
      tpu.vector_store %arg8[%c0_23, %c0_24, %c0_25], %102 {strides = array<i32>} : memref<1x8x2xf32, #tpu.memory_space<vmem>>, vector<1x8x2xf32>,
    } else {
    }
    %c0_16 = arith.constant 0 : index
    %c0_17 = arith.constant 0 : index
    %c0_18 = arith.constant 0 : index
    %93 = vector.load %arg8[%c0_16, %c0_17, %c0_18] : memref<1x8x2xf32, #tpu.memory_space<vmem>>, vector<1x8x2xf32>
    %94 = vector.shape_cast %93 : vector<1x8x2xf32> to vector<8x2xf32>
    %95 = arith.addf %94, %89 : vector<8x2xf32>
    %c0_19 = arith.constant 0 : index
    %c0_20 = arith.constant 0 : index
    %c0_21 = arith.constant 0 : index
    %96 = vector.load %arg8[%c0_19, %c0_20, %c0_21] : memref<1x8x2xf32, #tpu.memory_space<vmem>>, vector<1x8x2xf32>
    %97 = vector.shape_cast %96 : vector<1x8x2xf32> to vector<8x2xf32>
    %98 = vector.shape_cast %95 : vector<8x2xf32> to vector<1x8x2xf32>
    tpu.vector_store %arg8[%c0_19, %c0_20, %c0_21], %98 {strides = array<i32>} : memref<1x8x2xf32, #tpu.memory_space<vmem>>, vector<1x8x2xf32>,
    return
  }
  func.func @transform_0(%arg0: i32, %arg1: i32, %arg2: i32) -> (i32, i32, i32) {
    %c0_i32 = arith.constant 0 : i32
    %c0_i32_0 = arith.constant 0 : i32
    return %arg0, %c0_i32, %arg2 : i32, i32, i32
  }
  func.func @transform_1(%arg0: i32, %arg1: i32, %arg2: i32) -> (i32, i32, i32) {
    %c1_i32 = arith.constant 1 : i32
    %0 = arith.addi %arg2, %c1_i32 : i32
    %c3_i32 = arith.constant 3 : i32
    %1 = arith.muli %0, %c3_i32 : i32
    %c0_i32 = arith.constant 0 : i32
    %c0_i32_0 = arith.constant 0 : i32
    return %arg0, %c0_i32, %1 : i32, i32, i32
  }
  func.func @transform_2(%arg0: i32, %arg1: i32, %arg2: i32) -> (i32, i32, i32) {
    %c0_i32 = arith.constant 0 : i32
    %c0_i32_0 = arith.constant 0 : i32
    %c0_i32_1 = arith.constant 0 : i32
    return %c0_i32, %arg1, %c0_i32_0 : i32, i32, i32
  }
  func.func @transform_3(%arg0: i32, %arg1: i32, %arg2: i32) -> (i32, i32) {
    %c0_i32 = arith.constant 0 : i32
    %c0_i32_0 = arith.constant 0 : i32
    return %c0_i32, %arg2 : i32, i32
  }
  func.func @transform_4(%arg0: i32, %arg1: i32, %arg2: i32) -> (i32, i32, i32) {
    %c0_i32 = arith.constant 0 : i32
    return %arg0, %arg1, %arg2 : i32, i32, i32
  }
  func.func @transform_5(%arg0: i32, %arg1: i32, %arg2: i32) -> (i32, i32, i32) {
    %c0_i32 = arith.constant 0 : i32
    %c0_i32_0 = arith.constant 0 : i32
    return %arg0, %arg1, %c0_i32 : i32, i32, i32
  }
}

</mosaic_0001>

<bundles_post_ra>
// kernel: tpu_custom_call.1
= control target key start
LH: loop header
LB: loop body
LE: loop exit
PB: predicated region body
PF: predicated region fallthrough
CT: control target
= control target key end

     0   :  { %s5256_s0 = inlined_call_operand.hbm [shape: bf16[2,4,1536], index: 0, kind: input, shape index: {}]   ;;  %s5257_s1 = inlined_call_operand.hbm [shape: bf16[2,4,1536], index: 1, kind: input, shape index: {}]   ;;  %s5258_s2 = inlined_call_operand.hbm [shape: bf16[1,8,256], index: 2, kind: input, shape index: {}]   ;;  %s5259_s3 = inlined_call_operand.hbm [shape: f32[1,1152], index: 3, kind: input, shape index: {}]   ;;  %s5260_s4 = inlined_call_operand.hbm [shape: bf16[2,8,1152], index: 4, kind: output, shape index: {0}]   ;;  %s5261_s5 = inlined_call_operand.vmem [shape: f32[2,8,2], index: 5, kind: output, shape index: {1}]  }
   0x1   :  { %5400 = sst [smem:[#allocation124_spill]] %s5258_s2 }
   0x2   :  { %5401 = sst [smem:[#allocation125_spill]] %s5259_s3 }
   0x3   :  { %11 = vsyncpa [#allocation3], 0 }
   0x4   :  { %13 = vsyncpa [#allocation3 + $0x1], 0 }
   0x5   :  { %14 = vsyncpa [#allocation6], 0 }
   0x6   :  { %16 = vsyncpa [#allocation6 + $0x1], 0 }
   0x7   :  { %17 = vsyncpa [#allocation9], 0 }
   0x8   :  { %18 = vsyncpa [#allocation4], 0 }
   0x9   :  { %20 = vsyncpa [#allocation4 + $0x1], 0  ;;  %s2867_s18 = smov 0   ;;  %s2869_s19 = smov 0  }
   0xa   :  { %s2871_s20 = smov 0   ;;  %s2873_s21 = smov 0  }
   0xb   :  { %s2875_s22 = smov 0   ;;  %s2877_s23 = smov 0  }
   0xc LB: > { %5402 = sst [smem:[#allocation16_spill]] %s2810_s22  ;;  %s2898_s24 = sadd.s32 4294967295, %s2814_s23   ;;  %s2814_s23 = sphi %s2877_s23, %s26_s23   ;;  %s2810_s22 = sphi %s2875_s22, %s5724_s22   ;;  %s2806_s21 = sphi %s2873_s21, %s5723_s21   ;;  %s2802_s20 = sphi %s2871_s20, %s5727_s20   ;;  %s2798_s19 = sphi %s2869_s19, %s5726_s19   ;;  %s2794_s18 = sphi %s2867_s18, %s5725_s18  }
   0xd   : > { %s2470_s25 = sadd.s32 4294967294, %s2814_s23   ;;  %p67_p0 = scmp.ne.s32.totalorder %s2798_s19, %s2794_s18 }
   0xe   : > { %p68_p1 = scmp.eq.s32.totalorder %s2898_s24, 0  ;;  %p179_p2 = scmp.eq.s32.totalorder %s2898_s24, 1 }
   0xf   : > { %p185_p3 = scmp.eq.s32.totalorder %s2470_s25, 1  ;;  %p2471_p5 = scmp.ge.s32.totalorder %s2814_s23, 1 }
  0x10   : > { %p2907_p4 = por %p68_p1, %p67_p0  ;;  %p220_p7 = scmp.lt.s32.totalorder %s2814_s23, 3 }
  0x11   : > { %p2912_p6 = por %p185_p3, %p67_p0  ;;  %s5406_s2 = sld [smem:[#allocation124_spill]] }
  0x12   : > { %p2920_p8 = pnand %p2471_p5, %p220_p7  ;;  %p2474_p9 = scmp.ge.s32.totalorder %s2814_s23, 2 }
  0x13   : > { %s5404_s27 = scalar_select %p2912_p6, 1, 0 }
  0x14   : > { %p2505_p10 = pneg %p2920_p8  ;;  %s2816_s7 = smov [#allocation7]  }
  0x15   : > { %5405 = sst [smem:[#allocation17_spill]] %s5404_s27  ;;  %s237_s8 = sshll.u32 %s2816_s7, 4  ;;  %s238_s8 = int_to_ptr.vmem [resolvable:$true] %s237_s8 }
  0x16   : > { %s5408_s3 = sld [smem:[#allocation125_spill]]  ;;  %p2506_p11 = pnand %p2505_p10, %p68_p1 }
  0x17   : > { %s235_s30 = sshll.u32 %s5406_s2, 4  ;;  %s2817_s12 = smov [#allocation8]   ;;  %s236_s30 = int_to_ptr.hbm [resolvable:$true] %s235_s30 }
  0x18   : > { %s251_s13 = sshll.u32 %s2817_s12, 4  ;;  %s45_s14 = sadd.s32 1, %s2810_s22  ;;  %s252_s13 = int_to_ptr.vmem [resolvable:$true] %s251_s13 }
  0x19   : > { %2508 = dma.hbm_to_vmem [thread:$0]  (!%p2506_p11), %s236_s30, 128, %s238_s8, [#allocation6]  }
  0x1a   : > { %s54_s15 = sadd.s32 1, %s2802_s20  ;;  %p47_p12 = scmp.ge.s32.totalorder %s45_s14, 2 }
  0x1b   : > { %p61_p13 = scmp.ne.s32.totalorder %s2802_s20, %s2798_s19  ;;  %p62_p0 = scmp.eq.s32.totalorder %s2814_s23, 0 }
  0x1c   : > { %s249_s11 = sshll.u32 %s5408_s3, 4  ;;  %p2525_p3 = scmp.lt.s32.totalorder %s2814_s23, 2  ;;  %s250_s11 = int_to_ptr.hbm [resolvable:$true] %s249_s11 }
  0x1d   : > { %2511 = dma.hbm_to_vmem [thread:$0]  (!%p2506_p11), %s250_s11, 144, %s252_s13, [#allocation9]  }
  0x1e   : > { %s5729_s14 = smov (%p47_p12, %s45_s14), 0  ;;  %p63_p5 = por %p62_p0, %p61_p13 }
  0x1f   : > { %5409 = sst [smem:[#allocation18_spill]] %s5729_s14  ;;  %p2942_p7 = por %p179_p2, %p61_p13 }
  0x20   : > { %s49_s17 = ssub.s32 %s2810_s22, %s5729_s14  ;;  %s262_s25 = sand.u32 1, %s2802_s20  }
  0x21   : > { %p52_p10 = scmp.eq.s32.totalorder %s49_s17, 0  ;;  %s2484_s28 = smul.u32 18, %s262_s25 }
  0x22   : > { %p2949_p11 = pnand %p2525_p3, %p63_p5  ;;  %s2485_s7 = smul.u32 24, %s2810_s22 }
  0x23   : > { %s2954_s30 = scalar_select %p52_p10, %s2802_s20, %s54_s15  }
  0x24   : > { %s266_s8 = scalar_lea.vmem [#allocation2], %s2484_s28  ;;  %s279_s12 = scalar_lea.hbm %s5256_s0, %s2485_s7 }
  0x25   : > { %5412 = sst [smem:[#allocation19_spill]] %s2954_s30  ;;  %s284_s9 = sshll.u32 %s266_s8, 4  ;;  %s285_s9 = int_to_ptr.vmem [resolvable:$true] %s284_s9 }
  0x26   : > { %s282_s13 = sshll.u32 %s279_s12, 4  ;;  %s291_s17 = sand.u32 1, %s2814_s23   ;;  %s283_s13 = int_to_ptr.hbm [resolvable:$true] %s282_s13 }
  0x27   : > { %s263_s2 = scalar_lea.sflag [#allocation3], %s262_s25  ;;  %s2486_s3 = smul.u32 6, %s262_s25 }
  0x28   : > { %2515 = dma.hbm_to_vmem [thread:$0]  (!%p2949_p11), %s283_s13, 288, %s285_s9, %s263_s2  }
  0x29   : > { %s2356_s15 = scalar_lea.hbm %s5257_s1, %s2485_s7  ;;  %s295_s8 = scalar_lea.vmem [#allocation5], %s2486_s3 }
  0x2a   : > { %s2357_s22 = scalar_lea.hbm %s2356_s15, 18  ;;  %s308_s30 = sshll.u32 %s295_s8, 4  ;;  %s309_s30 = int_to_ptr.vmem [resolvable:$true] %s308_s30 }
  0x2b   : > { %s306_s28 = sshll.u32 %s2357_s22, 4  ;;  %s292_s10 = scalar_lea.sflag [#allocation6], %s291_s17  ;;  %s307_s28 = int_to_ptr.hbm [resolvable:$true] %s306_s28 }
  0x2c   : > { %2518 = dma.hbm_to_vmem [thread:$0]  (!%p2949_p11), %s307_s28, 96, %s309_s30, %s292_s10  }
  0x2d   : > { %317 = sbr.rel (%p2920_p8) target bundleno = 1258 (0x4ea), region = 36 }
  0x32   : > { %s2971_s2 = sand.u32 1, %s2798_s19  }
  0x33   : > { %s2487_s27 = smul.u32 18, %s2971_s2  ;;  %s320_s14 = scalar_lea.sflag [#allocation3], %s2971_s2 }
  0x35   : > { %s323_s25 = scalar_lea.vmem [#allocation2], %s2487_s27 }
  0x36   : > { %2773 = dma.done.wait (%p2907_p4), %s320_s14, 288  }
  0x37   : > { %2775 = vsyncadd (%p2907_p4), %s320_s14, 4294967008  ;;  %s329_s3 = sand.u32 1, %s2898_s24   ;;  %s2488_s22 = smul.u32 6, %s2971_s2 }
  0x38   : > { %s330_s6 = scalar_lea.sflag [#allocation6], %s329_s3 }
  0x39   : > { %s333_s29 = scalar_lea.vmem [#allocation5], %s2488_s22 }
  0x3a   : > { %2777 = dma.done.wait (%p2907_p4), %s330_s6, 96  }
  0x3b   : > { %2779 = vsyncadd (%p2907_p4), %s330_s6, 4294967200 }
  0x3c   : > { %2781 = dma.done.wait (%p68_p1), [#allocation6], 128  }
  0x3d   : > { %2783 = vsyncadd (%p68_p1), [#allocation6], 4294967168 }
  0x3e   : > { %2785 = dma.done.wait (%p68_p1), [#allocation9], 144  }
  0x3f   : > { %2787 = vsyncadd (%p68_p1), [#allocation9], 4294967152  ;;  %v401_v0 = vld [vmem:[%s323_s25 + $0x8] sm:$0xff]  ;;  %v400_v1 = vld [vmem:[%s323_s25] sm:$0xff]  ;;  %s2818_s26 = smov 127   ;;  %s2819_s24 = smov 126  }
  0x40   : > { %408 = vst [vmem:[#allocation1 + $0x20] ss:$4 sm:$0xff] %v401_v0  ;;  %v402_v7 = vld [vmem:[%s323_s25 + $0x10] sm:$0x3]  ;;  %v403_v15 = vld [vmem:[%s333_s29] sm:$0x3f] }
  0x41   : > { %405 = vst [vmem:[#allocation1] ss:$4 sm:$0xff] %v400_v1  ;;  %s2820_s30 = smov 125   ;;  %s2821_s7 = smov 118   ;;  %vm5385_vm0 = vcmask 1039360   ;;  %vm507_vm1 = vcmask 1031168  }
  0x42   : > { %s2822_s9 = smov 117   ;;  %s2823_s11 = smov 116   ;;  %vm547_vm2 = vcmask 1022976   ;;  %vm917_vm3 = vcmask 1041408   ;;  %vm936_vm4 = vcmask 1043456   ;;  %vm955_vm5 = vcmask 1045504  }
  0x43   : > { %s2824_s12 = smov 115   ;;  %s2825_s13 = smov 108   ;;  %vm607_vm6 = vcmask 957440   ;;  %vm5384_vm7 = vcmask 949248   ;;  %vm667_vm8 = vcmask 941056   ;;  %vm5390_vm9 = vcmask 965632  }
  0x44   : > { %s2826_s17 = smov 107   ;;  %s2827_s15 = smov 106   ;;  %vm727_vm10 = vcmask 875520   ;;  %vm757_vm11 = vcmask 867328   ;;  %vm697_vm12 = vcmask 883712   ;;  %vm787_vm13 = vcmask 859136  }
  0x45   : > { %s2828_s28 = smov 105   ;;  %s2829_s8 = smov 98   ;;  %vm847_vm14 = vcmask 793600   ;;  %vm817_vm15 = vcmask 801792  }
  0x46   : > { %s2830_s10 = smov 97   ;;  %s2831_s27 = smov 96  }
  0x47   : > { %v2993_v2 = vld.sshfl [vmem:[#allocation1 + $0x20] sm:$0xff pattern:$0x73625140]  ;;  %v3010_v9 = vld.sshfl [vmem:[#allocation1 + $0x28] sm:$0xff pattern:$0x73625140] }
  0x48   : > { %v2996_v3 = vrot.slane %v2993_v2, 6  ;;  %v2998_v4 = vld.sshfl [vmem:[#allocation1 + $0x10] sm:$0xff pattern:$0x73625140]  ;;  %v3021_v12 = vrot.slane %v3010_v9, 6  ;;  %v3074_v26 = vrot.slane %v2993_v2, 4 }
  0x49   : > { %v3001_v5 = vrot.slane %v2998_v4, 6  ;;  %v3003_v6 = vld.sshfl [vmem:[#allocation1] sm:$0xff pattern:$0x73625140]  ;;  %v3063_v24 = vrot.slane %v2998_v4, 4  ;;  %v3095_v31 = vrot.slane %v3010_v9, 4 }
  0x4a   : > { %455 = vrot.lane.b32.xlu2 %v2996_v3, %s2818_s26  ;;  %v3008_v8 = vrot.slane %v3003_v6, 6  ;;  %v3014_v10 = vld.sshfl [vmem:[#allocation1 + $0x18] sm:$0xff pattern:$0x73625140]  ;;  %v3060_v23 = vrot.slane %v3003_v6, 4  ;;  %v3104_v32 = vrot.slane %v3003_v6, 2 }
  0x4b   : > { %451 = vrot.lane.b32.xlu1 %v3001_v5, %s2818_s26  ;;  %v3016_v11 = vld.sshfl [vmem:[#allocation1 + $0x8] sm:$0xff pattern:$0x73625140]  ;;  %v3024_v13 = vrot.slane %v3014_v10, 6  ;;  %v3077_v27 = vrot.slane %v3014_v10, 4  ;;  %v3119_v35 = vrot.slane %v3014_v10, 2 }
  0x4c   : > { %447 = vrot.lane.b32.xlu0 %v3008_v8, %s2818_s26  ;;  %426 = vst [vmem:[#allocation1] ss:$4 sm:$0xff] %v402_v7  ;;  %v3027_v14 = vrot.slane %v3016_v11, 6  ;;  %v3037_v17 = vld.sshfl [vmem:[#allocation1 + $0x38] sm:$0xff pattern:$0x73625140] }
  0x4d   : > { %v3039_v18 = vld.sshfl [vmem:[#allocation1 + $0x30] sm:$0xff pattern:$0x73625140]  ;;  %v3042_v19 = vrot.slane %v3016_v11, 4  ;;  %v3045_v20 = vrot.slane %v3037_v17, 6  ;;  %v3089_v29 = vrot.slane %v3037_v17, 4 }
  0x4e   : > { %v3048_v21 = vrot.slane %v3039_v18, 6  ;;  %v3092_v30 = vrot.slane %v3039_v18, 4  ;;  %v3122_v36 = vrot.slane %v2998_v4, 2  ;;  %v3125_v37 = vrot.slane %v3016_v11, 2  ;;  %s2832_s14 = smov 95   ;;  %s2833_s25 = smov 28  }
  0x4f   : > { %v3134_v38 = vrot.slane %v3039_v18, 2  ;;  %v3137_v39 = vrot.slane %v3010_v9, 2  ;;  %v3140_v40 = vrot.slane %v2993_v2, 2  ;;  %v3155_v43 = vrot.slane %v3037_v17, 2  ;;  %s2834_s3 = smov 84   ;;  %s2835_s22 = smov 56  }
  0x50   : > { %s2489_s6 = smul.u32 36, %s2971_s2 }
  0x52   : > { %457 = vrot.lane.b32.xlu2 %v3021_v12, %s2818_s26  ;;  %s5191_s29 = scalar_lea.vmem [#allocation10], %s2489_s6 }
  0x53   : > { %453 = vrot.lane.b32.xlu1 %v3024_v13, %s2818_s26  ;;  %v3033_v16 = vld.sshfl [vmem:[#allocation1] sm:$0xff pattern:$0x73625140] }
  0x54   : > { %449 = vrot.lane.b32.xlu0 %v3027_v14, %s2818_s26  ;;  %430 = vst [vmem:[#allocation1] ss:$4 sm:$0xff] %v403_v15  ;;  %v3057_v22 = vrot.slane %v3033_v16, 6  ;;  %v3110_v34 = vrot.slane %v3033_v16, 4  ;;  %v3152_v42 = vrot.slane %v3033_v16, 2 }
  0x5a   : > { %489 = vrot.lane.b32.xlu2 %v3042_v19, %s2819_s24 }
  0x5b   : > { %461 = vrot.lane.b32.xlu1 %v3045_v20, %s2818_s26  ;;  %v3071_v25 = vld.sshfl [vmem:[#allocation1] sm:$0xff pattern:$0x73625140] }
  0x5c   : > { %459 = vrot.lane.b32.xlu0 %v3048_v21, %s2818_s26  ;;  %v3080_v28 = vrot.slane %v3071_v25, 6  ;;  %v3107_v33 = vrot.slane %v3071_v25, 4  ;;  %v3149_v41 = vrot.slane %v3071_v25, 2 }
  0x62   : > { %463 = vrot.lane.b32.xlu2 %v3057_v22, %s2818_s26 }
  0x63   : > { %487 = vrot.lane.b32.xlu1 %v3060_v23, %s2819_s24 }
  0x64   : > { %491 = vrot.lane.b32.xlu0 %v3063_v24, %s2819_s24 }
  0x6a   : > { %495 = vrot.lane.b32.xlu2 %v3074_v26, %s2819_s24 }
  0x6b   : > { %493 = vrot.lane.b32.xlu1 %v3077_v27, %s2819_s24 }
  0x6c   : > { %465 = vrot.lane.b32.xlu0 %v3080_v28, %s2818_s26 }
  0x72   : > { %501 = vrot.lane.b32.xlu2 %v3089_v29, %s2819_s24 }
  0x73   : > { %499 = vrot.lane.b32.xlu1 %v3092_v30, %s2819_s24 }
  0x74   : > { %497 = vrot.lane.b32.xlu0 %v3095_v31, %s2819_s24 }
  0x7a   : > { %527 = vrot.lane.b32.xlu2 %v3104_v32, %s2820_s30 }
  0x7b   : > { %505 = vrot.lane.b32.xlu1 %v3107_v33, %s2819_s24 }
  0x7c   : > { %503 = vrot.lane.b32.xlu0 %v3110_v34, %s2819_s24 }
  0x82   : > { %533 = vrot.lane.b32.xlu2 %v3119_v35, %s2820_s30 }
  0x83   : > { %531 = vrot.lane.b32.xlu1 %v3122_v36, %s2820_s30 }
  0x84   : > { %529 = vrot.lane.b32.xlu0 %v3125_v37, %s2820_s30 }
  0x8a   : > { %539 = vrot.lane.b32.xlu2 %v3134_v38, %s2820_s30 }
  0x8b   : > { %537 = vrot.lane.b32.xlu1 %v3137_v39, %s2820_s30 }
  0x8c   : > { %535 = vrot.lane.b32.xlu0 %v3140_v40, %s2820_s30 }
  0x92   : > { %545 = vrot.lane.b32.xlu2 %v3149_v41, %s2820_s30 }
  0x93   : > { %543 = vrot.lane.b32.xlu1 %v3152_v42, %s2820_s30 }
  0x94   : > { %541 = vrot.lane.b32.xlu0 %v3155_v43, %s2820_s30 }
  0x9a   : > { %561 = vrot.lane.b32.xlu2 %v2998_v4, %s2821_s7 }
  0x9b   : > { %559 = vrot.lane.b32.xlu1 %v3016_v11, %s2821_s7 }
  0x9c   : > { %557 = vrot.lane.b32.xlu0 %v3003_v6, %s2821_s7 }
  0xa2   : > { %567 = vrot.lane.b32.xlu2 %v3010_v9, %s2821_s7 }
  0xa3   : > { %565 = vrot.lane.b32.xlu1 %v2993_v2, %s2821_s7 }
  0xa4   : > { %563 = vrot.lane.b32.xlu0 %v3014_v10, %s2821_s7  ;;  %v3175_v44 = vpop.permute.xlu2 %455 }
  0xaa   : > { %573 = vrot.lane.b32.xlu2 %v3033_v16, %s2821_s7 }
  0xab   : > { %571 = vrot.lane.b32.xlu1 %v3037_v17, %s2821_s7 }
  0xac   : > { %569 = vrot.lane.b32.xlu0 %v3039_v18, %s2821_s7  ;;  %v3183_v45 = vpop.permute.xlu2 %457 }
  0xb2   : > { %589 = vrot.lane.b32.xlu2 %v3027_v14, %s2822_s9 }
  0xb3   : > { %587 = vrot.lane.b32.xlu1 %v3008_v8, %s2822_s9 }
  0xb4   : > { %575 = vrot.lane.b32.xlu0 %v3071_v25, %s2821_s7  ;;  %v3191_v46 = vpop.permute.xlu2 %489 }
  0xba   : > { %595 = vrot.lane.b32.xlu2 %v2996_v3, %s2822_s9 }
  0xbb   : > { %593 = vrot.lane.b32.xlu1 %v3024_v13, %s2822_s9 }
  0xbc   : > { %591 = vrot.lane.b32.xlu0 %v3001_v5, %s2822_s9  ;;  %v3199_v47 = vpop.permute.xlu2 %463 }
  0xbd   : > { %5413 = vst [vmem:[#allocation20_spill] sm:$0xff] %v3199_v47  ;;  %v3201_v48 = vpop.permute.xlu1 %451 }
  0xbe   : > { %v3203_v49 = vpop.permute.xlu0 %447 }
  0xc2   : > { %601 = vrot.lane.b32.xlu2 %v3045_v20, %s2822_s9 }
  0xc3   : > { %599 = vrot.lane.b32.xlu1 %v3048_v21, %s2822_s9 }
  0xc4   : > { %597 = vrot.lane.b32.xlu0 %v3021_v12, %s2822_s9  ;;  %v3211_v50 = vpop.permute.xlu2 %495 }
  0xc5   : > { %v3213_v51 = vpop.permute.xlu1 %453 }
  0xc6   : > { %v3215_v52 = vpop.permute.xlu0 %449 }
  0xca   : > { %617 = vrot.lane.b32.xlu2 %v3060_v23, %s2823_s11 }
  0xcb   : > { %605 = vrot.lane.b32.xlu1 %v3080_v28, %s2822_s9 }
  0xcc   : > { %603 = vrot.lane.b32.xlu0 %v3057_v22, %s2822_s9  ;;  %v3223_v53 = vpop.permute.xlu2 %501 }
  0xcd   : > { %5414 = vst [vmem:[#allocation21_spill] sm:$0xff] %v3223_v53  ;;  %v3225_v54 = vpop.permute.xlu1 %461 }
  0xce   : > { %5415 = vst [vmem:[#allocation22_spill] sm:$0xff] %v3225_v54  ;;  %v3227_v55 = vpop.permute.xlu0 %459 }
  0xd2   : > { %623 = vrot.lane.b32.xlu2 %v3077_v27, %s2823_s11 }
  0xd3   : > { %621 = vrot.lane.b32.xlu1 %v3063_v24, %s2823_s11 }
  0xd4   : > { %619 = vrot.lane.b32.xlu0 %v3042_v19, %s2823_s11  ;;  %v3235_v56 = vpop.permute.xlu2 %527 }
  0xd5   : > { %v3237_v57 = vpop.permute.xlu1 %487 }
  0xd6   : > { %v3239_v58 = vpop.permute.xlu0 %491 }
  0xda   : > { %629 = vrot.lane.b32.xlu2 %v3092_v30, %s2823_s11 }
  0xdb   : > { %627 = vrot.lane.b32.xlu1 %v3095_v31, %s2823_s11 }
  0xdc   : > { %625 = vrot.lane.b32.xlu0 %v3074_v26, %s2823_s11  ;;  %v3247_v59 = vpop.permute.xlu2 %533 }
  0xdd   : > { %v3249_v60 = vpop.permute.xlu1 %493 }
  0xde   : > { %v3251_v61 = vpop.permute.xlu0 %465 }
  0xdf   : > { %5416 = vst [vmem:[#allocation23_spill] sm:$0xff] %v3251_v61 }
  0xe2   : > { %635 = vrot.lane.b32.xlu2 %v3107_v33, %s2823_s11 }
  0xe3   : > { %633 = vrot.lane.b32.xlu1 %v3110_v34, %s2823_s11 }
  0xe4   : > { %631 = vrot.lane.b32.xlu0 %v3089_v29, %s2823_s11  ;;  %v3259_v62 = vpop.permute.xlu2 %539 }
  0xe5   : > { %5417 = vst [vmem:[#allocation24_spill] sm:$0xff] %v3259_v62  ;;  %v3261_v63 = vpop.permute.xlu1 %499 }
  0xe6   : > { %v3263_v0 = vpop.permute.xlu0 %497 }
  0xea   : > { %651 = vrot.lane.b32.xlu2 %v3122_v36, %s2824_s12 }
  0xeb   : > { %649 = vrot.lane.b32.xlu1 %v3125_v37, %s2824_s12 }
  0xec   : > { %647 = vrot.lane.b32.xlu0 %v3104_v32, %s2824_s12  ;;  %v3271_v1 = vpop.permute.xlu2 %545 }
  0xed   : > { %5418 = vst [vmem:[#allocation25_spill] sm:$0xff] %v3271_v1  ;;  %v3273_v7 = vpop.permute.xlu1 %505 }
  0xee   : > { %5419 = vst [vmem:[#allocation26_spill] sm:$0xff] %v3273_v7  ;;  %v3275_v15 = vpop.permute.xlu0 %503 }
  0xef   : > { %5420 = vst [vmem:[#allocation27_spill] sm:$0xff] %v3275_v15 }
  0xf2   : > { %657 = vrot.lane.b32.xlu2 %v3137_v39, %s2824_s12 }
  0xf3   : > { %655 = vrot.lane.b32.xlu1 %v3140_v40, %s2824_s12 }
  0xf4   : > { %653 = vrot.lane.b32.xlu0 %v3119_v35, %s2824_s12  ;;  %v3283_v53 = vpop.permute.xlu2 %561 }
  0xf5   : > { %5421 = vst [vmem:[#allocation28_spill] sm:$0xff] %v3283_v53  ;;  %v3285_v54 = vpop.permute.xlu1 %531 }
  0xf6   : > { %v3287_v47 = vpop.permute.xlu0 %529 }
  0xfa   : > { %663 = vrot.lane.b32.xlu2 %v3152_v42, %s2824_s12 }
  0xfb   : > { %661 = vrot.lane.b32.xlu1 %v3155_v43, %s2824_s12 }
  0xfc   : > { %659 = vrot.lane.b32.xlu0 %v3134_v38, %s2824_s12  ;;  %v3295_v1 = vpop.permute.xlu2 %567 }
  0xfd   : > { %5422 = vst [vmem:[#allocation29_spill] sm:$0xff] %v3295_v1  ;;  %v3297_v15 = vpop.permute.xlu1 %537 }
  0xfe   : > { %5423 = vst [vmem:[#allocation30_spill] sm:$0xff] %v3297_v15  ;;  %v3299_v7 = vpop.permute.xlu0 %535 }
  0xff   : > { %5424 = vst [vmem:[#allocation31_spill] sm:$0xff] %v3299_v7 }
 0x102   : > { %679 = vrot.lane.b32.xlu2 %v3016_v11, %s2825_s13 }
 0x103   : > { %677 = vrot.lane.b32.xlu1 %v3003_v6, %s2825_s13 }
 0x104   : > { %665 = vrot.lane.b32.xlu0 %v3149_v41, %s2824_s12  ;;  %v3307_v53 = vpop.permute.xlu2 %573 }
 0x105   : > { %5425 = vst [vmem:[#allocation32_spill] sm:$0xff] %v3307_v53  ;;  %v3309_v61 = vpop.permute.xlu1 %543 }
 0x106   : > { %5426 = vst [vmem:[#allocation33_spill] sm:$0xff] %v3309_v61  ;;  %v3311_v62 = vpop.permute.xlu0 %541 }
 0x107   : > { %5427 = vst [vmem:[#allocation34_spill] sm:$0xff] %v3311_v62 }
 0x10a   : > { %685 = vrot.lane.b32.xlu2 %v2993_v2, %s2825_s13 }
 0x10b   : > { %683 = vrot.lane.b32.xlu1 %v3014_v10, %s2825_s13 }
 0x10c   : > { %681 = vrot.lane.b32.xlu0 %v2998_v4, %s2825_s13  ;;  %v3319_v1 = vpop.permute.xlu2 %589 }
 0x10d   : > { %5428 = vst [vmem:[#allocation35_spill] sm:$0xff] %v3319_v1  ;;  %v3321_v7 = vpop.permute.xlu1 %559 }
 0x10e   : > { %5429 = vst [vmem:[#allocation36_spill] sm:$0xff] %v3321_v7  ;;  %v3323_v15 = vpop.permute.xlu0 %557 }
 0x10f   : > { %5430 = vst [vmem:[#allocation37_spill] sm:$0xff] %v3323_v15 }
 0x112   : > { %691 = vrot.lane.b32.xlu2 %v3037_v17, %s2825_s13 }
 0x113   : > { %689 = vrot.lane.b32.xlu1 %v3039_v18, %s2825_s13 }
 0x114   : > { %687 = vrot.lane.b32.xlu0 %v3010_v9, %s2825_s13  ;;  %v3331_v53 = vpop.permute.xlu2 %595 }
 0x115   : > { %5431 = vst [vmem:[#allocation38_spill] sm:$0xff] %v3331_v53  ;;  %v3333_v62 = vpop.permute.xlu1 %565 }
 0x116   : > { %5432 = vst [vmem:[#allocation39_spill] sm:$0xff] %v3333_v62  ;;  %v3335_v61 = vpop.permute.xlu0 %563 }
 0x117   : > { %5433 = vst [vmem:[#allocation40_spill] sm:$0xff] %v3335_v61 }
 0x11a   : > { %707 = vrot.lane.b32.xlu2 %v3008_v8, %s2826_s17 }
 0x11b   : > { %695 = vrot.lane.b32.xlu1 %v3071_v25, %s2825_s13 }
 0x11c   : > { %693 = vrot.lane.b32.xlu0 %v3033_v16, %s2825_s13  ;;  %v3343_v15 = vpop.permute.xlu2 %601 }
 0x11d   : > { %5434 = vst [vmem:[#allocation41_spill] sm:$0xff] %v3343_v15  ;;  %v3345_v7 = vpop.permute.xlu1 %571 }
 0x11e   : > { %5435 = vst [vmem:[#allocation42_spill] sm:$0xff] %v3345_v7  ;;  %v3347_v1 = vpop.permute.xlu0 %569 }
 0x11f   : > { %5436 = vst [vmem:[#allocation43_spill] sm:$0xff] %v3347_v1 }
 0x122   : > { %713 = vrot.lane.b32.xlu2 %v3024_v13, %s2826_s17 }
 0x123   : > { %711 = vrot.lane.b32.xlu1 %v3001_v5, %s2826_s17 }
 0x124   : > { %709 = vrot.lane.b32.xlu0 %v3027_v14, %s2826_s17  ;;  %v3355_v61 = vpop.permute.xlu2 %617 }
 0x125   : > { %5437 = vst [vmem:[#allocation44_spill] sm:$0xff] %v3355_v61  ;;  %v3357_v62 = vpop.permute.xlu1 %587 }
 0x126   : > { %5438 = vst [vmem:[#allocation45_spill] sm:$0xff] %v3357_v62  ;;  %v3359_v53 = vpop.permute.xlu0 %575 }
 0x127   : > { %5439 = vst [vmem:[#allocation46_spill] sm:$0xff] %v3359_v53 }
 0x12a   : > { %719 = vrot.lane.b32.xlu2 %v3048_v21, %s2826_s17 }
 0x12b   : > { %717 = vrot.lane.b32.xlu1 %v3021_v12, %s2826_s17 }
 0x12c   : > { %715 = vrot.lane.b32.xlu0 %v2996_v3, %s2826_s17  ;;  %v3367_v1 = vpop.permute.xlu2 %623 }
 0x12d   : > { %5440 = vst [vmem:[#allocation47_spill] sm:$0xff] %v3367_v1  ;;  %v3369_v7 = vpop.permute.xlu1 %593 }
 0x12e   : > { %5441 = vst [vmem:[#allocation48_spill] sm:$0xff] %v3369_v7  ;;  %v3371_v15 = vpop.permute.xlu0 %591 }
 0x12f   : > { %5442 = vst [vmem:[#allocation49_spill] sm:$0xff] %v3371_v15 }
 0x132   : > { %725 = vrot.lane.b32.xlu2 %v3080_v28, %s2826_s17 }
 0x133   : > { %723 = vrot.lane.b32.xlu1 %v3057_v22, %s2826_s17 }
 0x134   : > { %721 = vrot.lane.b32.xlu0 %v3045_v20, %s2826_s17  ;;  %v3379_v53 = vpop.permute.xlu2 %629 }
 0x135   : > { %5443 = vst [vmem:[#allocation50_spill] sm:$0xff] %v3379_v53  ;;  %v3381_v61 = vpop.permute.xlu1 %599 }
 0x136   : > { %5444 = vst [vmem:[#allocation51_spill] sm:$0xff] %v3381_v61  ;;  %v3383_v62 = vpop.permute.xlu0 %597 }
 0x137   : > { %5445 = vst [vmem:[#allocation52_spill] sm:$0xff] %v3383_v62 }
 0x13a   : > { %741 = vrot.lane.b32.xlu2 %v3063_v24, %s2827_s15 }
 0x13b   : > { %739 = vrot.lane.b32.xlu1 %v3042_v19, %s2827_s15 }
 0x13c   : > { %737 = vrot.lane.b32.xlu0 %v3060_v23, %s2827_s15  ;;  %v3391_v1 = vpop.permute.xlu2 %635 }
 0x13d   : > { %5446 = vst [vmem:[#allocation53_spill] sm:$0xff] %v3391_v1  ;;  %v3393_v7 = vpop.permute.xlu1 %605 }
 0x13e   : > { %5447 = vst [vmem:[#allocation54_spill] sm:$0xff] %v3393_v7  ;;  %v3395_v15 = vpop.permute.xlu0 %603 }
 0x13f   : > { %5448 = vst [vmem:[#allocation55_spill] sm:$0xff] %v3395_v15 }
 0x142   : > { %747 = vrot.lane.b32.xlu2 %v3095_v31, %s2827_s15 }
 0x143   : > { %745 = vrot.lane.b32.xlu1 %v3074_v26, %s2827_s15 }
 0x144   : > { %743 = vrot.lane.b32.xlu0 %v3077_v27, %s2827_s15  ;;  %v3403_v53 = vpop.permute.xlu2 %651 }
 0x145   : > { %5449 = vst [vmem:[#allocation56_spill] sm:$0xff] %v3403_v53  ;;  %v3405_v61 = vpop.permute.xlu1 %621 }
 0x146   : > { %5450 = vst [vmem:[#allocation57_spill] sm:$0xff] %v3405_v61  ;;  %v3407_v62 = vpop.permute.xlu0 %619 }
 0x147   : > { %5451 = vst [vmem:[#allocation58_spill] sm:$0xff] %v3407_v62 }
 0x14a   : > { %753 = vrot.lane.b32.xlu2 %v3110_v34, %s2827_s15 }
 0x14b   : > { %751 = vrot.lane.b32.xlu1 %v3089_v29, %s2827_s15 }
 0x14c   : > { %749 = vrot.lane.b32.xlu0 %v3092_v30, %s2827_s15  ;;  %v3415_v1 = vpop.permute.xlu2 %657 }
 0x14d   : > { %5452 = vst [vmem:[#allocation59_spill] sm:$0xff] %v3415_v1  ;;  %v3417_v7 = vpop.permute.xlu1 %627 }
 0x14e   : > { %5453 = vst [vmem:[#allocation60_spill] sm:$0xff] %v3417_v7  ;;  %v3419_v15 = vpop.permute.xlu0 %625 }
 0x14f   : > { %5454 = vst [vmem:[#allocation61_spill] sm:$0xff] %v3419_v15 }
 0x152   : > { %769 = vrot.lane.b32.xlu2 %v3125_v37, %s2828_s28 }
 0x153   : > { %767 = vrot.lane.b32.xlu1 %v3104_v32, %s2828_s28 }
 0x154   : > { %755 = vrot.lane.b32.xlu0 %v3107_v33, %s2827_s15  ;;  %v3427_v53 = vpop.permute.xlu2 %663 }
 0x155   : > { %5455 = vst [vmem:[#allocation62_spill] sm:$0xff] %v3427_v53  ;;  %v3429_v62 = vpop.permute.xlu1 %633 }
 0x156   : > { %5456 = vst [vmem:[#allocation63_spill] sm:$0xff] %v3429_v62  ;;  %v3431_v61 = vpop.permute.xlu0 %631 }
 0x157   : > { %5457 = vst [vmem:[#allocation64_spill] sm:$0xff] %v3431_v61 }
 0x15a   : > { %775 = vrot.lane.b32.xlu2 %v3140_v40, %s2828_s28 }
 0x15b   : > { %773 = vrot.lane.b32.xlu1 %v3119_v35, %s2828_s28 }
 0x15c   : > { %771 = vrot.lane.b32.xlu0 %v3122_v36, %s2828_s28  ;;  %v3439_v1 = vpop.permute.xlu2 %679 }
 0x15d   : > { %5458 = vst [vmem:[#allocation65_spill] sm:$0xff] %v3439_v1  ;;  %v3441_v15 = vpop.permute.xlu1 %649 }
 0x15e   : > { %5459 = vst [vmem:[#allocation66_spill] sm:$0xff] %v3441_v15  ;;  %v3443_v7 = vpop.permute.xlu0 %647 }
 0x15f   : > { %5460 = vst [vmem:[#allocation67_spill] sm:$0xff] %v3443_v7 }
 0x162   : > { %781 = vrot.lane.b32.xlu2 %v3155_v43, %s2828_s28 }
 0x163   : > { %779 = vrot.lane.b32.xlu1 %v3134_v38, %s2828_s28 }
 0x164   : > { %777 = vrot.lane.b32.xlu0 %v3137_v39, %s2828_s28  ;;  %v3451_v53 = vpop.permute.xlu2 %685 }
 0x165   : > { %5461 = vst [vmem:[#allocation68_spill] sm:$0xff] %v3451_v53  ;;  %v3453_v61 = vpop.permute.xlu1 %655 }
 0x166   : > { %5462 = vst [vmem:[#allocation69_spill] sm:$0xff] %v3453_v61  ;;  %v3455_v62 = vpop.permute.xlu0 %653 }
 0x167   : > { %5463 = vst [vmem:[#allocation70_spill] sm:$0xff] %v3455_v62 }
 0x16a   : > { %797 = vrot.lane.b32.xlu2 %v3003_v6, %s2829_s8 }
 0x16b   : > { %785 = vrot.lane.b32.xlu1 %v3149_v41, %s2828_s28 }
 0x16c   : > { %783 = vrot.lane.b32.xlu0 %v3152_v42, %s2828_s28  ;;  %v3463_v1 = vpop.permute.xlu2 %691 }
 0x16d   : > { %5464 = vst [vmem:[#allocation71_spill] sm:$0xff] %v3463_v1  ;;  %v3465_v7 = vpop.permute.xlu1 %661 }
 0x16e   : > { %5465 = vst [vmem:[#allocation72_spill] sm:$0xff] %v3465_v7  ;;  %v3467_v15 = vpop.permute.xlu0 %659 }
 0x16f   : > { %5466 = vst [vmem:[#allocation73_spill] sm:$0xff] %v3467_v15 }
 0x172   : > { %803 = vrot.lane.b32.xlu2 %v3014_v10, %s2829_s8 }
 0x173   : > { %801 = vrot.lane.b32.xlu1 %v2998_v4, %s2829_s8 }
 0x174   : > { %799 = vrot.lane.b32.xlu0 %v3016_v11, %s2829_s8  ;;  %v3475_v53 = vpop.permute.xlu2 %707 }
 0x175   : > { %5467 = vst [vmem:[#allocation74_spill] sm:$0xff] %v3475_v53  ;;  %v3477_v62 = vpop.permute.xlu1 %677 }
 0x176   : > { %5468 = vst [vmem:[#allocation75_spill] sm:$0xff] %v3477_v62  ;;  %v3479_v61 = vpop.permute.xlu0 %665 }
 0x177   : > { %5469 = vst [vmem:[#allocation76_spill] sm:$0xff] %v3479_v61 }
 0x17a   : > { %809 = vrot.lane.b32.xlu2 %v3039_v18, %s2829_s8 }
 0x17b   : > { %807 = vrot.lane.b32.xlu1 %v3010_v9, %s2829_s8 }
 0x17c   : > { %805 = vrot.lane.b32.xlu0 %v2993_v2, %s2829_s8  ;;  %v3487_v1 = vpop.permute.xlu2 %713 }
 0x17d   : > { %5470 = vst [vmem:[#allocation77_spill] sm:$0xff] %v3487_v1  ;;  %v3489_v15 = vpop.permute.xlu1 %683 }
 0x17e   : > { %5471 = vst [vmem:[#allocation78_spill] sm:$0xff] %v3489_v15  ;;  %v3491_v7 = vpop.permute.xlu0 %681 }
 0x17f   : > { %5472 = vst [vmem:[#allocation79_spill] sm:$0xff] %v3491_v7 }
 0x182   : > { %815 = vrot.lane.b32.xlu2 %v3071_v25, %s2829_s8 }
 0x183   : > { %813 = vrot.lane.b32.xlu1 %v3033_v16, %s2829_s8 }
 0x184   : > { %811 = vrot.lane.b32.xlu0 %v3037_v17, %s2829_s8  ;;  %v3499_v61 = vpop.permute.xlu2 %719 }
 0x185   : > { %5473 = vst [vmem:[#allocation80_spill] sm:$0xff] %v3499_v61  ;;  %v3501_v62 = vpop.permute.xlu1 %689 }
 0x186   : > { %5474 = vst [vmem:[#allocation81_spill] sm:$0xff] %v3501_v62  ;;  %v3503_v53 = vpop.permute.xlu0 %687 }
 0x187   : > { %5475 = vst [vmem:[#allocation82_spill] sm:$0xff] %v3503_v53 }
 0x18a   : > { %831 = vrot.lane.b32.xlu2 %v3001_v5, %s2830_s10 }
 0x18b   : > { %829 = vrot.lane.b32.xlu1 %v3027_v14, %s2830_s10 }
 0x18c   : > { %827 = vrot.lane.b32.xlu0 %v3008_v8, %s2830_s10  ;;  %v3511_v15 = vpop.permute.xlu2 %725 }
 0x18d   : > { %5476 = vst [vmem:[#allocation83_spill] sm:$0xff] %v3511_v15  ;;  %v3513_v1 = vpop.permute.xlu1 %695 }
 0x18e   : > { %v3515_v7 = vpop.permute.xlu0 %693 }
 0x18f   : > { %5477 = vst [vmem:[#allocation84_spill] sm:$0xff] %v3515_v7 }
 0x192   : > { %837 = vrot.lane.b32.xlu2 %v3021_v12, %s2830_s10 }
 0x193   : > { %835 = vrot.lane.b32.xlu1 %v2996_v3, %s2830_s10 }
 0x194   : > { %833 = vrot.lane.b32.xlu0 %v3024_v13, %s2830_s10  ;;  %v3523_v5 = vpop.permute.xlu2 %741 }
 0x195   : > { %v3525_v14 = vpop.permute.xlu1 %711 }
 0x196   : > { %v3527_v8 = vpop.permute.xlu0 %709 }
 0x19a   : > { %843 = vrot.lane.b32.xlu2 %v3057_v22, %s2830_s10 }
 0x19b   : > { %841 = vrot.lane.b32.xlu1 %v3045_v20, %s2830_s10 }
 0x19c   : > { %839 = vrot.lane.b32.xlu0 %v3048_v21, %s2830_s10  ;;  %v3535_v12 = vpop.permute.xlu2 %747 }
 0x19d   : > { %5478 = vst [vmem:[#allocation85_spill] sm:$0xff] %v3535_v12  ;;  %v3537_v3 = vpop.permute.xlu1 %717 }
 0x19e   : > { %5479 = vst [vmem:[#allocation86_spill] sm:$0xff] %v3537_v3  ;;  %v3539_v13 = vpop.permute.xlu0 %715 }
 0x1a2   : > { %859 = vrot.lane.b32.xlu2 %v3042_v19, %s2831_s27 }
 0x1a3   : > { %857 = vrot.lane.b32.xlu1 %v3060_v23, %s2831_s27 }
 0x1a4   : > { %845 = vrot.lane.b32.xlu0 %v3080_v28, %s2830_s10  ;;  %v3547_v20 = vpop.permute.xlu2 %753 }
 0x1a5   : > { %5480 = vst [vmem:[#allocation87_spill] sm:$0xff] %v3547_v20  ;;  %v3549_v22 = vpop.permute.xlu1 %723 }
 0x1a6   : > { %5481 = vst [vmem:[#allocation88_spill] sm:$0xff] %v3549_v22  ;;  %v3551_v21 = vpop.permute.xlu0 %721 }
 0x1a7   : > { %5482 = vst [vmem:[#allocation89_spill] sm:$0xff] %v3551_v21 }
 0x1aa   : > { %865 = vrot.lane.b32.xlu2 %v3074_v26, %s2831_s27 }
 0x1ab   : > { %863 = vrot.lane.b32.xlu1 %v3077_v27, %s2831_s27 }
 0x1ac   : > { %861 = vrot.lane.b32.xlu0 %v3063_v24, %s2831_s27  ;;  %v3559_v19 = vpop.permute.xlu2 %769 }
 0x1ad   : > { %v3561_v23 = vpop.permute.xlu1 %739 }
 0x1ae   : > { %v3563_v28 = vpop.permute.xlu0 %737 }
 0x1b2   : > { %871 = vrot.lane.b32.xlu2 %v3089_v29, %s2831_s27 }
 0x1b3   : > { %869 = vrot.lane.b32.xlu1 %v3092_v30, %s2831_s27 }
 0x1b4   : > { %867 = vrot.lane.b32.xlu0 %v3095_v31, %s2831_s27  ;;  %v3571_v26 = vpop.permute.xlu2 %775 }
 0x1b5   : > { %5483 = vst [vmem:[#allocation90_spill] sm:$0xff] %v3571_v26  ;;  %v3573_v27 = vpop.permute.xlu1 %745 }
 0x1b6   : > { %v3575_v24 = vpop.permute.xlu0 %743 }
 0x1ba   : > { %887 = vrot.lane.b32.xlu2 %v3104_v32, %s2832_s14 }
 0x1bb   : > { %875 = vrot.lane.b32.xlu1 %v3107_v33, %s2831_s27 }
 0x1bc   : > { %873 = vrot.lane.b32.xlu0 %v3110_v34, %s2831_s27  ;;  %v3583_v29 = vpop.permute.xlu2 %781 }
 0x1bd   : > { %5484 = vst [vmem:[#allocation91_spill] sm:$0xff] %v3583_v29  ;;  %v3585_v30 = vpop.permute.xlu1 %751 }
 0x1be   : > { %5485 = vst [vmem:[#allocation92_spill] sm:$0xff] %v3585_v30  ;;  %v3587_v31 = vpop.permute.xlu0 %749 }
 0x1bf   : > { %5486 = vst [vmem:[#allocation93_spill] sm:$0xff] %v3587_v31 }
 0x1c2   : > { %893 = vrot.lane.b32.xlu2 %v3119_v35, %s2832_s14 }
 0x1c3   : > { %891 = vrot.lane.b32.xlu1 %v3122_v36, %s2832_s14 }
 0x1c4   : > { %889 = vrot.lane.b32.xlu0 %v3125_v37, %s2832_s14  ;;  %v3595_v32 = vpop.permute.xlu2 %797 }
 0x1c5   : > { %5487 = vst [vmem:[#allocation94_spill] sm:$0xff] %v3595_v32  ;;  %v3597_v33 = vpop.permute.xlu1 %767  ;;  %v3617_v32 = vld.sshfl [vmem:[#allocation1 + $0x8] sm:$0xff pattern:$0x73625140] }
 0x1c6   : > { %v3599_v34 = vpop.permute.xlu0 %755  ;;  %v1206_v7 = vrot.slane %v3617_v32, 4  ;;  %v1202_v20 = vrot.slane %v3617_v32, 6  ;;  %v1210_v22 = vrot.slane %v3617_v32, 2 }
 0x1ca   : > { %899 = vrot.lane.b32.xlu2 %v3134_v38, %s2832_s14 }
 0x1cb   : > { %897 = vrot.lane.b32.xlu1 %v3137_v39, %s2832_s14 }
 0x1cc   : > { %895 = vrot.lane.b32.xlu0 %v3140_v40, %s2832_s14  ;;  %v3607_v35 = vpop.permute.xlu2 %803 }
 0x1cd   : > { %v3609_v36 = vpop.permute.xlu1 %773 }
 0x1ce   : > { %v3611_v37 = vpop.permute.xlu0 %771 }
 0x1d2   : > { %905 = vrot.lane.b32.xlu2 %v3149_v41, %s2832_s14 }
 0x1d3   : > { %903 = vrot.lane.b32.xlu1 %v3152_v42, %s2832_s14 }
 0x1d4   : > { %901 = vrot.lane.b32.xlu0 %v3155_v43, %s2832_s14  ;;  %v3621_v38 = vpop.permute.xlu2 %809 }
 0x1d5   : > { %5488 = vst [vmem:[#allocation95_spill] sm:$0xff] %v3621_v38  ;;  %v3623_v39 = vpop.permute.xlu1 %779  ;;  %v3671_v38 = vld.sshfl [vmem:[#allocation1 + $0x10] sm:$0xff pattern:$0x73625140] }
 0x1d6   : > { %5489 = vst [vmem:[#allocation96_spill] sm:$0xff] %v3623_v39  ;;  %v3625_v40 = vpop.permute.xlu0 %777 }
 0x1d7   : > { %5490 = vst [vmem:[#allocation97_spill] sm:$0xff] %v3625_v40 }
 0x1d8   : > { %5500 = vst [vmem:[#allocation107_spill] sm:$0xff] %v3671_v38 }
 0x1da   : > { %1207 = vrot.lane.b32.xlu2 %v1206_v7, %s2831_s27 }
 0x1db   : > { %1203 = vrot.lane.b32.xlu1 %v1202_v20, %s2830_s10 }
 0x1dc   : > { %1199 = vrot.lane.b32.xlu0 %v3617_v32, %s2829_s8  ;;  %v3633_v41 = vpop.permute.xlu2 %815 }
 0x1dd   : > { %5491 = vst [vmem:[#allocation98_spill] sm:$0xff] %v3633_v41  ;;  %v3635_v42 = vpop.permute.xlu1 %785 }
 0x1de   : > { %5492 = vst [vmem:[#allocation99_spill] sm:$0xff] %v3635_v42  ;;  %v3637_v43 = vpop.permute.xlu0 %783 }
 0x1df   : > { %5493 = vst [vmem:[#allocation100_spill] sm:$0xff] %v3637_v43 }
 0x1e2   : > { %1251 = vrot.lane.b32.xlu2 %v1206_v7, %s2819_s24 }
 0x1e3   : > { %1248 = vrot.lane.b32.xlu1 %v1202_v20, %s2818_s26 }
 0x1e4   : > { %1211 = vrot.lane.b32.xlu0 %v1210_v22, %s2832_s14  ;;  %v3643_v29 = vpop.permute.xlu2 %831 }
 0x1e5   : > { %v3645_v30 = vpop.permute.xlu1 %801 }
 0x1e6   : > { %v3647_v21 = vpop.permute.xlu0 %799 }
 0x1e7   : > { %5494 = vst [vmem:[#allocation101_spill] sm:$0xff] %v3647_v21 }
 0x1ea   : > { %1260 = vrot.lane.b32.xlu2 %v1202_v20, %s2822_s9 }
 0x1eb   : > { %1257 = vrot.lane.b32.xlu1 %v3617_v32, %s2821_s7 }
 0x1ec   : > { %1254 = vrot.lane.b32.xlu0 %v1210_v22, %s2820_s30  ;;  %v3653_v41 = vpop.permute.xlu2 %837 }
 0x1ed   : > { %5495 = vst [vmem:[#allocation102_spill] sm:$0xff] %v3653_v41  ;;  %v3655_v43 = vpop.permute.xlu1 %807 }
 0x1ee   : > { %5496 = vst [vmem:[#allocation103_spill] sm:$0xff] %v3655_v43  ;;  %v3657_v39 = vpop.permute.xlu0 %805 }
 0x1f2   : > { %1269 = vrot.lane.b32.xlu2 %v3617_v32, %s2825_s13 }
 0x1f3   : > { %1266 = vrot.lane.b32.xlu1 %v1210_v22, %s2824_s12 }
 0x1f4   : > { %1263 = vrot.lane.b32.xlu0 %v1206_v7, %s2823_s11  ;;  %v3663_v62 = vpop.permute.xlu2 %843 }
 0x1f5   : > { %5497 = vst [vmem:[#allocation104_spill] sm:$0xff] %v3663_v62  ;;  %v3665_v31 = vpop.permute.xlu1 %813  ;;  %v1336_v62 = vrot.slane %v3671_v38, 2 }
 0x1f6   : > { %5498 = vst [vmem:[#allocation105_spill] sm:$0xff] %v3665_v31  ;;  %v3667_v61 = vpop.permute.xlu0 %811  ;;  %v1332_v31 = vrot.slane %v3671_v38, 4 }
 0x1f7   : > { %5499 = vst [vmem:[#allocation106_spill] sm:$0xff] %v3667_v61  ;;  %v1328_v61 = vrot.slane %v3671_v38, 6 }
 0x1fa   : > { %1278 = vrot.lane.b32.xlu2 %v1210_v22, %s2828_s28 }
 0x1fb   : > { %1275 = vrot.lane.b32.xlu1 %v1206_v7, %s2827_s15 }
 0x1fc   : > { %1272 = vrot.lane.b32.xlu0 %v1202_v20, %s2826_s17  ;;  %v3674_v40 = vpop.permute.xlu2 %859 }
 0x1fd   : > { %v3676_v53 = vpop.permute.xlu1 %829 }
 0x1fe   : > { %v3678_v12 = vpop.permute.xlu0 %827 }
 0x1ff   : > { %5501 = vst [vmem:[#allocation108_spill] sm:$0xff] %v3678_v12 }
 0x202   : > { %1337 = vrot.lane.b32.xlu2 %v1336_v62, %s2820_s30 }
 0x203   : > { %1333 = vrot.lane.b32.xlu1 %v1332_v31, %s2819_s24 }
 0x204   : > { %1329 = vrot.lane.b32.xlu0 %v1328_v61, %s2818_s26  ;;  %v3686_v7 = vpop.permute.xlu2 %865  ;;  %s2490_s26 = smul.u32 36, %s2806_s21 }
 0x205   : > { %v3688_v20 = vpop.permute.xlu1 %835 }
 0x206   : > { %v3690_v22 = vpop.permute.xlu0 %833 }
 0x20a   : > { %1346 = vrot.lane.b32.xlu2 %v1332_v31, %s2823_s11 }
 0x20b   : > { %1343 = vrot.lane.b32.xlu1 %v1328_v61, %s2822_s9  ;;  %s2293_s9 = sshll.u32 %s5191_s29, 4  ;;  %s2294_s9 = int_to_ptr.vmem [resolvable:$true] %s2293_s9 }
 0x20c   : > { %1340 = vrot.lane.b32.xlu0 %v3671_v38, %s2821_s7  ;;  %v3696_v12 = vpop.permute.xlu2 %871  ;;  %s2291_s7 = scalar_lea.hbm %s5260_s4, %s2490_s26 }
 0x20d   : > { %5502 = vst [vmem:[#allocation109_spill] sm:$0xff] %v3696_v12  ;;  %v3698_v3 = vpop.permute.xlu1 %841  ;;  %s2295_s11 = sshll.u32 %s2291_s7, 4  ;;  %s2296_s11 = int_to_ptr.hbm [resolvable:$true] %s2295_s11 }
 0x20e   : > { %5503 = vst [vmem:[#allocation110_spill] sm:$0xff] %v3698_v3  ;;  %v3700_v43 = vpop.permute.xlu0 %839 }
 0x20f   : > { %5504 = vst [vmem:[#allocation111_spill] sm:$0xff] %v3700_v43 }
 0x212   : > { %1355 = vrot.lane.b32.xlu2 %v1328_v61, %s2826_s17 }
 0x213   : > { %1352 = vrot.lane.b32.xlu1 %v3671_v38, %s2825_s13  ;;  %s2734_s13 = sshra.s32 %s2296_s11, 4  ;;  %s2735_s13 = int_to_ptr.hbm [resolvable:$true] %s2734_s13 }
 0x214   : > { %1349 = vrot.lane.b32.xlu0 %v1336_v62, %s2824_s12  ;;  %v3706_v41 = vpop.permute.xlu2 %887  ;;  %s2269_s12 = scalar_lea.sflag [#allocation4], %s2971_s2  ;;  %s2736_s17 = scalar_lea.hbm %s2735_s13, 36 }
 0x215   : > { %5505 = vst [vmem:[#allocation112_spill] sm:$0xff] %v3706_v41  ;;  %v3708_v42 = vpop.permute.xlu1 %857  ;;  %p2737_p1 = scmp.ne.s32.totalorder %s2735_s13, %s2736_s17  ;;  %p2741_p8 = scmp.lt.s32.totalorder %s2735_s13, %s5260_s4 }
 0x216   : > { %5506 = vst [vmem:[#allocation113_spill] sm:$0xff] %v3708_v42  ;;  %v3710_v26 = vpop.permute.xlu0 %845  ;;  %v469_v42 = vsel %vm5385_vm0, %v3215_v52, %v3201_v48 }
 0x217   : > { %5507 = vst [vmem:[#allocation114_spill] sm:$0xff] %v3710_v26  ;;  %v470_v26 = vsel %vm5385_vm0, %v3201_v48, %v3213_v51  ;;  %p2738_p2 = pnand %p2737_p1, %p2942_p7 }
 0x218   : > { %v923_v15 = vsel %vm917_vm3, %v2998_v4, %v470_v26 }
 0x219   : > { %p2739_p4 = pneg %p2738_p2 }
 0x21a   : > { %1364 = vrot.lane.b32.xlu2 %v3671_v38, %s2829_s8  ;;  %s2740_s8 = scalar_lea.hbm %s5260_s4, 72 }
 0x21b   : > { %1361 = vrot.lane.b32.xlu1 %v1336_v62, %s2828_s28  ;;  %p2742_p12 = scmp.lt.s32.totalorder %s2740_s8, %s2736_s17 }
 0x21c   : > { %1358 = vrot.lane.b32.xlu0 %v1332_v31, %s2827_s15  ;;  %v3716_v12 = vpop.permute.xlu2 %893 }
 0x21d   : > { %v3718_v3 = vpop.permute.xlu1 %863  ;;  %p2743_p13 = por %p2742_p12, %p2741_p8 }
 0x21e   : > { %v3720_v43 = vpop.permute.xlu0 %861 }
 0x21f   : > { %p2744_p0 = pnand %p2743_p13, %p2739_p4 }
 0x222   : > { %1373 = vrot.lane.b32.xlu2 %v1336_v62, %s2832_s14  ;;  %v510_v62 = vsel %vm507_vm1, %v3239_v58, %v3249_v60 }
 0x223   : > { %1370 = vrot.lane.b32.xlu1 %v1332_v31, %s2831_s27  ;;  %v468_v31 = vsel %vm5385_vm0, %v3203_v49, %v3215_v52  ;;  %v549_v49 = vsel %vm547_vm2, %v3287_v47, %v3285_v54  ;;  %v921_v52 = vsel %vm917_vm3, %v3016_v11, %v469_v42  ;;  %v512_v42 = vsel %vm507_vm1, %v3211_v50, %v3263_v0 }
 0x224   : > { %1367 = vrot.lane.b32.xlu0 %v1328_v61, %s2830_s10  ;;  %v3728_v41 = vpop.permute.xlu2 %899  ;;  %v509_v61 = vsel %vm507_vm1, %v3191_v46, %v3239_v58  ;;  %v548_v58 = vsel %vm547_vm2, %v3235_v56, %v3287_v47  ;;  %v919_v4 = vsel %vm917_vm3, %v3003_v6, %v468_v31  ;;  %v473_v6 = vsel %vm5385_vm0, %v3183_v45, %v3227_v55  ;;  %v5517_v31 = vld [vmem:[#allocation30_spill] sm:$0xff] }
 0x225   : > { %5508 = vst [vmem:[#allocation115_spill] sm:$0xff] %v3728_v41  ;;  %v3736_v38 = vpop.permute.xlu1 %869  ;;  %v550_v41 = vsel %vm547_vm2, %v3285_v54, %v3247_v59 }
 0x226   : > { %5509 = vst [vmem:[#allocation116_spill] sm:$0xff] %v3736_v38  ;;  %v3747_v48 = vpop.permute.xlu0 %867  ;;  %v508_v38 = vsel %vm507_vm1, %v3237_v57, %v3191_v46  ;;  %v940_v46 = vsel %vm936_vm4, %v921_v52, %v509_v61  ;;  %v472_v57 = vsel %vm5385_vm0, %v3175_v44, %v3183_v45  ;;  %v929_v45 = vsel %vm917_vm3, %v3010_v9, %v473_v6  ;;  %v5519_v52 = vld [vmem:[#allocation31_spill] sm:$0xff] }
 0x227   : > { %5510 = vst [vmem:[#allocation117_spill] sm:$0xff] %v3747_v48  ;;  %v942_v48 = vsel %vm936_vm4, %v923_v15, %v510_v62  ;;  %v938_v54 = vsel %vm936_vm4, %v919_v4, %v508_v38  ;;  %v3773_v11 = vsel %vm955_vm5, %v940_v46, %v549_v49  ;;  %v513_v15 = vsel %vm507_vm1, %v3263_v0, %v3261_v63  ;;  %v5516_v62 = vld [vmem:[#allocation24_spill] sm:$0xff] }
 0x228   : > { %v3766_v26 = vsel %vm955_vm5, %v942_v48, %v550_v41  ;;  %5512 = vst [vmem:[#allocation119_spill] sm:$0xff] %v3773_v11  ;;  %v3778_v47 = vsel %vm955_vm5, %v938_v54, %v548_v58  ;;  %v471_v41 = vsel %vm5385_vm0, %v3213_v51, %v3175_v44  ;;  %v553_v61 = vsel %vm547_vm2, %v5517_v31, %v5516_v62  ;;  %v5524_v46 = vld [vmem:[#allocation20_spill] sm:$0xff] }
 0x229   : > { %5511 = vst [vmem:[#allocation118_spill] sm:$0xff] %v3766_v26  ;;  %v511_v49 = vsel %vm507_vm1, %v3249_v60, %v3211_v50  ;;  %v552_v44 = vsel %vm547_vm2, %v5519_v52, %v5517_v31  ;;  %v927_v51 = vsel %vm917_vm3, %v2993_v2, %v472_v57  ;;  %v551_v0 = vsel %vm547_vm2, %v3247_v59, %v5519_v52  ;;  %v5526_v57 = vld [vmem:[#allocation22_spill] sm:$0xff] }
 0x22a   : > { %1474 = vrot.lane.b32.xlu2 %v3766_v26, %s2833_s25  ;;  %5513 = vst [vmem:[#allocation120_spill] sm:$0xff] %v3778_v47  ;;  %v948_v58 = vsel %vm936_vm4, %v929_v45, %v513_v15  ;;  %v925_v9 = vsel %vm917_vm3, %v3014_v10, %v471_v41  ;;  %v946_v50 = vsel %vm936_vm4, %v927_v51, %v512_v42  ;;  %v5523_v10 = vld [vmem:[#allocation23_spill] sm:$0xff]  ;;  %v5527_v41 = vld [vmem:[#allocation26_spill] sm:$0xff]  ;;  %v5531_v51 = vld [vmem:[#allocation33_spill] sm:$0xff] }
 0x22b   : > { %1472 = vrot.lane.b32.xlu1 %v3773_v11, %s2833_s25  ;;  %v3823_v4 = vsel %vm955_vm5, %v948_v58, %v553_v61  ;;  %v3829_v60 = vsel %vm955_vm5, %v946_v50, %v552_v44  ;;  %v944_v2 = vsel %vm936_vm4, %v925_v9, %v511_v49  ;;  %v476_v54 = vsel %vm5385_vm0, %v5524_v46, %v5523_v10  ;;  %v5528_v42 = vld [vmem:[#allocation27_spill] sm:$0xff]  ;;  %v5529_v49 = vld [vmem:[#allocation21_spill] sm:$0xff]  ;;  %v5532_v50 = vld [vmem:[#allocation34_spill] sm:$0xff] }
 0x22c   : > { %1470 = vrot.lane.b32.xlu0 %v3778_v47, %s2833_s25  ;;  %v3785_v56 = vpop.permute.xlu2 %905  ;;  %5520 = vst [vmem:[#allocation30_spill] sm:$0xff] %v3823_v4  ;;  %v3835_v59 = vsel %vm955_vm5, %v944_v2, %v551_v0  ;;  %v475_v15 = vsel %vm5385_vm0, %v5526_v57, %v5524_v46  ;;  %v516_v31 = vsel %vm507_vm1, %v5528_v42, %v5527_v41  ;;  %v5530_v44 = vld [vmem:[#allocation25_spill] sm:$0xff] }
 0x22d   : > { %5514 = vst [vmem:[#allocation121_spill] sm:$0xff] %v3785_v56  ;;  %v3793_v38 = vpop.permute.xlu1 %875  ;;  %v474_v45 = vsel %vm5385_vm0, %v3227_v55, %v5526_v57  ;;  %v515_v52 = vsel %vm507_vm1, %v5529_v49, %v5528_v42  ;;  %v556_v0 = vsel %vm547_vm2, %v5531_v51, %v5530_v44  ;;  %v514_v9 = vsel %vm507_vm1, %v3261_v63, %v5529_v49 }
 0x22e   : > { %5515 = vst [vmem:[#allocation122_spill] sm:$0xff] %v3793_v38  ;;  %v3804_v48 = vpop.permute.xlu0 %873  ;;  %v555_v2 = vsel %vm547_vm2, %v5532_v50, %v5531_v51  ;;  %v935_v55 = vsel %vm917_vm3, %v3033_v16, %v476_v54  ;;  %v933_v46 = vsel %vm917_vm3, %v3037_v17, %v475_v15  ;;  %v554_v57 = vsel %vm547_vm2, %v5516_v62, %v5532_v50  ;;  %v5536_v62 = vld [vmem:[#allocation49_spill] sm:$0xff]  ;;  %v5537_v54 = vld [vmem:[#allocation35_spill] sm:$0xff]  ;;  %v5540_v51 = vld [vmem:[#allocation58_spill] sm:$0xff] }
 0x22f   : > { %5518 = vst [vmem:[#allocation24_spill] sm:$0xff] %v3804_v48  ;;  %v954_v42 = vsel %vm936_vm4, %v935_v55, %v516_v31  ;;  %v931_v47 = vsel %vm917_vm3, %v3039_v18, %v474_v45  ;;  %v952_v49 = vsel %vm936_vm4, %v933_v46, %v515_v52  ;;  %v609_v15 = vsel %vm607_vm6, %v5537_v54, %v5536_v62  ;;  %v5538_v45 = vld [vmem:[#allocation45_spill] sm:$0xff]  ;;  %v5541_v50 = vld [vmem:[#allocation28_spill] sm:$0xff]  ;;  %v5547_v38 = vld [vmem:[#allocation67_spill] sm:$0xff] }
 0x230   : > { %5521 = vst [vmem:[#allocation31_spill] sm:$0xff] %v3829_v60  ;;  %v3880_v63 = vsel %vm955_vm5, %v954_v42, %v556_v0  ;;  %v3886_v16 = vsel %vm955_vm5, %v952_v49, %v555_v2  ;;  %v950_v17 = vsel %vm936_vm4, %v931_v47, %v514_v9  ;;  %v608_v47 = vsel %vm607_vm6, %v5538_v45, %v5537_v54  ;;  %v5539_v52 = vld [vmem:[#allocation57_spill] sm:$0xff]  ;;  %v5542_v2 = vld [vmem:[#allocation36_spill] sm:$0xff]  ;;  %v5545_v49 = vld [vmem:[#allocation66_spill] sm:$0xff] }
 0x231   : > { %5522 = vst [vmem:[#allocation123_spill] sm:$0xff] %v3835_v59  ;;  %v3892_v18 = vsel %vm955_vm5, %v950_v17, %v554_v57  ;;  %v639_v0 = vsel %vm5384_vm7, %v5540_v51, %v5539_v52  ;;  %v579_v55 = vsel %vm5390_vm9, %v5542_v2, %v5541_v50  ;;  %v5543_v46 = vld [vmem:[#allocation44_spill] sm:$0xff]  ;;  %v1215_v54 = vsel %vm917_vm3, %v3071_v25, %v5523_v10  ;;  %v5546_v45 = vld [vmem:[#allocation37_spill] sm:$0xff] }
 0x232   : > { %1480 = vrot.lane.b32.xlu2 %v3823_v4, %s2833_s25  ;;  %5533 = vst [vmem:[#allocation20_spill] sm:$0xff] %v3880_v63  ;;  %v638_v57 = vsel %vm5384_vm7, %v5543_v46, %v5540_v51  ;;  %v5544_v42 = vld [vmem:[#allocation56_spill] sm:$0xff]  ;;  %v988_v56 = vsel %vm917_vm3, %v579_v55, %v609_v15  ;;  %v668_v51 = vsel %vm667_vm8, %v5547_v38, %v5545_v49 }
 0x233   : > { %1478 = vrot.lane.b32.xlu1 %v3829_v60, %s2833_s25  ;;  %5534 = vst [vmem:[#allocation22_spill] sm:$0xff] %v3886_v16  ;;  %v669_v17 = vsel %vm667_vm8, %v5545_v49, %v5544_v42  ;;  %v1013_v48 = vsel %vm936_vm4, %v988_v56, %v639_v0  ;;  %v5552_v0 = vld [vmem:[#allocation48_spill] sm:$0xff] }
 0x234   : > { %1476 = vrot.lane.b32.xlu0 %v3835_v59, %s2833_s25  ;;  %v3842_v6 = vpop.permute.xlu2 %1207  ;;  %5535 = vst [vmem:[#allocation26_spill] sm:$0xff] %v3892_v18  ;;  %v3935_v4 = vsel %vm955_vm5, %v1013_v48, %v669_v17  ;;  %v5553_v55 = vld [vmem:[#allocation60_spill] sm:$0xff]  ;;  %v5556_v17 = vld [vmem:[#allocation29_spill] sm:$0xff] }
 0x235   : > { %5525 = vst [vmem:[#allocation23_spill] sm:$0xff] %v3842_v6  ;;  %v3850_v61 = vpop.permute.xlu1 %891 }
 0x236   : > { %v3861_v58 = vpop.permute.xlu0 %889  ;;  %5548 = vst [vmem:[#allocation27_spill] sm:$0xff] %v3935_v4 }
 0x23a   : > { %1486 = vrot.lane.b32.xlu2 %v3880_v63, %s2833_s25 }
 0x23b   : > { %1484 = vrot.lane.b32.xlu1 %v3886_v16, %s2833_s25  ;;  %v578_v16 = vsel %vm5390_vm9, %v5546_v45, %v5542_v2 }
 0x23c   : > { %1482 = vrot.lane.b32.xlu0 %v3892_v18, %s2833_s25  ;;  %v3899_v31 = vpop.permute.xlu2 %1251  ;;  %v985_v46 = vsel %vm917_vm3, %v578_v16, %v608_v47  ;;  %v1217_v18 = vsel %vm936_vm4, %v1215_v54, %v5527_v41  ;;  %v5550_v16 = vld [vmem:[#allocation52_spill] sm:$0xff]  ;;  %v5551_v47 = vld [vmem:[#allocation38_spill] sm:$0xff]  ;;  %v5557_v54 = vld [vmem:[#allocation39_spill] sm:$0xff] }
 0x23d   : > { %v3907_v9 = vpop.permute.xlu1 %897  ;;  %v1011_v25 = vsel %vm936_vm4, %v985_v46, %v638_v57  ;;  %v1219_v38 = vsel %vm955_vm5, %v1217_v18, %v5530_v44  ;;  %v612_v56 = vsel %vm607_vm6, %v5551_v47, %v5550_v16  ;;  %v611_v2 = vsel %vm607_vm6, %v5552_v0, %v5551_v47  ;;  %v5554_v57 = vld [vmem:[#allocation61_spill] sm:$0xff]  ;;  %v5558_v46 = vld [vmem:[#allocation47_spill] sm:$0xff] }
 0x23e   : > { %v3918_v63 = vpop.permute.xlu0 %895  ;;  %v3941_v15 = vsel %vm955_vm5, %v1011_v25, %v668_v51  ;;  %v642_v49 = vsel %vm5384_vm7, %v5554_v57, %v5553_v55  ;;  %v582_v45 = vsel %vm5390_vm9, %v5557_v54, %v5556_v17  ;;  %v610_v51 = vsel %vm607_vm6, %v5536_v62, %v5552_v0  ;;  %v5560_v47 = vld [vmem:[#allocation69_spill] sm:$0xff]  ;;  %v5563_v0 = vld [vmem:[#allocation70_spill] sm:$0xff] }
 0x23f   : > { %5549 = vst [vmem:[#allocation21_spill] sm:$0xff] %v3941_v15  ;;  %v641_v25 = vsel %vm5384_vm7, %v5558_v46, %v5554_v57  ;;  %v997_v60 = vsel %vm917_vm3, %v582_v45, %v612_v56  ;;  %v640_v62 = vsel %vm5384_vm7, %v5539_v52, %v5558_v46  ;;  %v671_v57 = vsel %vm667_vm8, %v5563_v0, %v5560_v47 }
 0x240   : > { %v1019_v56 = vsel %vm936_vm4, %v997_v60, %v642_v49 }
 0x242   : > { %1492 = vrot.lane.b32.xlu2 %v3935_v4, %s2833_s25 }
 0x243   : > { %1490 = vrot.lane.b32.xlu1 %v3941_v15, %s2833_s25 }
 0x244   : > { %1488 = vrot.lane.b32.xlu0 %v1219_v38, %s2833_s25  ;;  %v3951_v48 = vpop.permute.xlu2 %1260  ;;  %v5559_v38 = vld [vmem:[#allocation59_spill] sm:$0xff] }
 0x245   : > { %v3959_v18 = vpop.permute.xlu1 %903  ;;  %v672_v15 = vsel %vm667_vm8, %v5560_v47, %v5559_v38 }
 0x246   : > { %5555 = vst [vmem:[#allocation25_spill] sm:$0xff] %v3959_v18  ;;  %v3973_v11 = vpop.permute.xlu0 %901  ;;  %v5562_v18 = vld [vmem:[#allocation40_spill] sm:$0xff]  ;;  %v3995_v52 = vsel %vm955_vm5, %v1019_v56, %v672_v15  ;;  %v5575_v56 = vld [vmem:[#allocation50_spill] sm:$0xff] }
 0x247   : > { %5561 = vst [vmem:[#allocation33_spill] sm:$0xff] %v3973_v11  ;;  %v581_v4 = vsel %vm5390_vm9, %v5562_v18, %v5557_v54  ;;  %v580_v6 = vsel %vm5390_vm9, %v5541_v50, %v5562_v18  ;;  %v670_v54 = vsel %vm667_vm8, %v5544_v42, %v5563_v0  ;;  %v5568_v42 = vld [vmem:[#allocation41_spill] sm:$0xff]  ;;  %v5570_v18 = vld [vmem:[#allocation63_spill] sm:$0xff]  ;;  %v5574_v0 = vld [vmem:[#allocation42_spill] sm:$0xff] }
 0x248   : > { %v994_v11 = vsel %vm917_vm3, %v581_v4, %v611_v2  ;;  %v991_v45 = vsel %vm917_vm3, %v580_v6, %v610_v51  ;;  %5564 = vst [vmem:[#allocation34_spill] sm:$0xff] %v3995_v52  ;;  %v5567_v6 = vld [vmem:[#allocation55_spill] sm:$0xff]  ;;  %v5571_v51 = vld [vmem:[#allocation64_spill] sm:$0xff] }
 0x249   : > { %v1017_v46 = vsel %vm936_vm4, %v994_v11, %v641_v25  ;;  %v1015_v4 = vsel %vm936_vm4, %v991_v45, %v640_v62  ;;  %v615_v15 = vsel %vm607_vm6, %v5568_v42, %v5567_v6  ;;  %v5569_v2 = vld [vmem:[#allocation51_spill] sm:$0xff]  ;;  %v645_v25 = vsel %vm5384_vm7, %v5571_v51, %v5570_v18  ;;  %v5573_v62 = vld [vmem:[#allocation32_spill] sm:$0xff] }
 0x24a   : > { %1498 = vrot.lane.b32.xlu2 %v3995_v52, %s2833_s25  ;;  %v4001_v50 = vsel %vm955_vm5, %v1017_v46, %v671_v57  ;;  %v4007_v60 = vsel %vm955_vm5, %v1015_v4, %v670_v54  ;;  %v614_v49 = vsel %vm607_vm6, %v5569_v2, %v5568_v42  ;;  %v585_v57 = vsel %vm5390_vm9, %v5574_v0, %v5573_v62  ;;  %v5576_v46 = vld [vmem:[#allocation62_spill] sm:$0xff]  ;;  %v5577_v4 = vld [vmem:[#allocation72_spill] sm:$0xff] }
 0x24b   : > { %5565 = vst [vmem:[#allocation49_spill] sm:$0xff] %v4001_v50  ;;  %1496 = vrot.lane.b32.xlu1 %v4001_v50, %s2833_s25  ;;  %v613_v54 = vsel %vm607_vm6, %v5550_v16, %v5569_v2  ;;  %v644_v45 = vsel %vm5384_vm7, %v5575_v56, %v5571_v51  ;;  %v675_v42 = vsel %vm667_vm8, %v5577_v4, %v5576_v46  ;;  %v5580_v2 = vld [vmem:[#allocation73_spill] sm:$0xff] }
 0x24c   : > { %5566 = vst [vmem:[#allocation35_spill] sm:$0xff] %v4007_v60  ;;  %1494 = vrot.lane.b32.xlu0 %v4007_v60, %s2833_s25  ;;  %v4014_v11 = vpop.permute.xlu2 %1269  ;;  %v1006_v59 = vsel %vm917_vm3, %v585_v57, %v615_v15  ;;  %v643_v16 = vsel %vm5384_vm7, %v5553_v55, %v5575_v56  ;;  %v674_v51 = vsel %vm667_vm8, %v5580_v2, %v5577_v4 }
 0x24d   : > { %v4022_v47 = vpop.permute.xlu1 %1203  ;;  %v1025_v15 = vsel %vm936_vm4, %v1006_v59, %v645_v25  ;;  %v5583_v25 = vld [vmem:[#allocation46_spill] sm:$0xff] }
 0x24e   : > { %5572 = vst [vmem:[#allocation45_spill] sm:$0xff] %v4022_v47  ;;  %v4036_v52 = vpop.permute.xlu0 %1199  ;;  %v5579_v47 = vld [vmem:[#allocation43_spill] sm:$0xff]  ;;  %v4058_v55 = vsel %vm955_vm5, %v1025_v15, %v675_v42  ;;  %v5584_v42 = vld [vmem:[#allocation53_spill] sm:$0xff]  ;;  %v788_v15 = vsel %vm787_vm13, %v3597_v33, %v3559_v19 }
 0x24f   : > { %5578 = vst [vmem:[#allocation57_spill] sm:$0xff] %v4036_v52  ;;  %v584_v26 = vsel %vm5390_vm9, %v5579_v47, %v5574_v0  ;;  %v583_v50 = vsel %vm5390_vm9, %v5556_v17, %v5579_v47  ;;  %v673_v0 = vsel %vm667_vm8, %v5559_v38, %v5580_v2  ;;  %v5581_v38 = vld [vmem:[#allocation74_spill] sm:$0xff]  ;;  %v5585_v2 = vld [vmem:[#allocation65_spill] sm:$0xff] }
 0x250   : > { %v1003_v52 = vsel %vm917_vm3, %v584_v26, %v614_v49  ;;  %v1000_v57 = vsel %vm917_vm3, %v583_v50, %v613_v54  ;;  %v5582_v49 = vld [vmem:[#allocation54_spill] sm:$0xff] }
 0x251   : > { %v1023_v56 = vsel %vm936_vm4, %v1003_v52, %v644_v45  ;;  %v1021_v17 = vsel %vm936_vm4, %v1000_v57, %v643_v16  ;;  %v728_v52 = vsel %vm727_vm10, %v5581_v38, %v3527_v8  ;;  %v1222_v47 = vsel %vm917_vm3, %v5583_v25, %v5582_v49 }
 0x252   : > { %1504 = vrot.lane.b32.xlu2 %v4058_v55, %s2833_s25  ;;  %v4064_v26 = vsel %vm955_vm5, %v1023_v56, %v674_v51  ;;  %v4070_v59 = vsel %vm955_vm5, %v1021_v17, %v673_v0  ;;  %v616_v54 = vsel %vm607_vm6, %v5567_v6, %v5582_v49  ;;  %v758_v45 = vsel %vm757_vm11, %v3563_v28, %v3561_v23  ;;  %v5586_v51 = vld [vmem:[#allocation75_spill] sm:$0xff]  ;;  %v5587_v56 = vld [vmem:[#allocation76_spill] sm:$0xff] }
 0x253   : > { %1502 = vrot.lane.b32.xlu1 %v4064_v26, %s2833_s25  ;;  %v646_v16 = vsel %vm5384_vm7, %v5570_v18, %v5584_v42  ;;  %v698_v0 = vsel %vm697_vm12, %v5586_v51, %v5585_v2  ;;  %v586_v28 = vsel %vm5390_vm9, %v5573_v62, %v5583_v25  ;;  %v676_v18 = vsel %vm667_vm8, %v5576_v46, %v5587_v56 }
 0x254   : > { %1500 = vrot.lane.b32.xlu0 %v4070_v59, %s2833_s25  ;;  %v4077_v50 = vpop.permute.xlu2 %1278  ;;  %v1057_v6 = vsel %vm917_vm3, %v698_v0, %v728_v52  ;;  %v1009_v17 = vsel %vm917_vm3, %v586_v28, %v616_v54  ;;  %v1224_v51 = vsel %vm936_vm4, %v1222_v47, %v5584_v42  ;;  %v849_v54 = vsel %vm847_vm14, %v3676_v53, %v3643_v29  ;;  %v2599_v28 = vld.sshfl [vmem:[#allocation1] sm:$0xff pattern:$0x73625140] }
 0x255   : > { %v4088_v4 = vpop.permute.xlu1 %1248  ;;  %v1083_v38 = vsel %vm936_vm4, %v1057_v6, %v758_v45  ;;  %v1027_v52 = vsel %vm936_vm4, %v1009_v17, %v646_v16  ;;  %vm907_vm7 = vcmask 777216   ;;  %v5590_v45 = vld [vmem:[#allocation79_spill] sm:$0xff]  ;;  %v729_v0 = vsel %vm727_vm10, %v3527_v8, %v3525_v14 }
 0x256   : > { %v4099_v57 = vpop.permute.xlu0 %1211  ;;  %v1250_v33 = vsel %vm5385_vm0, %v5523_v10, %v4088_v4  ;;  %v1284_v62 = vsel %vm917_vm3, %v3617_v32, %v4088_v4  ;;  %v4120_v46 = vsel %vm955_vm5, %v1083_v38, %v788_v15  ;;  %v1226_v10 = vsel %vm955_vm5, %v1224_v51, %v5587_v56 }
 0x257   : > { %5588 = vst [vmem:[#allocation58_spill] sm:$0xff] %v4120_v46  ;;  %v4128_v47 = vsel %vm955_vm5, %v1027_v52, %v676_v18  ;;  %v699_v16 = vsel %vm697_vm12, %v5585_v2, %v5590_v45  ;;  %v759_v15 = vsel %vm757_vm11, %v3561_v23, %v3523_v5  ;;  %v1282_v6 = vsel %vm917_vm3, %v2599_v28, %v1250_v33 }
 0x258   : > { %5589 = vst [vmem:[#allocation28_spill] sm:$0xff] %v4128_v47  ;;  %v819_v18 = vsel %vm817_vm15, %v3647_v21, %v3645_v30  ;;  %v1236_v2 = vsel %vm917_vm3, %v3647_v21, %v3676_v53  ;;  %vm877_vm0 = vcmask 785408   ;;  %v1288_v23 = vsel %vm936_vm4, %v1284_v62, %v3899_v31 }
 0x259   : > { %v879_v17 = vsel %vm877_vm0, %v3674_v40, %v3720_v43  ;;  %v1253_v38 = vsel %vm507_vm1, %v5527_v41, %v3899_v31  ;;  %v909_v51 = vsel %vm907_vm7, %v3861_v58, %v3850_v61  ;;  %v1132_v52 = vsel %vm917_vm3, %v819_v18, %v849_v54 }
 0x25a   : > { %1510 = vrot.lane.b32.xlu2 %v4120_v46, %s2833_s25  ;;  %v1262_v62 = vsel %vm607_vm6, %v5582_v49, %v3951_v48 }
 0x25b   : > { %1508 = vrot.lane.b32.xlu1 %v1226_v10, %s2833_s25 }
 0x25c   : > { %1506 = vrot.lane.b32.xlu0 %v4128_v47, %s2833_s25  ;;  %v4151_v8 = vpop.permute.xlu2 %1337  ;;  %v1286_v47 = vsel %vm936_vm4, %v1282_v6, %v1253_v38  ;;  %v789_v6 = vsel %vm787_vm13, %v3559_v19, %v3611_v37  ;;  %v1157_v38 = vsel %vm936_vm4, %v1132_v52, %v879_v17 }
 0x25d   : > { %v4161_v33 = vpop.permute.xlu1 %1257 }
 0x25e   : > { %v1259_v10 = vsel %vm5390_vm9, %v5583_v25, %v4161_v33  ;;  %v1298_v41 = vsel %vm917_vm3, %v4161_v33, %v3951_v48  ;;  %v1255_v28 = vpop.permute.xlu0 %1254  ;;  %v5592_v25 = vld [vmem:[#allocation77_spill] sm:$0xff] }
 0x25f   : > { %v1295_v46 = vsel %vm917_vm3, %v1259_v10, %v1262_v62  ;;  %v1256_v54 = vsel %vm547_vm2, %v5530_v44, %v1255_v28  ;;  %v4182_v18 = vsel %vm547_vm2, %v1255_v28, %v4151_v8  ;;  %v4185_v49 = vsel %vm955_vm5, %v1288_v23, %v1255_v28  ;;  %v5594_v28 = vld [vmem:[#allocation78_spill] sm:$0xff] }
 0x260   : > { %5591 = vst [vmem:[#allocation36_spill] sm:$0xff] %v4185_v49  ;;  %v730_v21 = vsel %vm727_vm10, %v3525_v14, %v5592_v25  ;;  %v4195_v62 = vsel %vm955_vm5, %v1286_v47, %v1256_v54  ;;  %v1060_v44 = vsel %vm917_vm3, %v699_v16, %v729_v0  ;;  %v760_v23 = vsel %vm757_vm11, %v3523_v5, %v3575_v24 }
 0x261   : > { %5593 = vst [vmem:[#allocation44_spill] sm:$0xff] %v4195_v62  ;;  %v1241_v10 = vsel %vm936_vm4, %v1236_v2, %v3674_v40  ;;  %v4204_v14 = vsel %vm955_vm5, %v1157_v38, %v909_v51  ;;  %v700_v19 = vsel %vm697_vm12, %v5590_v45, %v5594_v28  ;;  %v1085_v17 = vsel %vm936_vm4, %v1060_v44, %v759_v15  ;;  %v5659_v62 = vld [vmem:[#allocation91_spill] sm:$0xff] }
 0x262   : > { %v1245_v47 = vsel %vm955_vm5, %v1241_v10, %v3861_v58  ;;  %1532 = vrot.lane.b32.xlu2 %v4204_v14, %s2833_s25  ;;  %v1063_v5 = vsel %vm917_vm3, %v700_v19, %v730_v21  ;;  %v4216_v16 = vsel %vm955_vm5, %v1085_v17, %v789_v6  ;;  %v790_v15 = vsel %vm787_vm13, %v3611_v37, %v3609_v36 }
 0x263   : > { %1530 = vrot.lane.b32.xlu1 %v1245_v47, %s2833_s25  ;;  %v1087_v45 = vsel %vm936_vm4, %v1063_v5, %v760_v23  ;;  %v820_v21 = vsel %vm817_vm15, %v3645_v30, %v3607_v35  ;;  %v821_v2 = vsel %vm817_vm15, %v3607_v35, %v3657_v39  ;;  %v851_v51 = vsel %vm847_vm14, %v3690_v22, %v3688_v20 }
 0x264   : > { %1512 = vrot.lane.b32.xlu0 %v4216_v16, %s2833_s25  ;;  %v4221_v0 = vpop.permute.xlu2 %1346  ;;  %v850_v54 = vsel %vm847_vm14, %v3643_v29, %v3690_v22  ;;  %v881_v37 = vsel %vm877_vm0, %v3718_v3, %v3686_v7  ;;  %v880_v30 = vsel %vm877_vm0, %v3720_v43, %v3718_v3  ;;  %v911_v38 = vsel %vm907_vm7, %v3716_v12, %v3918_v63 }
 0x265   : > { %v4236_v52 = vpop.permute.xlu1 %1266  ;;  %vm5595_vm2 = vcmask 949248   ;;  %v1138_v3 = vsel %vm917_vm3, %v821_v2, %v851_v51  ;;  %v910_v43 = vsel %vm907_vm7, %v3850_v61, %v3716_v12  ;;  %v731_v5 = vsel %vm727_vm10, %v5592_v25, %v3539_v13  ;;  %v5600_v51 = vld [vmem:[#allocation83_spill] sm:$0xff] }
 0x266   : > { %v1268_v35 = vsel %vm667_vm8, %v5587_v56, %v4236_v52  ;;  %v1264_v6 = vpop.permute.xlu0 %1263  ;;  %vm5596_vm9 = vmmov %vm5595_vm2  ;;  %v1161_v10 = vsel %vm936_vm4, %v1138_v3, %v881_v37  ;;  %v1271_v2 = vsel %vm697_vm12, %v3513_v1, %v4014_v11  ;;  %v5603_v3 = vld [vmem:[#allocation99_spill] sm:$0xff] }
 0x267   : > { %v1265_v29 = vsel %vm5595_vm2, %v5584_v42, %v1264_v6  ;;  %v1302_v22 = vsel %vm936_vm4, %v1298_v41, %v1264_v6  ;;  %v4258_v44 = vsel %vm5596_vm9, %v1264_v6, %v4221_v0  ;;  %v1135_v42 = vsel %vm917_vm3, %v820_v21, %v850_v54 }
 0x268   : > { %v1300_v56 = vsel %vm936_vm4, %v1295_v46, %v1265_v29  ;;  %v4267_v23 = vsel %vm955_vm5, %v1302_v22, %v4236_v52  ;;  %v4271_v41 = vsel %vm955_vm5, %v1087_v45, %v790_v15  ;;  %v1159_v17 = vsel %vm936_vm4, %v1135_v42, %v880_v30  ;;  %v5601_v30 = vld [vmem:[#allocation68_spill] sm:$0xff] }
 0x269   : > { %5597 = vst [vmem:[#allocation56_spill] sm:$0xff] %v4267_v23  ;;  %v4275_v19 = vsel %vm955_vm5, %v1300_v56, %v1268_v35  ;;  %v4281_v12 = vsel %vm955_vm5, %v1161_v10, %v911_v38  ;;  %v4284_v61 = vsel %vm955_vm5, %v1159_v17, %v910_v43  ;;  %v761_v45 = vsel %vm757_vm11, %v3575_v24, %v3573_v27  ;;  %v5602_v35 = vld [vmem:[#allocation90_spill] sm:$0xff] }
 0x26a   : > { %5598 = vst [vmem:[#allocation66_spill] sm:$0xff] %v4275_v19  ;;  %1831 = vrot.lane.b32.xlu2 %v4271_v41, %s2834_s3  ;;  %v701_v24 = vsel %vm697_vm12, %v5594_v28, %v5601_v30  ;;  %v791_v6 = vsel %vm787_vm13, %v3609_v36, %v5602_v35  ;;  %v1280_v43 = vsel %vm787_vm13, %v5603_v3, %v4077_v50  ;;  %vm5609_vm9 = vcmask 1039360  }
 0x26b   : > { %5599 = vst [vmem:[#allocation37_spill] sm:$0xff] %v4281_v12  ;;  %1853 = vrot.lane.b32.xlu1 %v4281_v12, %s2834_s3  ;;  %v1066_v22 = vsel %vm917_vm3, %v701_v24, %v731_v5  ;;  %v5606_v5 = vld [vmem:[#allocation102_spill] sm:$0xff]  ;;  %v5608_v24 = vld [vmem:[#allocation103_spill] sm:$0xff] }
 0x26c   : > { %1851 = vrot.lane.b32.xlu0 %v4284_v61, %s2834_s3  ;;  %v4290_v46 = vpop.permute.xlu2 %1355  ;;  %v1089_v42 = vsel %vm936_vm4, %v1066_v22, %v761_v45  ;;  %v852_v45 = vsel %vm847_vm14, %v3688_v20, %v5606_v5 }
 0x26d   : > { %v4292_v47 = vpop.permute.xlu1 %1275  ;;  %v4337_v10 = vsel %vm955_vm5, %v1089_v42, %v791_v6  ;;  %v822_v6 = vsel %vm817_vm15, %v3657_v39, %v5608_v24 }
 0x26e   : > { %v1277_v15 = vsel %vm757_vm11, %v3599_v34, %v4292_v47  ;;  %v1273_v21 = vpop.permute.xlu0 %1272  ;;  %5605 = vst [vmem:[#allocation52_spill] sm:$0xff] %v4337_v10 }
 0x26f   : > { %v1274_v54 = vsel %vm727_vm10, %v5600_v51, %v1273_v21  ;;  %v1312_v37 = vsel %vm917_vm3, %v4014_v11, %v1273_v21  ;;  %v1357_v25 = vsel %vm727_vm10, %v1273_v21, %v4290_v46  ;;  %v5607_v21 = vld [vmem:[#allocation117_spill] sm:$0xff] }
 0x270   : > { %v1309_v38 = vsel %vm917_vm3, %v1271_v2, %v1274_v54  ;;  %v1316_v29 = vsel %vm936_vm4, %v1312_v37, %v4292_v47  ;;  %v882_v2 = vsel %vm877_vm0, %v3686_v7, %v5607_v21  ;;  %v1141_v7 = vsel %vm917_vm3, %v822_v6, %v852_v45  ;;  %v5617_v6 = vld [vmem:[#allocation82_spill] sm:$0xff] }
 0x271   : > { %v1314_v56 = vsel %vm936_vm4, %v1309_v38, %v1277_v15  ;;  %v4328_v28 = vsel %vm955_vm5, %v1316_v29, %v4077_v50  ;;  %v912_v38 = vsel %vm907_vm7, %v3918_v63, %v3907_v9  ;;  %v5610_v29 = vld [vmem:[#allocation107_spill] sm:$0xff] }
 0x272   : > { %5604 = vst [vmem:[#allocation67_spill] sm:$0xff] %v4328_v28  ;;  %1811 = vrot.lane.b32.xlu2 %v4007_v60, %s2834_s3  ;;  %v4334_v36 = vsel %vm955_vm5, %v1314_v56, %v1280_v43  ;;  %v1163_v56 = vsel %vm936_vm4, %v1141_v7, %v882_v2  ;;  %v5616_v2 = vld [vmem:[#allocation85_spill] sm:$0xff]  ;;  %v5636_v28 = vld [vmem:[#allocation31_spill] sm:$0xff] }
 0x273   : > { %1534 = vrot.lane.b32.xlu1 %v4284_v61, %s2833_s25 }
 0x274   : > { %1833 = vrot.lane.b32.xlu0 %v4337_v10, %s2834_s3  ;;  %v4343_v17 = vpop.permute.xlu2 %1364 }
 0x275   : > { %v1334_v15 = vpop.permute.xlu1 %1333 }
 0x276   : > { %v1335_v54 = vsel %vm507_vm1, %v3899_v31, %v1334_v15  ;;  %v1330_v37 = vpop.permute.xlu0 %1329  ;;  %vm5619_vm1 = vcmask 965632  }
 0x277   : > { %v1331_v20 = vsel %vm5609_vm9, %v4088_v4, %v1330_v37  ;;  %v1379_v22 = vsel %vm917_vm3, %v5610_v29, %v1330_v37  ;;  %v4376_v4 = vsel %vm955_vm5, %v1163_v56, %v912_v38  ;;  %v5618_v38 = vld [vmem:[#allocation97_spill] sm:$0xff]  ;;  %v5622_v56 = vld [vmem:[#allocation118_spill] sm:$0xff] }
 0x278   : > { %v1377_v31 = vsel %vm917_vm3, %v3617_v32, %v1331_v20  ;;  %v1383_v43 = vsel %vm936_vm4, %v1379_v22, %v1334_v15  ;;  %5612 = vst [vmem:[#allocation48_spill] sm:$0xff] %v4376_v4  ;;  %v5614_v32 = vld [vmem:[#allocation86_spill] sm:$0xff]  ;;  %v792_v20 = vsel %vm787_vm13, %v5602_v35, %v5618_v38 }
 0x279   : > { %v1381_v39 = vsel %vm936_vm4, %v1377_v31, %v1335_v54  ;;  %v4371_v63 = vsel %vm955_vm5, %v1383_v43, %v4151_v8  ;;  %v732_v45 = vsel %vm727_vm10, %v3539_v13, %v5614_v32  ;;  %v5615_v8 = vld [vmem:[#allocation49_spill] sm:$0xff]  ;;  %v762_v54 = vsel %vm757_vm11, %v3573_v27, %v5616_v2 }
 0x27a   : > { %5611 = vst [vmem:[#allocation38_spill] sm:$0xff] %v4371_v63  ;;  %1514 = vrot.lane.b32.xlu2 %v4271_v41, %s2833_s25  ;;  %v4380_v42 = vsel %vm955_vm5, %v1381_v39, %v4182_v18  ;;  %v702_v18 = vsel %vm697_vm12, %v5601_v30, %v5617_v6  ;;  %v5642_v63 = vld [vmem:[#allocation27_spill] sm:$0xff] }
 0x27b   : > { %5613 = vst [vmem:[#allocation60_spill] sm:$0xff] %v4380_v42  ;;  %1855 = vrot.lane.b32.xlu1 %v4376_v4, %s2834_s3  ;;  %v1069_v22 = vsel %vm917_vm3, %v702_v18, %v732_v45 }
 0x27c   : > { %1813 = vrot.lane.b32.xlu0 %v5615_v8, %s2834_s3  ;;  %v1374_v15 = vpop.permute.xlu2 %1373  ;;  %v1091_v43 = vsel %vm936_vm4, %v1069_v22, %v762_v54 }
 0x27d   : > { %v1344_v37 = vpop.permute.xlu1 %1343  ;;  %v4409_v35 = vsel %vm955_vm5, %v1091_v43, %v792_v20 }
 0x27e   : > { %v1345_v13 = vsel %vm607_vm6, %v3951_v48, %v1344_v37  ;;  %v1341_v29 = vpop.permute.xlu0 %1340  ;;  %5620 = vst [vmem:[#allocation61_spill] sm:$0xff] %v4409_v35  ;;  %vm1550_vm6 = vcmask 228352  }
 0x27f   : > { %v1342_v7 = vsel %vm5619_vm1, %v4161_v33, %v1341_v29  ;;  %v1393_v27 = vsel %vm917_vm3, %v1341_v29, %v1344_v37  ;;  %v5621_v33 = vld [vmem:[#allocation123_spill] sm:$0xff]  ;;  %v5626_v29 = vld [vmem:[#allocation116_spill] sm:$0xff] }
 0x280   : > { %v1390_v31 = vsel %vm917_vm3, %v1342_v7, %v1345_v13  ;;  %v1397_v30 = vsel %vm936_vm4, %v1393_v27, %v4221_v0  ;;  %v883_v22 = vsel %vm877_vm0, %v5607_v21, %v5626_v29 }
 0x281   : > { %v1395_v48 = vsel %vm936_vm4, %v1390_v31, %v4258_v44  ;;  %v5627_v31 = vld [vmem:[#allocation95_spill] sm:$0xff] }
 0x282   : > { %1835 = vrot.lane.b32.xlu2 %v4409_v35, %s2834_s3  ;;  %v823_v43 = vsel %vm817_vm15, %v5608_v24, %v5627_v31 }
 0x283   : > { %1793 = vrot.lane.b32.xlu1 %v5621_v33, %s2834_s3 }
 0x284   : > { %1791 = vrot.lane.b32.xlu0 %v5622_v56, %s2834_s3  ;;  %v4419_v39 = vpop.permute.xlu2 %1474 }
 0x285   : > { %v1353_v45 = vpop.permute.xlu1 %1352 }
 0x286   : > { %v1354_v0 = vsel %vm697_vm12, %v4014_v11, %v1353_v45  ;;  %v1407_v54 = vsel %vm917_vm3, %v1353_v45, %v4290_v46  ;;  %v1350_v37 = vpop.permute.xlu0 %1349  ;;  %v5625_v46 = vld [vmem:[#allocation111_spill] sm:$0xff] }
 0x287   : > { %v1404_v44 = vsel %vm917_vm3, %v1354_v0, %v1357_v25  ;;  %v1351_v18 = vsel %vm667_vm8, %v4236_v52, %v1350_v37  ;;  %v4429_v20 = vsel %vm955_vm5, %v1397_v30, %v1350_v37  ;;  %v853_v52 = vsel %vm847_vm14, %v5606_v5, %v5625_v46  ;;  %v5628_v30 = vld [vmem:[#allocation115_spill] sm:$0xff] }
 0x288   : > { %5623 = vst [vmem:[#allocation29_spill] sm:$0xff] %v4429_v20  ;;  %v4432_v13 = vsel %vm955_vm5, %v1395_v48, %v1351_v18  ;;  %v913_v48 = vsel %vm907_vm7, %v3907_v9, %v5628_v30  ;;  %v1144_v0 = vsel %vm917_vm3, %v823_v43, %v853_v52  ;;  %v5632_v18 = vld [vmem:[#allocation23_spill] sm:$0xff]  ;;  %vm1871_vm8 = vcmask 687104  }
 0x289   : > { %5624 = vst [vmem:[#allocation39_spill] sm:$0xff] %v4432_v13  ;;  %v1165_v37 = vsel %vm936_vm4, %v1144_v0, %v883_v22  ;;  %v5633_v22 = vld [vmem:[#allocation57_spill] sm:$0xff]  ;;  %v1375_v0 = vsel %vm907_vm7, %v4099_v57, %v1374_v15 }
 0x28a   : > { %1692 = vrot.lane.b32.xlu2 %v4284_v61, %s2835_s22  ;;  %v4471_v9 = vsel %vm955_vm5, %v1165_v37, %v913_v48 }
 0x28b   : > { %1690 = vrot.lane.b32.xlu1 %v4204_v14, %s2835_s22 }
 0x28c   : > { %1536 = vrot.lane.b32.xlu0 %v4281_v12, %s2833_s25  ;;  %v4440_v11 = vpop.permute.xlu2 %1480 }
 0x28d   : > { %v1362_v25 = vpop.permute.xlu1 %1361 }
 0x28e   : > { %v1363_v7 = vsel %vm787_vm13, %v4077_v50, %v1362_v25  ;;  %v1359_v27 = vpop.permute.xlu0 %1358 }
 0x28f   : > { %v1360_v5 = vsel %vm757_vm11, %v4292_v47, %v1359_v27  ;;  %v1411_v45 = vsel %vm936_vm4, %v1407_v54, %v1359_v27  ;;  %v5631_v47 = vld [vmem:[#allocation34_spill] sm:$0xff]  ;;  %v5634_v27 = vld [vmem:[#allocation45_spill] sm:$0xff] }
 0x290   : > { %v1409_v21 = vsel %vm936_vm4, %v1404_v44, %v1360_v5  ;;  %v4462_v50 = vsel %vm955_vm5, %v1411_v45, %v1362_v25 }
 0x291   : > { %5629 = vst [vmem:[#allocation47_spill] sm:$0xff] %v4462_v50  ;;  %v4466_v24 = vsel %vm955_vm5, %v1409_v21, %v1363_v7  ;;  %v1366_v7 = vsel %vm817_vm15, %v5633_v22, %v4343_v17 }
 0x292   : > { %5630 = vst [vmem:[#allocation59_spill] sm:$0xff] %v4466_v24  ;;  %1516 = vrot.lane.b32.xlu2 %v4337_v10, %s2833_s25 }
 0x293   : > { %1857 = vrot.lane.b32.xlu1 %v4471_v9, %s2834_s3 }
 0x294   : > { %1815 = vrot.lane.b32.xlu0 %v5631_v47, %s2834_s3  ;;  %v1487_v54 = vpop.permute.xlu2 %1486 }
 0x295   : > { %v1371_v44 = vpop.permute.xlu1 %1370 }
 0x296   : > { %v1372_v52 = vsel %vm877_vm0, %v5632_v18, %v1371_v44  ;;  %v1368_v25 = vpop.permute.xlu0 %1367 }
 0x297   : > { %v1369_v43 = vsel %vm847_vm14, %v5634_v27, %v1368_v25  ;;  %v1421_v48 = vsel %vm917_vm3, %v4343_v17, %v1368_v25 }
 0x298   : > { %v1418_v5 = vsel %vm917_vm3, %v1366_v7, %v1369_v43  ;;  %v1425_v45 = vsel %vm936_vm4, %v1421_v48, %v1371_v44  ;;  %v5639_v43 = vld [vmem:[#allocation93_spill] sm:$0xff] }
 0x299   : > { %v1423_v21 = vsel %vm936_vm4, %v1418_v5, %v1372_v52  ;;  %v4492_v37 = vsel %vm955_vm5, %v1425_v45, %v1374_v15  ;;  %v5638_v52 = vld [vmem:[#allocation80_spill] sm:$0xff]  ;;  %v763_v48 = vsel %vm757_vm11, %v5616_v2, %v5639_v43  ;;  %v5640_v45 = vld [vmem:[#allocation81_spill] sm:$0xff] }
 0x29a   : > { %5635 = vst [vmem:[#allocation69_spill] sm:$0xff] %v4492_v37  ;;  %1795 = vrot.lane.b32.xlu2 %v5636_v28, %s2834_s3  ;;  %v4497_v23 = vsel %vm955_vm5, %v1423_v21, %v1375_v0  ;;  %v733_v15 = vsel %vm727_vm10, %v5614_v32, %v5638_v52  ;;  %v703_v0 = vsel %vm697_vm12, %v5617_v6, %v5640_v45  ;;  %v5641_v21 = vld [vmem:[#allocation96_spill] sm:$0xff]  ;;  %v5650_v37 = vld [vmem:[#allocation106_spill] sm:$0xff] }
 0x29b   : > { %5637 = vst [vmem:[#allocation40_spill] sm:$0xff] %v4497_v23  ;;  %1672 = vrot.lane.b32.xlu1 %v4271_v41, %s2835_s22  ;;  %v793_v32 = vsel %vm787_vm13, %v5618_v38, %v5641_v21  ;;  %v1072_v49 = vsel %vm917_vm3, %v703_v0, %v733_v15  ;;  %v5645_v0 = vld [vmem:[#allocation110_spill] sm:$0xff] }
 0x29c   : > { %1670 = vrot.lane.b32.xlu0 %v4216_v16, %s2835_s22  ;;  %v4503_v17 = vpop.permute.xlu2 %1492  ;;  %v1093_v20 = vsel %vm936_vm4, %v1072_v49, %v763_v48 }
 0x29d   : > { %v1473_v44 = vpop.permute.xlu1 %1472  ;;  %v4529_v2 = vsel %vm955_vm5, %v1093_v20, %v793_v32  ;;  %v854_v32 = vsel %vm847_vm14, %v5625_v46, %v5645_v0  ;;  %v5651_v46 = vld [vmem:[#allocation33_spill] sm:$0xff] }
 0x29e   : > { %v1471_v25 = vpop.permute.xlu0 %1470  ;;  %v4510_v7 = vsel %vm1550_vm6, %v1473_v44, %v4419_v39  ;;  %v914_v13 = vsel %vm907_vm7, %v5628_v30, %v5651_v46 }
 0x29f   : > { %v4516_v5 = vsel %vm1550_vm6, %v1471_v25, %v1473_v44 }
 0x2a2   : > { %1650 = vrot.lane.b32.xlu2 %v5642_v63, %s2835_s22 }
 0x2a3   : > { %1538 = vrot.lane.b32.xlu1 %v4376_v4, %s2833_s25 }
 0x2a4   : > { %1837 = vrot.lane.b32.xlu0 %v4529_v2, %s2834_s3  ;;  %v1499_v6 = vpop.permute.xlu2 %1498 }
 0x2a5   : > { %v1479_v44 = vpop.permute.xlu1 %1478 }
 0x2a6   : > { %v1477_v25 = vpop.permute.xlu0 %1476  ;;  %v4537_v38 = vsel %vm1550_vm6, %v1479_v44, %v4440_v11 }
 0x2a7   : > { %5643 = vst [vmem:[#allocation70_spill] sm:$0xff] %v4537_v38  ;;  %v4541_v15 = vsel %vm1550_vm6, %v4419_v39, %v1477_v25  ;;  %v4544_v49 = vsel %vm1550_vm6, %v1477_v25, %v1479_v44  ;;  %v5647_v44 = vld [vmem:[#allocation109_spill] sm:$0xff] }
 0x2a8   : > { %5644 = vst [vmem:[#allocation55_spill] sm:$0xff] %v4544_v49  ;;  %v884_v25 = vsel %vm877_vm0, %v5626_v29, %v5647_v44  ;;  %v5652_v49 = vld [vmem:[#allocation119_spill] sm:$0xff] }
 0x2aa   : > { %1817 = vrot.lane.b32.xlu2 %v4070_v59, %s2834_s3 }
 0x2ab   : > { %1694 = vrot.lane.b32.xlu1 %v4281_v12, %s2835_s22  ;;  %v824_v12 = vsel %vm817_vm15, %v5627_v31, %v5650_v37 }
 0x2ac   : > { %1652 = vrot.lane.b32.xlu0 %v4007_v60, %s2835_s22  ;;  %v1505_v20 = vpop.permute.xlu2 %1504 }
 0x2ad   : > { %v1485_v48 = vpop.permute.xlu1 %1484 }
 0x2ae   : > { %v1483_v39 = vpop.permute.xlu0 %1482  ;;  %v4556_v38 = vsel %vm1550_vm6, %v1485_v48, %v1487_v54 }
 0x2af   : > { %5646 = vst [vmem:[#allocation41_spill] sm:$0xff] %v4556_v38  ;;  %v4563_v42 = vsel %vm1550_vm6, %v4440_v11, %v1483_v39  ;;  %v4566_v50 = vsel %vm1550_vm6, %v1483_v39, %v1485_v48  ;;  %v1147_v38 = vsel %vm917_vm3, %v824_v12, %v854_v32  ;;  %v5654_v32 = vld [vmem:[#allocation30_spill] sm:$0xff]  ;;  %v5655_v39 = vld [vmem:[#allocation89_spill] sm:$0xff] }
 0x2b0   : > { %5648 = vst [vmem:[#allocation51_spill] sm:$0xff] %v4563_v42  ;;  %v1167_v29 = vsel %vm936_vm4, %v1147_v38, %v884_v25  ;;  %v734_v25 = vsel %vm727_vm10, %v5638_v52, %v5655_v39  ;;  %v5658_v42 = vld [vmem:[#allocation71_spill] sm:$0xff]  ;;  %v794_v52 = vsel %vm787_vm13, %v5641_v21, %v5659_v62 }
 0x2b1   : > { %5649 = vst [vmem:[#allocation63_spill] sm:$0xff] %v4566_v50  ;;  %v4581_v11 = vsel %vm955_vm5, %v1167_v29, %v914_v13 }
 0x2b2   : > { %1630 = vrot.lane.b32.xlu2 %v5652_v49, %s2835_s22 }
 0x2b3   : > { %1518 = vrot.lane.b32.xlu1 %v4409_v35, %s2833_s25 }
 0x2b4   : > { %1859 = vrot.lane.b32.xlu0 %v4581_v11, %s2834_s3  ;;  %v1511_v31 = vpop.permute.xlu2 %1510 }
 0x2b5   : > { %v4585_v48 = vpop.permute.xlu1 %1490 }
 0x2b6   : > { %v1489_v30 = vpop.permute.xlu0 %1488 }
 0x2b7   : > { %v4588_v12 = vsel %vm1550_vm6, %v1487_v54, %v1489_v30  ;;  %v5657_v30 = vld [vmem:[#allocation92_spill] sm:$0xff] }
 0x2b8   : > { %5653 = vst [vmem:[#allocation64_spill] sm:$0xff] %v4588_v12  ;;  %v764_v12 = vsel %vm757_vm11, %v5639_v43, %v5657_v30 }
 0x2ba   : > { %1797 = vrot.lane.b32.xlu2 %v5654_v32, %s2834_s3 }
 0x2bb   : > { %1674 = vrot.lane.b32.xlu1 %v4337_v10, %s2835_s22  ;;  %v704_v10 = vsel %vm697_vm12, %v5640_v45, %v5658_v42 }
 0x2bc   : > { %1632 = vrot.lane.b32.xlu0 %v5622_v56, %s2835_s22  ;;  %v4596_v13 = vpop.permute.xlu2 %1532  ;;  %v1075_v24 = vsel %vm917_vm3, %v704_v10, %v734_v25  ;;  %v5661_v10 = vld [vmem:[#allocation24_spill] sm:$0xff] }
 0x2bd   : > { %v1497_v38 = vpop.permute.xlu1 %1496  ;;  %v885_v25 = vsel %vm877_vm0, %v5647_v44, %v5661_v10 }
 0x2be   : > { %v4601_v29 = vpop.permute.xlu0 %1494  ;;  %v4604_v54 = vsel %vm1550_vm6, %v1497_v38, %v1499_v6 }
 0x2bf   : > { %5656 = vst [vmem:[#allocation32_spill] sm:$0xff] %v4604_v54  ;;  %v4611_v50 = vsel %vm1550_vm6, %v4601_v29, %v1497_v38  ;;  %v1095_v54 = vsel %vm936_vm4, %v1075_v24, %v764_v12  ;;  %v5660_v38 = vld [vmem:[#allocation104_spill] sm:$0xff]  ;;  %v5662_v12 = vld [vmem:[#allocation105_spill] sm:$0xff] }
 0x2c0   : > { %v4626_v43 = vsel %vm955_vm5, %v1095_v54, %v794_v52  ;;  %v855_v45 = vsel %vm847_vm14, %v5645_v0, %v5660_v38  ;;  %v5663_v54 = vld [vmem:[#allocation25_spill] sm:$0xff] }
 0x2c1   : > { %v915_v52 = vsel %vm907_vm7, %v5651_v46, %v5663_v54 }
 0x2c2   : > { %1654 = vrot.lane.b32.xlu2 %v5615_v8, %s2835_s22  ;;  %v825_v8 = vsel %vm817_vm15, %v5650_v37, %v5662_v12 }
 0x2c3   : > { %1540 = vrot.lane.b32.xlu1 %v4471_v9, %s2833_s25  ;;  %v1150_v19 = vsel %vm917_vm3, %v825_v8, %v855_v45  ;;  %v5669_v45 = vld [vmem:[#allocation88_spill] sm:$0xff] }
 0x2c4   : > { %1839 = vrot.lane.b32.xlu0 %v4626_v43, %s2834_s3  ;;  %v4633_v21 = vpop.permute.xlu2 %1831  ;;  %v1169_v60 = vsel %vm936_vm4, %v1150_v19, %v885_v25  ;;  %v735_v25 = vsel %vm727_vm10, %v5655_v39, %v5669_v45 }
 0x2c5   : > { %v1503_v24 = vpop.permute.xlu1 %1502  ;;  %v4656_v37 = vsel %vm955_vm5, %v1169_v60, %v915_v52 }
 0x2c6   : > { %v1501_v56 = vpop.permute.xlu0 %1500  ;;  %v4645_v0 = vsel %vm1550_vm6, %v1503_v24, %v1505_v20 }
 0x2c7   : > { %5664 = vst [vmem:[#allocation42_spill] sm:$0xff] %v4645_v0  ;;  %v4649_v23 = vsel %vm1550_vm6, %v1499_v6, %v1501_v56  ;;  %v4652_v44 = vsel %vm1550_vm6, %v1501_v56, %v1503_v24  ;;  %v5670_v24 = vld [vmem:[#allocation87_spill] sm:$0xff]  ;;  %v5672_v0 = vld [vmem:[#allocation100_spill] sm:$0xff] }
 0x2c8   : > { %5665 = vst [vmem:[#allocation50_spill] sm:$0xff] %v4649_v23  ;;  %v765_v52 = vsel %vm757_vm11, %v5657_v30, %v5670_v24 }
 0x2c9   : > { %5666 = vst [vmem:[#allocation62_spill] sm:$0xff] %v4652_v44  ;;  %v795_v44 = vsel %vm787_vm13, %v5659_v62, %v5672_v0 }
 0x2ca   : > { %1861 = vrot.lane.b32.xlu2 %v4656_v37, %s2834_s3 }
 0x2cb   : > { %1819 = vrot.lane.b32.xlu1 %v4064_v26, %s2834_s3 }
 0x2cc   : > { %1696 = vrot.lane.b32.xlu0 %v4376_v4, %s2835_s22  ;;  %v4664_v8 = vpop.permute.xlu2 %1811 }
 0x2cd   : > { %v1509_v6 = vpop.permute.xlu1 %1508 }
 0x2ce   : > { %v1507_v46 = vpop.permute.xlu0 %1506 }
 0x2cf   : > { %v4667_v56 = vsel %vm1550_vm6, %v1505_v20, %v1507_v46  ;;  %v4670_v19 = vsel %vm1550_vm6, %v1507_v46, %v1509_v6 }
 0x2d0   : > { %5667 = vst [vmem:[#allocation72_spill] sm:$0xff] %v4667_v56 }
 0x2d1   : > { %5668 = vst [vmem:[#allocation43_spill] sm:$0xff] %v4670_v19  ;;  %v5671_v19 = vld [vmem:[#allocation84_spill] sm:$0xff] }
 0x2d2   : > { %1676 = vrot.lane.b32.xlu2 %v4409_v35, %s2835_s22  ;;  %v705_v56 = vsel %vm697_vm12, %v5658_v42, %v5671_v19  ;;  %v5673_v42 = vld [vmem:[#allocation26_spill] sm:$0xff] }
 0x2d3   : > { %1634 = vrot.lane.b32.xlu1 %v5621_v33, %s2835_s22  ;;  %v1078_v39 = vsel %vm917_vm3, %v705_v56, %v735_v25 }
 0x2d4   : > { %1520 = vrot.lane.b32.xlu0 %v4529_v2, %s2833_s25  ;;  %v4678_v60 = vpop.permute.xlu2 %1514  ;;  %v1097_v35 = vsel %vm936_vm4, %v1078_v39, %v765_v52  ;;  %v5675_v52 = vld [vmem:[#allocation113_spill] sm:$0xff] }
 0x2d5   : > { %v1531_v20 = vpop.permute.xlu1 %1530  ;;  %v4697_v4 = vsel %vm955_vm5, %v1097_v35, %v795_v44  ;;  %v1560_v35 = vsel %vm1550_vm6, %v4585_v48, %v4503_v17  ;;  %v5676_v39 = vld [vmem:[#allocation101_spill] sm:$0xff]  ;;  %v5678_v48 = vld [vmem:[#allocation112_spill] sm:$0xff] }
 0x2d6   : > { %v1513_v6 = vpop.permute.xlu0 %1512  ;;  %v1578_v46 = vsel %vm1550_vm6, %v1531_v20, %v4596_v13 }
 0x2d7   : > { %1952 = vmatpush.bf16.msra.mxu0 %v1578_v46  ;;  %v1569_v30 = vsel %vm1550_vm6, %v1511_v31, %v1513_v6  ;;  %v5674_v31 = vld [vmem:[#allocation108_spill] sm:$0xff]  ;;  %v878_v46 = vsel %vm877_vm0, %v5675_v52, %v3674_v40 }
 0x2d8   : > { %v848_v20 = vsel %vm847_vm14, %v5674_v31, %v3676_v53  ;;  %v908_v53 = vsel %vm907_vm7, %v5678_v48, %v3861_v58  ;;  %v5679_v31 = vld [vmem:[#allocation114_spill] sm:$0xff]  ;;  %v5682_v48 = vld [vmem:[#allocation121_spill] sm:$0xff] }
 0x2d9   : > { %v856_v52 = vsel %vm847_vm14, %v5660_v38, %v5679_v31 }
 0x2da   : > { %1542 = vrot.lane.b32.xlu2 %v4581_v11, %s2833_s25 }
 0x2db   : > { %1841 = vrot.lane.b32.xlu1 %v4697_v4, %s2834_s3  ;;  %1953 = vmatpush.bf16.msra.mxu0 %v1569_v30  ;;  %v5677_v30 = vld [vmem:[#allocation94_spill] sm:$0xff] }
 0x2dc   : > { %1799 = vrot.lane.b32.xlu0 %v5673_v42, %s2834_s3  ;;  %v4706_v62 = vpop.permute.xlu2 %1835  ;;  %v818_v23 = vsel %vm817_vm15, %v5677_v30, %v5676_v39 }
 0x2dd   : > { %v1854_v56 = vpop.permute.xlu1 %1853 }
 0x2de   : > { %v1852_v25 = vpop.permute.xlu0 %1851 }
 0x2df   : > { %1954 = vmatpush.bf16.msra.mxu0 %v1560_v35  ;;  %v1899_v44 = vsel %vm1871_vm8, %v1852_v25, %v1854_v56  ;;  %v1129_v25 = vsel %vm917_vm3, %v818_v23, %v848_v20  ;;  %v5680_v23 = vld [vmem:[#allocation122_spill] sm:$0xff] }
 0x2e0   : > { %1965 = vmatpush.bf16.msra.mxu1 %v1899_v44  ;;  %v1155_v44 = vsel %vm936_vm4, %v1129_v25, %v878_v46  ;;  %v886_v20 = vsel %vm877_vm0, %v5661_v10, %v5680_v23  ;;  %v5681_v46 = vld [vmem:[#allocation98_spill] sm:$0xff] }
 0x2e1   : > { %v1173_v39 = vsel %vm955_vm5, %v1155_v44, %v908_v53  ;;  %v826_v38 = vsel %vm817_vm15, %v5662_v12, %v5681_v46  ;;  %v916_v53 = vsel %vm907_vm7, %v5663_v54, %v5682_v48  ;;  %v5683_v25 = vld [vmem:[#allocation58_spill] sm:$0xff]  ;;  %v1570_v12 = vsel %vm1550_vm6, %v1513_v6, %v4678_v60 }
 0x2e2   : > { %1821 = vrot.lane.b32.xlu2 %v4058_v55, %s2834_s3  ;;  %v736_v54 = vsel %vm727_vm10, %v5669_v45, %v5600_v51  ;;  %v706_v6 = vsel %vm697_vm12, %v5671_v19, %v3513_v1  ;;  %v796_v45 = vsel %vm787_vm13, %v5672_v0, %v5603_v3  ;;  %vm1710_vm10 = vcmask 457728  }
 0x2e3   : > { %1698 = vrot.lane.b32.xlu1 %v4471_v9, %s2835_s22  ;;  %1955 = vmatpush.bf16.msra.mxu0 %v4516_v5 }
 0x2e4   : > { %1656 = vrot.lane.b32.xlu0 %v5631_v47, %s2835_s22  ;;  %v4732_v40 = vpop.permute.xlu2 %1692 }
 0x2e5   : > { %v4734_v35 = vpop.permute.xlu1 %1534 }
 0x2e6   : > { %v1834_v5 = vpop.permute.xlu0 %1833  ;;  %v1579_v58 = vsel %vm1550_vm6, %v4596_v13, %v4734_v35  ;;  %v1153_v13 = vsel %vm917_vm3, %v826_v38, %v856_v52  ;;  %v766_v52 = vsel %vm757_vm11, %v5670_v24, %v3599_v34  ;;  %v5684_v38 = vld [vmem:[#allocation21_spill] sm:$0xff] }
 0x2e7   : > { %1956 = vmatpush.bf16.msra.mxu0 %v1173_v39  ;;  %v1890_v30 = vsel %vm1871_vm8, %v4633_v21, %v1834_v5  ;;  %1978 = vmatpush.bf16.msra.mxu2 %v1579_v58  ;;  %v1171_v10 = vsel %vm936_vm4, %v1153_v13, %v886_v20  ;;  %v5686_v13 = vld [vmem:[#allocation120_spill] sm:$0xff] }
 0x2e8   : > { %1966 = vmatpush.bf16.msra.mxu1 %v1890_v30  ;;  %v4762_v21 = vsel %vm955_vm5, %v1171_v10, %v916_v53  ;;  %v1081_v30 = vsel %vm917_vm3, %v706_v6, %v736_v54  ;;  %v1561_v53 = vsel %vm1550_vm6, %v4503_v17, %v4601_v29  ;;  %v1891_v17 = vsel %vm1871_vm8, %v1834_v5, %v4706_v62 }
 0x2e9   : > { %v1099_v0 = vsel %vm936_vm4, %v1081_v30, %v766_v52  ;;  %v1201_v5 = vsel %vm817_vm15, %v5681_v46, %v5633_v22  ;;  %v1213_v6 = vsel %vm907_vm7, %v5682_v48, %v4099_v57 }
 0x2ea   : > { %1636 = vrot.lane.b32.xlu2 %v5636_v28, %s2835_s22  ;;  %v4796_v19 = vsel %vm955_vm5, %v1099_v0, %v796_v45 }
 0x2eb   : > { %1522 = vrot.lane.b32.xlu1 %v4626_v43, %s2833_s25  ;;  %1957 = vmatpush.bf16.msra.mxu0 %v5683_v25 }
 0x2ec   : > { %1863 = vrot.lane.b32.xlu0 %v4762_v21, %s2834_s3  ;;  %1979 = vmatpush.bf16.msra.mxu2 %v1570_v12  ;;  %v4772_v44 = vpop.permute.xlu2 %1516 }
 0x2ed   : > { %v4777_v39 = vpop.permute.xlu1 %1855 }
 0x2ee   : > { %v1814_v58 = vpop.permute.xlu0 %1813  ;;  %v1900_v20 = vsel %vm1871_vm8, %v1854_v56, %v4777_v39  ;;  %v5685_v56 = vld [vmem:[#allocation22_spill] sm:$0xff] }
 0x2ef   : > { %1958 = vmatpush.bf16.msra.mxu0 %v5684_v38  ;;  %v1881_v24 = vsel %vm1871_vm8, %v4664_v8, %v1814_v58  ;;  %1991 = vmatpush.bf16.msra.mxu3 %v1900_v20 }
 0x2f0   : > { %1967 = vmatpush.bf16.msra.mxu1 %v1881_v24  ;;  %1980 = vmatpush.bf16.msra.mxu2 %v1561_v53  ;;  %v5688_v24 = vld [vmem:[#allocation20_spill] sm:$0xff] }
 0x2f2   : > { %1843 = vrot.lane.b32.xlu2 %v4796_v19, %s2834_s3 }
 0x2f3   : > { %1801 = vrot.lane.b32.xlu1 %v5685_v56, %s2834_s3  ;;  %1959 = vmatpush.bf16.msra.mxu0 %v5686_v13  ;;  %v4879_v13 = vld [vmem:[#allocation7] sm:$0xff] }
 0x2f4   : > { %1678 = vrot.lane.b32.xlu0 %v4529_v2, %s2835_s22  ;;  %1981 = vmatpush.bf16.msra.mxu2 %v4510_v7  ;;  %v4808_v29 = vpop.permute.xlu2 %1795  ;;  %v1205_v7 = vsel %vm847_vm14, %v5679_v31, %v5634_v27 }
 0x2f5   : > { %1992 = vmatpush.bf16.msra.mxu3 %v1891_v17  ;;  %v1794_v8 = vpop.permute.xlu1 %1793  ;;  %v1239_v31 = vsel %vm917_vm3, %v1201_v5, %v1205_v7  ;;  %v1946_v17 = vunpack.c.l.b16 %v4879_v13  ;;  %v5690_v7 = vld [vmem:[#allocation40_spill] sm:$0xff] }
 0x2f6   : > { %v1792_v10 = vpop.permute.xlu0 %1791 }
 0x2f7   : > { %v1872_v25 = vsel %vm1871_vm8, %v1792_v10, %v1794_v8  ;;  %v4886_v10 = vpack.c.b16 %v1946_v17, %v1946_v17 }
 0x2f8   : > { %1968 = vmatpush.bf16.msra.mxu1 %v1872_v25  ;;  %1982 = vmatpush.bf16.msra.mxu2 %v4204_v14  ;;  %v5689_v25 = vld [vmem:[#allocation35_spill] sm:$0xff] }
 0x2f9   : > { %1960 = vmatmul.bf16.vlgmr.msra.gmra.mxu0 %v4886_v10 }
 0x2fa   : > { %1700 = vrot.lane.b32.xlu2 %v4581_v11, %s2835_s22 }
 0x2fb   : > { %1658 = vrot.lane.b32.xlu1 %v4070_v59, %s2835_s22 }
 0x2fc   : > { %1544 = vrot.lane.b32.xlu0 %v4656_v37, %s2833_s25  ;;  %1983 = vmatpush.bf16.msra.mxu2 %v4216_v16  ;;  %v1651_v14 = vpop.permute.xlu2 %1650  ;;  %v1209_v16 = vsel %vm877_vm0, %v5680_v23, %v5632_v18 }
 0x2fd   : > { %v1691_v12 = vpop.permute.xlu1 %1690  ;;  %v1243_v45 = vsel %vm936_vm4, %v1239_v31, %v1209_v16 }
 0x2fe   : > { %v1537_v54 = vpop.permute.xlu0 %1536  ;;  %v1738_v52 = vsel %vm1710_vm10, %v1691_v12, %v4732_v40  ;;  %v4841_v20 = vsel %vm955_vm5, %v1243_v45, %v1213_v6  ;;  %v5692_v12 = vld [vmem:[#allocation118_spill] sm:$0xff] }
 0x2ff   : > { %1969 = vmatpush.bf16.msra.mxu1 %v1738_v52  ;;  %v1580_v46 = vsel %vm1550_vm6, %v4734_v35, %v1537_v54  ;;  %v5687_v35 = vld [vmem:[#allocation28_spill] sm:$0xff] }
 0x300   : > { %1984 = vmatpush.bf16.msra.mxu2 %v5642_v63  ;;  %2004 = vmatpush.bf16.msrb.mxu0 %v1580_v46  ;;  %v1571_v63 = vsel %vm1550_vm6, %v4678_v60, %v4772_v44 }
 0x302   : > { %1524 = vrot.lane.b32.xlu2 %v4697_v4, %s2833_s25 }
 0x303   : > { %1865 = vrot.lane.b32.xlu1 %v4841_v20, %s2834_s3 }
 0x304   : > { %1823 = vrot.lane.b32.xlu0 %v5687_v35, %s2834_s3  ;;  %1985 = vmatpush.bf16.msra.mxu2 %v5652_v49  ;;  %v4851_v23 = vpop.permute.xlu2 %1817  ;;  %v1873_v49 = vsel %vm1871_vm8, %v1794_v8, %v4808_v29 }
 0x305   : > { %2005 = vmatpush.bf16.msrb.mxu0 %v1571_v63  ;;  %v4853_v48 = vpop.permute.xlu1 %1857  ;;  %v5694_v63 = vld [vmem:[#allocation32_spill] sm:$0xff] }
 0x306   : > { %v4855_v30 = vpop.permute.xlu0 %1815 }
 0x307   : > { %v1882_v38 = vsel %vm1871_vm8, %v1814_v58, %v4855_v30  ;;  %1986 = vmatmul.bf16.vlgmr.msra.gmra.mxu2 %v4886_v10 }
 0x308   : > { %1993 = vmatpush.bf16.msra.mxu3 %v1882_v38  ;;  %v5695_v38 = vld [vmem:[#allocation44_spill] sm:$0xff] }
 0x309   : > { %2006 = vmatpush.bf16.msrb.mxu0 %v4611_v50 }
 0x30a   : > { %1803 = vrot.lane.b32.xlu2 %v5688_v24, %s2834_s3 }
 0x30b   : > { %1680 = vrot.lane.b32.xlu1 %v4626_v43, %s2835_s22 }
 0x30c   : > { %1638 = vrot.lane.b32.xlu0 %v5654_v32, %s2835_s22  ;;  %1994 = vmatpush.bf16.msra.mxu3 %v1873_v49  ;;  %v1631_v60 = vpop.permute.xlu2 %1630 }
 0x30d   : > { %2007 = vmatpush.bf16.msrb.mxu0 %v4541_v15  ;;  %v1673_v58 = vpop.permute.xlu1 %1672 }
 0x30e   : > { %v1671_v53 = vpop.permute.xlu0 %1670 }
 0x30f   : > { %v1729_v50 = vsel %vm1710_vm10, %v1671_v53, %v1673_v58 }
 0x310   : > { %1970 = vmatpush.bf16.msra.mxu1 %v1729_v50 }
 0x311   : > { %2008 = vmatpush.bf16.msrb.mxu0 %v4284_v61 }
 0x312   : > { %1660 = vrot.lane.b32.xlu2 %v4064_v26, %s2835_s22 }
 0x313   : > { %1546 = vrot.lane.b32.xlu1 %v4762_v21, %s2833_s25 }
 0x314   : > { %1845 = vrot.lane.b32.xlu0 %v4334_v36, %s2834_s3  ;;  %v4877_v0 = vpop.permute.xlu2 %1797 }
 0x315   : > { %2009 = vmatpush.bf16.msrb.mxu0 %v4271_v41  ;;  %v1539_v15 = vpop.permute.xlu1 %1538  ;;  %v5691_v41 = vld [vmem:[#allocation66_spill] sm:$0xff] }
 0x316   : > { %v4883_v8 = vpop.permute.xlu0 %1837  ;;  %v1581_v61 = vsel %vm1550_vm6, %v1537_v54, %v1539_v15 }
 0x317   : > { %2030 = vmatpush.bf16.msrb.mxu2 %v1581_v61  ;;  %v5696_v61 = vld [vmem:[#allocation55_spill] sm:$0xff] }
 0x319   : > { %2010 = vmatpush.bf16.msrb.mxu0 %v5689_v25  ;;  %v1901_v25 = vsel %vm1871_vm8, %v4777_v39, %v4853_v48  ;;  %v1892_v39 = vsel %vm1871_vm8, %v4706_v62, %v4883_v8 }
 0x31a   : > { %1867 = vrot.lane.b32.xlu2 %v5690_v7, %s2834_s3  ;;  %v5697_v7 = vld [vmem:[#allocation39_spill] sm:$0xff] }
 0x31b   : > { %1825 = vrot.lane.b32.xlu1 %v5691_v41, %s2834_s3 }
 0x31c   : > { %1702 = vrot.lane.b32.xlu0 %v4656_v37, %s2835_s22  ;;  %v4897_v5 = vpop.permute.xlu2 %1654 }
 0x31d   : > { %2011 = vmatpush.bf16.msrb.mxu0 %v5692_v12  ;;  %v1695_v54 = vpop.permute.xlu1 %1694 }
 0x31e   : > { %v1653_v52 = vpop.permute.xlu0 %1652  ;;  %v1739_v31 = vsel %vm1710_vm10, %v4732_v40, %v1695_v54 }
 0x31f   : > { %v1720_v46 = vsel %vm1710_vm10, %v1651_v14, %v1653_v52  ;;  %1995 = vmatpush.bf16.msra.mxu3 %v1739_v31  ;;  %v5693_v14 = vld [vmem:[#allocation59_spill] sm:$0xff]  ;;  %v1721_v12 = vsel %vm1710_vm10, %v1653_v52, %v4897_v5 }
 0x320   : > { %1971 = vmatpush.bf16.msra.mxu1 %v1720_v46  ;;  %2012 = vmatmul.bf16.vlgmr.msrb.gmra.mxu0 %v4886_v10 }
 0x322   : > { %1682 = vrot.lane.b32.xlu2 %v4697_v4, %s2835_s22 }
 0x323   : > { %1640 = vrot.lane.b32.xlu1 %v5673_v42, %s2835_s22 }
 0x324   : > { %1526 = vrot.lane.b32.xlu0 %v4796_v19, %s2833_s25  ;;  %v4909_v6 = vpop.permute.xlu2 %1861 }
 0x325   : > { %v4911_v16 = vpop.permute.xlu1 %1518 }
 0x326   : > { %v4913_v45 = vpop.permute.xlu0 %1859  ;;  %v1572_v40 = vsel %vm1550_vm6, %v4772_v44, %v4911_v16 }
 0x327   : > { %2031 = vmatpush.bf16.msrb.mxu2 %v1572_v40  ;;  %v1229_v40 = vsel %vm917_vm3, %v3513_v1, %v5600_v51  ;;  %v5700_v1 = vld [vmem:[#allocation69_spill] sm:$0xff] }
 0x328   : > { %v1231_v62 = vsel %vm936_vm4, %v1229_v40, %v3599_v34  ;;  %v5701_v51 = vld [vmem:[#allocation49_spill] sm:$0xff] }
 0x329   : > { %v5704_v40 = vld [vmem:[#allocation29_spill] sm:$0xff] }
 0x32a   : > { %1548 = vrot.lane.b32.xlu2 %v4841_v20, %s2833_s25 }
 0x32b   : > { %1847 = vrot.lane.b32.xlu1 %v5693_v14, %s2834_s3  ;;  %2032 = vmatpush.bf16.msrb.mxu2 %v5694_v63  ;;  %v5699_v14 = vld [vmem:[#allocation52_spill] sm:$0xff]  ;;  %v1883_v63 = vsel %vm1871_vm8, %v4855_v30, %v4851_v23  ;;  %v1874_v30 = vsel %vm1871_vm8, %v4808_v29, %v4877_v0  ;;  %v5702_v29 = vld [vmem:[#allocation47_spill] sm:$0xff] }
 0x32c   : > { %1805 = vrot.lane.b32.xlu0 %v5695_v38, %s2834_s3  ;;  %v4926_v49 = vpop.permute.xlu2 %1676 }
 0x32d   : > { %v1675_v53 = vpop.permute.xlu1 %1674 }
 0x32e   : > { %v1633_v50 = vpop.permute.xlu0 %1632  ;;  %v1730_v44 = vsel %vm1710_vm10, %v1673_v58, %v1675_v53 }
 0x32f   : > { %v1711_v17 = vsel %vm1710_vm10, %v1631_v60, %v1633_v50  ;;  %1996 = vmatpush.bf16.msra.mxu3 %v1730_v44  ;;  %2033 = vmatpush.bf16.msrb.mxu2 %v5696_v61  ;;  %v5698_v60 = vld [vmem:[#allocation37_spill] sm:$0xff]  ;;  %v1947_v44 = vunpack.c.h.b16 %v4879_v13 }
 0x330   : > { %1972 = vmatpush.bf16.msra.mxu1 %v1711_v17 }
 0x331   : > { %v4974_v17 = vpack.c.b16 %v1947_v44, %v1947_v44 }
 0x332   : > { %1827 = vrot.lane.b32.xlu2 %v5697_v7, %s2834_s3  ;;  %v5703_v7 = vld [vmem:[#allocation60_spill] sm:$0xff] }
 0x333   : > { %1704 = vrot.lane.b32.xlu1 %v4762_v21, %s2835_s22  ;;  %1997 = vmatpush.bf16.msra.mxu3 %v1721_v12 }
 0x334   : > { %2017 = vmatpush.bf16.msrb.mxu1 %v1901_v25  ;;  %1662 = vrot.lane.b32.xlu0 %v4058_v55, %s2835_s22  ;;  %v4946_v58 = vpop.permute.xlu2 %1542 }
 0x335   : > { %2034 = vmatpush.bf16.msrb.mxu2 %v5698_v60  ;;  %v1541_v31 = vpop.permute.xlu1 %1540  ;;  %1973 = vmatmul.bf16.vlgmr.msra.gmra.mxu1 %v4974_v17 }
 0x336   : > { %v1582_v46 = vsel %vm1550_vm6, %v1539_v15, %v1541_v31  ;;  %v4949_v52 = vpop.permute.xlu0 %1839  ;;  %v1233_v15 = vsel %vm955_vm5, %v1231_v62, %v5603_v3  ;;  %v1583_v25 = vsel %vm1550_vm6, %v1541_v31, %v4946_v58  ;;  %v5707_v62 = vld [vmem:[#allocation38_spill] sm:$0xff] }
 0x337   : > { %2056 = vmatpush.bf16.msra.mxu0 %v1582_v46  ;;  %v1902_v46 = vsel %vm1871_vm8, %v4853_v48, %v4913_v45 }
 0x338   : > { %2018 = vmatpush.bf16.msrb.mxu1 %v1892_v39 }
 0x339   : > { %2035 = vmatpush.bf16.msrb.mxu2 %v5699_v14 }
 0x33a   : > { %1642 = vrot.lane.b32.xlu2 %v5685_v56, %s2835_s22 }
 0x33b   : > { %1528 = vrot.lane.b32.xlu1 %v1233_v15, %s2833_s25 }
 0x33c   : > { %2019 = vmatpush.bf16.msrb.mxu1 %v1883_v63  ;;  %1869 = vrot.lane.b32.xlu0 %v5700_v1, %s2834_s3  ;;  %v4972_v34 = vpop.permute.xlu2 %1821  ;;  %v5706_v63 = vld [vmem:[#allocation70_spill] sm:$0xff] }
 0x33d   : > { %2036 = vmatpush.bf16.msrb.mxu2 %v5701_v51  ;;  %v4976_v3 = vpop.permute.xlu1 %1819 }
 0x33e   : > { %v1697_v61 = vpop.permute.xlu0 %1696 }
 0x33f   : > { %v1740_v13 = vsel %vm1710_vm10, %v1695_v54, %v1697_v61  ;;  %v1731_v54 = vsel %vm1710_vm10, %v1675_v53, %v4926_v49  ;;  %v5705_v53 = vld [vmem:[#allocation50_spill] sm:$0xff] }
 0x340   : > { %2020 = vmatpush.bf16.msrb.mxu1 %v1874_v30 }
 0x341   : > { %2037 = vmatpush.bf16.msrb.mxu2 %v5621_v33 }
 0x342   : > { %1849 = vrot.lane.b32.xlu2 %v5702_v29, %s2834_s3  ;;  %v5713_v29 = vld [vmem:[#allocation67_spill] sm:$0xff] }
 0x343   : > { %1807 = vrot.lane.b32.xlu1 %v5703_v7, %s2834_s3  ;;  %v1885_v7 = vsel %vm1871_vm8, %v4976_v3, %v4972_v34 }
 0x344   : > { %2021 = vmatpush.bf16.msrb.mxu1 %v1740_v13  ;;  %2038 = vmatmul.bf16.vlgmr.msrb.gmra.mxu2 %v4886_v10  ;;  %v4992_v12 = vpop.permute.xlu2 %1636  ;;  %v5709_v13 = vld [vmem:[#allocation61_spill] sm:$0xff] }
 0x345   : > { %2082 = vmatpush.bf16.msra.mxu2 %v1583_v25  ;;  %1684 = vrot.lane.b32.xlu0 %v4796_v19, %s2835_s22  ;;  %v1635_v33 = vpop.permute.xlu1 %1634 }
 0x346   : > { %v1521_v60 = vpop.permute.xlu0 %1520  ;;  %v1712_v39 = vsel %vm1710_vm10, %v1633_v50, %v1635_v33 }
 0x347   : > { %1998 = vmatpush.bf16.msra.mxu3 %v1712_v39  ;;  %v1573_v31 = vsel %vm1550_vm6, %v4911_v16, %v1521_v60  ;;  %v1893_v16 = vsel %vm1871_vm8, %v4883_v8, %v4949_v52  ;;  %v5708_v8 = vld [vmem:[#allocation48_spill] sm:$0xff]  ;;  %v5714_v39 = vld [vmem:[#allocation51_spill] sm:$0xff] }
 0x348   : > { %2022 = vmatpush.bf16.msrb.mxu1 %v1731_v54  ;;  %2057 = vmatpush.bf16.msra.mxu0 %v1573_v31 }
 0x34a   : > { %1829 = vrot.lane.b32.xlu2 %v5704_v40, %s2834_s3  ;;  %1999 = vmatmul.bf16.vlgmr.msra.gmra.mxu3 %v4974_v17 }
 0x34b   : > { %2043 = vmatpush.bf16.msrb.mxu3 %v1902_v46  ;;  %1706 = vrot.lane.b32.xlu1 %v4841_v20, %s2835_s22  ;;  %v1884_v20 = vsel %vm1871_vm8, %v4851_v23, %v4976_v3  ;;  %v1323_v23 = vsel %vm917_vm3, %v5633_v22, %v5634_v27  ;;  %v1713_v22 = vsel %vm1710_vm10, %v1635_v33, %v4992_v12 }
 0x34c   : > { %2058 = vmatpush.bf16.msra.mxu0 %v5705_v53  ;;  %v5011_v48 = vpop.permute.xlu2 %1843  ;;  %v1903_v27 = vsel %vm1871_vm8, %v4913_v45, %v4909_v6 }
 0x34d   : > { %1664 = vrot.lane.b32.xlu0 %v5687_v35, %s2835_s22  ;;  %v5013_v50 = vpop.permute.xlu1 %1841 }
 0x34e   : > { %v1800_v14 = vpop.permute.xlu0 %1799  ;;  %v1894_v45 = vsel %vm1871_vm8, %v4949_v52, %v5013_v50 }
 0x34f   : > { %2044 = vmatpush.bf16.msrb.mxu3 %v1893_v16  ;;  %v1875_v15 = vsel %vm1871_vm8, %v4877_v0, %v1800_v14  ;;  %v1325_v0 = vsel %vm936_vm4, %v1323_v23, %v5632_v18 }
 0x350   : > { %2059 = vmatpush.bf16.msra.mxu0 %v5706_v63  ;;  %v1327_v25 = vsel %vm955_vm5, %v1325_v0, %v4099_v57 }
 0x352   : > { %1809 = vrot.lane.b32.xlu2 %v5707_v62, %s2834_s3 }
 0x353   : > { %2045 = vmatpush.bf16.msrb.mxu3 %v1884_v20  ;;  %1686 = vrot.lane.b32.xlu1 %v4334_v36, %s2835_s22  ;;  %v5715_v20 = vld [vmem:[#allocation42_spill] sm:$0xff] }
 0x354   : > { %2060 = vmatpush.bf16.msra.mxu0 %v5708_v8  ;;  %v5028_v44 = vpop.permute.xlu2 %1700 }
 0x355   : > { %1644 = vrot.lane.b32.xlu0 %v5688_v24, %s2835_s22  ;;  %v1699_v1 = vpop.permute.xlu1 %1698 }
 0x356   : > { %v1657_v51 = vpop.permute.xlu0 %1656  ;;  %v1741_v30 = vsel %vm1710_vm10, %v1697_v61, %v1699_v1  ;;  %v5712_v61 = vld [vmem:[#allocation62_spill] sm:$0xff]  ;;  %v1742_v3 = vsel %vm1710_vm10, %v1699_v1, %v5028_v44 }
 0x357   : > { %2046 = vmatpush.bf16.msrb.mxu3 %v1875_v15  ;;  %v1722_v36 = vsel %vm1710_vm10, %v4897_v5, %v1657_v51 }
 0x358   : > { %2023 = vmatpush.bf16.msrb.mxu1 %v1722_v36  ;;  %2061 = vmatpush.bf16.msra.mxu0 %v5709_v13 }
 0x35a   : > { %1646 = vrot.lane.b32.xlu2 %v5695_v38, %s2835_s22 }
 0x35b   : > { %2047 = vmatpush.bf16.msrb.mxu3 %v1741_v30  ;;  %1708 = vrot.lane.b32.xlu1 %v1327_v25, %s2835_s22 }
 0x35c   : > { %2024 = vmatpush.bf16.msrb.mxu1 %v1713_v22  ;;  %v5051_v18 = vpop.permute.xlu2 %1524  ;;  %2062 = vmatpush.bf16.msra.mxu0 %v5631_v47  ;;  %v5711_v47 = vld [vmem:[#allocation56_spill] sm:$0xff] }
 0x35d   : > { %1666 = vrot.lane.b32.xlu0 %v5691_v41, %s2835_s22  ;;  %v1523_v57 = vpop.permute.xlu1 %1522  ;;  %v5710_v41 = vld [vmem:[#allocation36_spill] sm:$0xff] }
 0x35e   : > { %v5054_v5 = vpop.permute.xlu0 %1863  ;;  %v1574_v38 = vsel %vm1550_vm6, %v1521_v60, %v1523_v57 }
 0x35f   : > { %2083 = vmatpush.bf16.msra.mxu2 %v1574_v38  ;;  %2025 = vmatmul.bf16.vlgmr.msrb.gmra.mxu1 %v4974_v17 }
 0x360   : > { %2069 = vmatpush.bf16.msra.mxu1 %v1903_v27  ;;  %2063 = vmatpush.bf16.msra.mxu0 %v5636_v28 }
 0x362   : > { %1648 = vrot.lane.b32.xlu2 %v5710_v41, %s2835_s22 }
 0x363   : > { %1668 = vrot.lane.b32.xlu1 %v5711_v47, %s2835_s22  ;;  %2084 = vmatpush.bf16.msra.mxu2 %v5712_v61  ;;  %v5718_v47 = vld [vmem:[#allocation41_spill] sm:$0xff] }
 0x364   : > { %2070 = vmatpush.bf16.msra.mxu1 %v1894_v45  ;;  %v5072_v54 = vpop.permute.xlu2 %1803  ;;  %2064 = vmatmul.bf16.vlgmr.msra.gmra.mxu0 %v4886_v10 }
 0x365   : > { %1688 = vrot.lane.b32.xlu0 %v5713_v29, %s2835_s22  ;;  %v1802_v28 = vpop.permute.xlu1 %1801 }
 0x366   : > { %v1679_v52 = vpop.permute.xlu0 %1678  ;;  %v1876_v33 = vsel %vm1871_vm8, %v1800_v14, %v1802_v28 }
 0x367   : > { %v1732_v60 = vsel %vm1710_vm10, %v4926_v49, %v1679_v52  ;;  %2085 = vmatpush.bf16.msra.mxu2 %v5714_v39 }
 0x368   : > { %2071 = vmatpush.bf16.msra.mxu1 %v1885_v7  ;;  %2048 = vmatpush.bf16.msrb.mxu3 %v1732_v60 }
 0x36b   : > { %2086 = vmatpush.bf16.msra.mxu2 %v4471_v9  ;;  %v1575_v9 = vsel %vm1550_vm6, %v1523_v57, %v5051_v18  ;;  %v5717_v57 = vld [vmem:[#allocation72_spill] sm:$0xff] }
 0x36c   : > { %2072 = vmatpush.bf16.msra.mxu1 %v1876_v33  ;;  %v5082_v31 = vpop.permute.xlu2 %1660 }
 0x36d   : > { %v1659_v46 = vpop.permute.xlu1 %1658 }
 0x36e   : > { %v1545_v40 = vpop.permute.xlu0 %1544  ;;  %v1723_v53 = vsel %vm1710_vm10, %v1657_v51, %v1659_v46  ;;  %v1724_v1 = vsel %vm1710_vm10, %v1659_v46, %v5082_v31 }
 0x36f   : > { %v1584_v16 = vsel %vm1550_vm6, %v4946_v58, %v1545_v40  ;;  %2049 = vmatpush.bf16.msrb.mxu3 %v1723_v53  ;;  %2087 = vmatpush.bf16.msra.mxu2 %v4529_v2  ;;  %v5716_v58 = vld [vmem:[#allocation63_spill] sm:$0xff]  ;;  %v5720_v53 = vld [vmem:[#allocation64_spill] sm:$0xff] }
 0x370   : > { %2073 = vmatpush.bf16.msra.mxu1 %v1742_v3  ;;  %2108 = vmatpush.bf16.msrb.mxu0 %v1584_v16  ;;  %v5719_v3 = vld [vmem:[#allocation43_spill] sm:$0xff] }
 0x373   : > { %2088 = vmatpush.bf16.msra.mxu2 %v4070_v59 }
 0x374   : > { %2109 = vmatpush.bf16.msrb.mxu0 %v1575_v9  ;;  %v5093_v14 = vpop.permute.xlu2 %1867 }
 0x375   : > { %v5091_v49 = vpop.permute.xlu1 %1865 }
 0x376   : > { %v1824_v63 = vpop.permute.xlu0 %1823  ;;  %v1905_v22 = vsel %vm1871_vm8, %v5054_v5, %v5091_v49 }
 0x377   : > { %2089 = vmatpush.bf16.msra.mxu2 %v5654_v32  ;;  %v1904_v32 = vsel %vm1871_vm8, %v4909_v6, %v5054_v5 }
 0x378   : > { %2110 = vmatpush.bf16.msrb.mxu0 %v5715_v20 }
 0x37a   : > { %2090 = vmatmul.bf16.vlgmr.msra.gmra.mxu2 %v4886_v10 }
 0x37c   : > { %2111 = vmatpush.bf16.msrb.mxu0 %v5716_v58  ;;  %v5100_v8 = vpop.permute.xlu2 %1682 }
 0x37d   : > { %v1681_v2 = vpop.permute.xlu1 %1680 }
 0x37e   : > { %v1639_v62 = vpop.permute.xlu0 %1638  ;;  %v1733_v59 = vsel %vm1710_vm10, %v1679_v52, %v1681_v2 }
 0x37f   : > { %v1714_v15 = vsel %vm1710_vm10, %v4992_v12, %v1639_v62  ;;  %2074 = vmatpush.bf16.msra.mxu1 %v1733_v59  ;;  %v1895_v12 = vsel %vm1871_vm8, %v5013_v50, %v5011_v48 }
 0x380   : > { %2050 = vmatpush.bf16.msrb.mxu3 %v1714_v15  ;;  %2112 = vmatpush.bf16.msrb.mxu0 %v4581_v11  ;;  %v1886_v11 = vsel %vm1871_vm8, %v4972_v34, %v1824_v63  ;;  %v1961_v15 = vpop.f32.mrf.mxu0 }
 0x383   : > { %2075 = vmatpush.bf16.msra.mxu1 %v1724_v1  ;;  %2051 = vmatmul.bf16.vlgmr.msrb.gmra.mxu3 %v4974_v17 }
 0x384   : > { %2095 = vmatpush.bf16.msra.mxu3 %v1904_v32  ;;  %2113 = vmatpush.bf16.msrb.mxu0 %v4626_v43  ;;  %v1549_v30 = vpop.permute.xlu2 %1548  ;;  %v1877_v43 = vsel %vm1871_vm8, %v1802_v28, %v5072_v54  ;;  %v5179_v32 = vld [vmem:[#allocation8] sm:$0xff] }
 0x385   : > { %v1547_v23 = vpop.permute.xlu1 %1546  ;;  %v2200_v1 = vperm.slane %v5179_v32, 0 }
 0x386   : > { %v1585_v6 = vsel %vm1550_vm6, %v1545_v40, %v1547_v23  ;;  %v1846_v51 = vpop.permute.xlu0 %1845  ;;  %v1586_v36 = vsel %vm1550_vm6, %v1547_v23, %v1549_v30 }
 0x387   : > { %2134 = vmatpush.bf16.msrb.mxu2 %v1585_v6 }
 0x388   : > { %2096 = vmatpush.bf16.msra.mxu3 %v1895_v12  ;;  %2114 = vmatpush.bf16.msrb.mxu0 %v4064_v26  ;;  %v1734_v26 = vsel %vm1710_vm10, %v1681_v2, %v5100_v8 }
 0x38a   : > { %v1987_v12 = vpop.f32.mrf.mxu2 }
 0x38c   : > { %2097 = vmatpush.bf16.msra.mxu3 %v1886_v11  ;;  %2115 = vmatpush.bf16.msrb.mxu0 %v5673_v42  ;;  %v5140_v45 = vpop.permute.xlu2 %1827 }
 0x38d   : > { %v1826_v50 = vpop.permute.xlu1 %1825 }
 0x38e   : > { %v1703_v13 = vpop.permute.xlu0 %1702  ;;  %v1887_v5 = vsel %vm1871_vm8, %v1824_v63, %v1826_v50 }
 0x38f   : > { %v1743_v0 = vsel %vm1710_vm10, %v5028_v44, %v1703_v13  ;;  %2116 = vmatmul.bf16.vlgmr.msrb.gmra.mxu0 %v4886_v10  ;;  %v1896_v44 = vsel %vm1871_vm8, %v5011_v48, %v1846_v51 }
 0x390   : > { %2098 = vmatpush.bf16.msra.mxu3 %v1877_v43  ;;  %2160 = vmatpush.bf16.msra.mxu0 %v1586_v36  ;;  %v1963_v43 = vpop.f32.mrf.mxu0 }
 0x391   : > { %v2206_v43 = vperm.slane %v5179_v32, 6 }
 0x394   : > { %2099 = vmatpush.bf16.msra.mxu3 %v1743_v0  ;;  %v1643_v28 = vpop.permute.xlu2 %1642 }
 0x395   : > { %v1641_v34 = vpop.permute.xlu1 %1640 }
 0x396   : > { %v1527_v25 = vpop.permute.xlu0 %1526  ;;  %v1715_v42 = vsel %vm1710_vm10, %v1639_v62, %v1641_v34  ;;  %v1716_v52 = vsel %vm1710_vm10, %v1641_v34, %v1643_v28 }
 0x397   : > { %2076 = vmatpush.bf16.msra.mxu1 %v1715_v42  ;;  %v1576_v27 = vsel %vm1550_vm6, %v5051_v18, %v1527_v25 }
 0x398   : > { %2100 = vmatpush.bf16.msra.mxu3 %v1734_v26  ;;  %2135 = vmatpush.bf16.msrb.mxu2 %v1576_v27  ;;  %v1989_v26 = vpop.f32.mrf.mxu2 }
 0x39a   : > { %2077 = vmatmul.bf16.vlgmr.msra.gmra.mxu1 %v4974_v17 }
 0x39b   : > { %2121 = vmatpush.bf16.msrb.mxu1 %v1905_v22 }
 0x39c   : > { %2136 = vmatpush.bf16.msrb.mxu2 %v5717_v57  ;;  %v1850_v39 = vpop.permute.xlu2 %1849 }
 0x39d   : > { %v5138_v38 = vpop.permute.xlu1 %1847 }
 0x39e   : > { %v1806_v41 = vpop.permute.xlu0 %1805 }
 0x39f   : > { %2122 = vmatpush.bf16.msrb.mxu1 %v1896_v44  ;;  %v1878_v18 = vsel %vm1871_vm8, %v5072_v54, %v1806_v41  ;;  %v1906_v54 = vsel %vm1871_vm8, %v5091_v49, %v5093_v14 }
 0x3a0   : > { %2137 = vmatpush.bf16.msrb.mxu2 %v5718_v47 }
 0x3a3   : > { %2123 = vmatpush.bf16.msrb.mxu1 %v1887_v5 }
 0x3a4   : > { %2138 = vmatpush.bf16.msrb.mxu2 %v4656_v37  ;;  %v1830_v16 = vpop.permute.xlu2 %1829 }
 0x3a5   : > { %v1705_v48 = vpop.permute.xlu1 %1704  ;;  %v1889_v36 = vsel %vm1871_vm8, %v5140_v45, %v1830_v16 }
 0x3a6   : > { %v1663_v61 = vpop.permute.xlu0 %1662  ;;  %v1744_v29 = vsel %vm1710_vm10, %v1703_v13, %v1705_v48 }
 0x3a7   : > { %2124 = vmatpush.bf16.msrb.mxu1 %v1878_v18  ;;  %v1725_v7 = vsel %vm1710_vm10, %v5082_v31, %v1663_v61  ;;  %v2202_v18 = vperm.slane %v5179_v32, 2 }
 0x3a8   : > { %2101 = vmatpush.bf16.msra.mxu3 %v1725_v7  ;;  %2139 = vmatpush.bf16.msrb.mxu2 %v4697_v4  ;;  %v1897_v4 = vsel %vm1871_vm8, %v1846_v51, %v5138_v38 }
 0x3ab   : > { %2125 = vmatpush.bf16.msrb.mxu1 %v1744_v29 }
 0x3ac   : > { %2102 = vmatpush.bf16.msra.mxu3 %v1716_v52  ;;  %2140 = vmatpush.bf16.msrb.mxu2 %v4058_v55  ;;  %v1888_v55 = vsel %vm1871_vm8, %v1826_v50, %v5140_v45  ;;  %v1810_v59 = vpop.permute.xlu2 %1809 }
 0x3ad   : > { %v1529_v37 = vpop.permute.xlu1 %1528 }
 0x3ae   : > { %v1870_v33 = vpop.permute.xlu0 %1869  ;;  %v1577_v60 = vsel %vm1550_vm6, %v1527_v25, %v1529_v37 }
 0x3af   : > { %2103 = vmatmul.bf16.vlgmr.msra.gmra.mxu3 %v4974_v17  ;;  %2161 = vmatpush.bf16.msra.mxu0 %v1577_v60 }
 0x3b0   : > { %2147 = vmatpush.bf16.msrb.mxu3 %v1906_v54  ;;  %2141 = vmatpush.bf16.msrb.mxu2 %v5685_v56 }
 0x3b3   : > { %2162 = vmatpush.bf16.msra.mxu0 %v5719_v3  ;;  %2142 = vmatmul.bf16.vlgmr.msrb.gmra.mxu2 %v4886_v10 }
 0x3b4   : > { %2148 = vmatpush.bf16.msrb.mxu3 %v1897_v4  ;;  %v1647_v34 = vpop.permute.xlu2 %1646 }
 0x3b5   : > { %v1808_v31 = vpop.permute.xlu1 %1807 }
 0x3b6   : > { %v1879_v40 = vsel %vm1871_vm8, %v1806_v41, %v1808_v31  ;;  %v1880_v44 = vsel %vm1871_vm8, %v1808_v31, %v1810_v59  ;;  %v2013_v41 = vpop.f32.mrf.mxu0  ;;  %v2204_v59 = vperm.slane %v5179_v32, 4 }
 0x3b7   : > { %v1685_v46 = vpop.permute.xlu0 %1684  ;;  %2163 = vmatpush.bf16.msra.mxu0 %v5720_v53 }
 0x3b8   : > { %2149 = vmatpush.bf16.msrb.mxu3 %v1888_v55  ;;  %v1735_v56 = vsel %vm1710_vm10, %v5100_v8, %v1685_v46  ;;  %v1907_v8 = vsel %vm1871_vm8, %v5093_v14, %v1870_v33  ;;  %v2201_v14 = vperm.slane %v5179_v32, 1 }
 0x3b9   : > { %2126 = vmatpush.bf16.msrb.mxu1 %v1735_v56  ;;  %v2203_v56 = vperm.slane %v5179_v32, 3 }
 0x3bb   : > { %2164 = vmatpush.bf16.msra.mxu0 %v4762_v21 }
 0x3bc   : > { %2150 = vmatpush.bf16.msrb.mxu3 %v1879_v40  ;;  %v1649_v37 = vpop.permute.xlu2 %1648 }
 0x3bd   : > { %v1707_v9 = vpop.permute.xlu1 %1706  ;;  %v1719_v3 = vsel %vm1710_vm10, %v1647_v34, %v1649_v37 }
 0x3be   : > { %v1745_v63 = vsel %vm1710_vm10, %v1705_v48, %v1707_v9  ;;  %v2015_v54 = vpop.f32.mrf.mxu0 }
 0x3bf   : > { %v1665_v49 = vpop.permute.xlu0 %1664  ;;  %2165 = vmatpush.bf16.msra.mxu0 %v4796_v19  ;;  %v1974_v19 = vpop.f32.mrf.mxu1 }
 0x3c0   : > { %v1726_v20 = vsel %vm1710_vm10, %v1663_v61, %v1665_v49  ;;  %2151 = vmatpush.bf16.msrb.mxu3 %v1745_v63 }
 0x3c1   : > { %2127 = vmatpush.bf16.msrb.mxu1 %v1726_v20 }
 0x3c3   : > { %2166 = vmatpush.bf16.msra.mxu0 %v5687_v35  ;;  %v1975_v35 = vadd.f32 %v1974_v19, %v1961_v15 }
 0x3c5   : > { %v1687_v58 = vpop.permute.xlu1 %1686  ;;  %v2218_v23 = vmul.f32 %v2200_v1, %v1975_v35 }
 0x3c6   : > { %v1736_v62 = vsel %vm1710_vm10, %v1685_v46, %v1687_v58 }
 0x3c7   : > { %v1645_v2 = vpop.permute.xlu0 %1644  ;;  %2152 = vmatpush.bf16.msrb.mxu3 %v1736_v62  ;;  %2167 = vmatpush.bf16.msra.mxu0 %v5688_v24  ;;  %v1898_v24 = vsel %vm1871_vm8, %v5138_v38, %v1850_v39  ;;  %v1976_v50 = vpop.f32.mrf.mxu1 }
 0x3c8   : > { %v1717_v21 = vsel %vm1710_vm10, %v1643_v28, %v1645_v2  ;;  %v1718_v27 = vsel %vm1710_vm10, %v1645_v2, %v1647_v34  ;;  %v2039_v47 = vpop.f32.mrf.mxu2 }
 0x3c9   : > { %2128 = vmatpush.bf16.msrb.mxu1 %v1717_v21 }
 0x3ca   : > { %2168 = vmatmul.bf16.vlgmr.msra.gmra.mxu0 %v4886_v10  ;;  %v2237_v10 = vmul.f32 %v2218_v23, %v2218_v23 }
 0x3cc   : > { %2129 = vmatmul.bf16.vlgmr.msrb.gmra.mxu1 %v4974_v17 }
 0x3cd   : > { %2173 = vmatpush.bf16.msra.mxu1 %v1907_v8  ;;  %v2000_v6 = vpop.f32.mrf.mxu3  ;;  %v1709_v22 = vpop.permute.xlu1 %1708 }
 0x3ce   : > { %v2001_v11 = vadd.f32 %v2000_v6, %v1987_v12  ;;  %v1746_v45 = vsel %vm1710_vm10, %v1707_v9, %v1709_v22 }
 0x3cf   : > { %v1667_v51 = vpop.permute.xlu0 %1666 }
 0x3d0   : > { %v1727_v30 = vsel %vm1710_vm10, %v1665_v49, %v1667_v51  ;;  %v2186_v13 = vpack.c.bf16 %v2001_v11, %v1975_v35  ;;  %v2219_v0 = vmul.f32 %v2201_v14, %v2001_v11  ;;  %v2041_v4 = vpop.f32.mrf.mxu2 }
 0x3d1   : > { %2174 = vmatpush.bf16.msra.mxu1 %v1898_v24  ;;  %2153 = vmatpush.bf16.msrb.mxu3 %v1727_v30 }
 0x3d2   : > { %2191 = vst [vmem:[%s5191_s29] sm:$0xff] %v2186_v13  ;;  %v2227_v25 = vadd.f32 %v2219_v0, %v2218_v23  ;;  %v2238_v42 = vmul.f32 %v2219_v0, %v2219_v0 }
 0x3d4   : > { %v2246_v57 = vadd.f32 %v2238_v42, %v2237_v10 }
 0x3d5   : > { %2175 = vmatpush.bf16.msra.mxu1 %v1889_v36  ;;  %2154 = vmatpush.bf16.msrb.mxu3 %v1718_v27  ;;  %v2002_v38 = vpop.f32.mrf.mxu3  ;;  %v1669_v29 = vpop.permute.xlu1 %1668  ;;  %v2205_v36 = vperm.slane %v5179_v32, 5 }
 0x3d6   : > { %v1728_v52 = vsel %vm1710_vm10, %v1667_v51, %v1669_v29 }
 0x3d7   : > { %v1689_v5 = vpop.permute.xlu0 %1688 }
 0x3d8   : > { %2155 = vmatmul.bf16.vlgmr.msrb.gmra.mxu3 %v4974_v17  ;;  %v1737_v48 = vsel %vm1710_vm10, %v1687_v58, %v1689_v5 }
 0x3d9   : > { %2176 = vmatpush.bf16.msra.mxu1 %v1880_v44 }
 0x3dc   : > { %v2026_v61 = vpop.f32.mrf.mxu1 }
 0x3dd   : > { %2177 = vmatpush.bf16.msra.mxu1 %v1746_v45  ;;  %v2027_v7 = vadd.f32 %v2026_v61, %v2013_v41  ;;  %v2598_v61 = vld [vmem:[#allocation8 + $0x8] ss:$0 sm:$0xff] }
 0x3df   : > { %v2220_v28 = vmul.f32 %v2202_v18, %v2027_v7 }
 0x3e1   : > { %2178 = vmatpush.bf16.msra.mxu1 %v1737_v48  ;;  %v2228_v33 = vadd.f32 %v2227_v25, %v2220_v28  ;;  %v2239_v60 = vmul.f32 %v2220_v28, %v2220_v28  ;;  %v2065_v31 = vpop.f32.mrf.mxu0 }
 0x3e3   : > { %v2247_v39 = vadd.f32 %v2246_v57, %v2239_v60 }
 0x3e4   : > { %v2028_v55 = vpop.f32.mrf.mxu1 }
 0x3e5   : > { %2179 = vmatpush.bf16.msra.mxu1 %v1728_v52 }
 0x3e9   : > { %2180 = vmatpush.bf16.msra.mxu1 %v1719_v3  ;;  %v2067_v46 = vpop.f32.mrf.mxu0 }
 0x3ec   : > { %2181 = vmatmul.bf16.vlgmr.msra.gmra.mxu1 %v4974_v17 }
 0x3fd   : > { %v2091_v40 = vpop.f32.mrf.mxu2 }
 0x405   : > { %v2093_v16 = vpop.f32.mrf.mxu2 }
 0x406   : > { %v2052_v53 = vpop.f32.mrf.mxu3 }
 0x407   : > { %v2053_v9 = vadd.f32 %v2052_v53, %v2039_v47  ;;  %v2207_v47 = vperm.slane %v5179_v32, 7 }
 0x409   : > { %v2187_v49 = vpack.c.bf16 %v2053_v9, %v2027_v7  ;;  %v2221_v63 = vmul.f32 %v2203_v56, %v2053_v9 }
 0x40b   : > { %2192 = vst [vmem:[%s5191_s29 + $0x8] sm:$0xff] %v2187_v49  ;;  %v2229_v20 = vadd.f32 %v2228_v33, %v2221_v63  ;;  %v2240_v58 = vmul.f32 %v2221_v63, %v2221_v63 }
 0x40c   : > { %v2117_v8 = vpop.f32.mrf.mxu0 }
 0x40d   : > { %v2248_v2 = vadd.f32 %v2247_v39, %v2240_v58 }
 0x40e   : > { %v2054_v62 = vpop.f32.mrf.mxu3 }
 0x414   : > { %v2119_v24 = vpop.f32.mrf.mxu0 }
 0x417   : > { %v2078_v21 = vpop.f32.mrf.mxu1 }
 0x418   : > { %v2079_v17 = vadd.f32 %v2078_v21, %v2065_v31 }
 0x41a   : > { %v2222_v15 = vmul.f32 %v2204_v59, %v2079_v17 }
 0x41c   : > { %v2230_v19 = vadd.f32 %v2229_v20, %v2222_v15  ;;  %v2241_v35 = vmul.f32 %v2222_v15, %v2222_v15 }
 0x41e   : > { %v2249_v1 = vadd.f32 %v2248_v2, %v2241_v35 }
 0x41f   : > { %v2080_v12 = vpop.f32.mrf.mxu1 }
 0x432   : > { %v2104_v23 = vpop.f32.mrf.mxu3 }
 0x433   : > { %v2105_v14 = vadd.f32 %v2104_v23, %v2091_v40 }
 0x435   : > { %v2188_v6 = vpack.c.bf16 %v2105_v14, %v2079_v17  ;;  %v2223_v10 = vmul.f32 %v2205_v36, %v2105_v14 }
 0x436   : > { %v2143_v51 = vpop.f32.mrf.mxu2 }
 0x437   : > { %2193 = vst [vmem:[%s5191_s29 + $0x10] sm:$0xff] %v2188_v6  ;;  %v2242_v0 = vmul.f32 %v2223_v10, %v2223_v10  ;;  %v2231_v34 = vadd.f32 %v2230_v19, %v2223_v10 }
 0x439   : > { %v2250_v42 = vadd.f32 %v2249_v1, %v2242_v0 }
 0x43a   : > { %v2106_v11 = vpop.f32.mrf.mxu3 }
 0x43e   : > { %v2145_v30 = vpop.f32.mrf.mxu2 }
 0x447   : > { %v2169_v50 = vpop.f32.mrf.mxu0 }
 0x449   : > { %v2130_v13 = vpop.f32.mrf.mxu1 }
 0x44a   : > { %v2131_v26 = vadd.f32 %v2130_v13, %v2117_v8 }
 0x44c   : > { %v2224_v25 = vmul.f32 %v2206_v43, %v2131_v26 }
 0x44e   : > { %v2232_v22 = vadd.f32 %v2231_v34, %v2224_v25  ;;  %v2243_v27 = vmul.f32 %v2224_v25, %v2224_v25 }
 0x44f   : > { %v2171_v57 = vpop.f32.mrf.mxu0 }
 0x450   : > { %v2251_v44 = vadd.f32 %v2250_v42, %v2243_v27 }
 0x451   : > { %v2132_v38 = vpop.f32.mrf.mxu1 }
 0x45b   : > { %v2156_v45 = vpop.f32.mrf.mxu3 }
 0x45c   : > { %v2157_v41 = vadd.f32 %v2156_v45, %v2143_v51 }
 0x45e   : > { %v2189_v5 = vpack.c.bf16 %v2157_v41, %v2131_v26  ;;  %v2225_v18 = vmul.f32 %v2207_v47, %v2157_v41 }
 0x460   : > { %2194 = vst [vmem:[%s5191_s29 + $0x18] sm:$0xff] %v2189_v5  ;;  %v2244_v7 = vmul.f32 %v2225_v18, %v2225_v18  ;;  %v2233_v52 = vadd.f32 %v2232_v22, %v2225_v18 }
 0x462   : > { %v2252_v60 = vadd.f32 %v2251_v44, %v2244_v7 }
 0x463   : > { %v2158_v48 = vpop.f32.mrf.mxu3 }
 0x469   : > { %v2182_v29 = vpop.f32.mrf.mxu1 }
 0x46a   : > { %v2183_v28 = vadd.f32 %v2182_v29, %v2169_v50 }
 0x46c   : > { %v2190_v54 = vpack.c.bf16 %v2183_v28, %v2183_v28  ;;  %v2226_v32 = vmul.f32 %v2598_v61, %v2183_v28 }
 0x46e   : > { %2195 = vst [vmem:[%s5191_s29 + $0x20] sm:$0xf] %v2190_v54  ;;  %v2245_v37 = vmul.f32 %v2226_v32, %v2226_v32  ;;  %v2234_v33 = vadd.f32 %v2233_v52, %v2226_v32 }
 0x46f   : > { %2747 = shalt.err (!%p2744_p0)
}
 0x470   : > { %2503 = dma.vmem_to_hbm [thread:$0]  (%p2942_p7), %s2294_s9, 576, %s2296_s11, %s2269_s12   ;;  %2235 = vadd.xlane.f32.xlu0 %v2234_v33  ;;  %v2253_v4 = vadd.f32 %v2252_v60, %v2245_v37  ;;  %vm2262_vm0 = vcmask 15360   ;;  %v2836_v3 = vmov 0.0   ;;  %vm2256_vm3 = vcmask 7168  }
 0x471   : > { %v2184_v39 = vpop.f32.mrf.mxu1  ;;  %p393_p3 = scmp.lt.s32.totalorder %s2806_s21, 1 }
 0x472   : > { %2254 = vadd.xlane.f32.xlu1 %v2253_v4 }
 0x473   : > { %s5731_s21 = smov (!%p393_p3, %s2806_s21), 1 }
 0x474   : > { %s2480_s2 = sshll.u32 %s5731_s21, 3 }
 0x475   : > { %s399_s3 = scalar_lea.vmem %s5261_s5, %s2480_s2 }
 0x476   : > { %2263 = vst.msk [vmem:[%s399_s3] sm:$0xff] %vm2262_vm0, %v2836_v3 }
 0x47d   : > { %v2264_v55 = vld [vmem:[%s399_s3] sm:$0xff] }
 0x4e3   : > { %v2236_v31 = vpop.xlane.xlu0 %2235 }
 0x4e5   : > { %v2255_v46 = vpop.xlane.xlu1 %2254 }
 0x4e6   : > { %v2257_v40 = vsel %vm2256_vm3, %v2236_v31, %v2255_v46 }
 0x4e7   : > { %v2265_v56 = vadd.f32 %v2264_v55, %v2257_v40 }
 0x4e9   : > { %2267 = vst.msk [vmem:[%s399_s3] sm:$0xff] %vm2262_vm0, %v2265_v56 }
 0x4ea PF: > { %s2310_s22 = sand.u32 1, %s2794_s18   ;;  %p2520_p5 = pnand %p2474_p9, %p2912_p6 }
 0x4eb   : > { %s2311_s21 = scalar_lea.sflag [#allocation4], %s2310_s22 }
 0x4ec   : > { %p2521_p7 = pneg %p2520_p5 }
 0x4ee   : > { %2789 = dma.done.wait (%p2521_p7), %s2311_s21, 576  }
 0x4ef   : > { %2791 = vsyncadd (%p2521_p7), %s2311_s21, 4294966720  ;;  %s26_s23 = sadd.s32 1, %s2814_s23   ;;  %s5722_s6 = sld [smem:[#allocation19_spill]] }
 0x4f0   : > { %p23_p10 = scmp.ge.s32.totalorder %s26_s23, 4   ;;  %s5723_s21 = sld [smem:[#allocation16_spill]] }
 0x4f1   : > { %s5724_s22 = sld [smem:[#allocation18_spill]]  ;;  %s5725_s18 = smov %s2798_s19 }
 0x4f2   : > { %s5726_s19 = smov %s2802_s20  ;;  %25 = sbr.rel (!%p23_p10) target bundleno = 12 (0xc), region = 121 }
 0x4f5   : > { %s5727_s20 = smov %s5722_s6 }
 0x4f7   :  { %2327 = vsyncpa [#allocation3], 1 }
 0x4f8   :  { %2329 = vsyncpa [#allocation3 + $0x1], 1 }
 0x4f9   :  { %2330 = vsyncpa [#allocation6], 1 }
 0x4fa   :  { %2332 = vsyncpa [#allocation6 + $0x1], 1 }
 0x4fb   :  { %2333 = vsyncpa [#allocation9], 1 }
 0x4fc   :  { %2334 = vsyncpa [#allocation4], 1 }
 0x4fd   :  { %2336 = vsyncpa [#allocation4 + $0x1], 1 }

</bundles_post_ra>
